<compile_context>
chip_gen: v5e
topology: v5e:2x2
jax: 0.10.0
libtpu: 0.0.40
codegen_flags: <defaults>
</compile_context>

<pallas_src>
import functools
import math

import jax
import jax.numpy as jnp
from jax.experimental import pallas as pl
from jax.experimental.pallas import tpu as pltpu

LANE = 128       # TPU lane width; every kernel last dim is padded to this
LN_EPS = 1e-5


def _round_up(n, m):
    return ((n + m - 1) // m) * m


# ---------------------------------------------------------------------------
# Fused whole-model kernel (one grid step = one batch element)
# ---------------------------------------------------------------------------

def _transformer_kernel(
    src_ref, tgt_ref, mask_ref,
    e_wqkv, e_wo, e_w1, e_w2, e_bqkv, e_b1, e_vecs,
    d_sa_wqkv, d_sa_wo, d_ca_wq, d_ca_wkv, d_ca_wo, d_w1, d_w2,
    d_sa_bqkv, d_ca_bkv, d_b1, d_vecs,
    fc_w, fc_b,
    out_ref,
    *, n_enc, n_dec, n_head, d_model, d_head, dp, scale):

    f32 = jnp.float32
    bf16 = jnp.bfloat16

    # Hoisted once and reused by every LayerNorm and every head mask
    # (JAX does not CSE broadcast_in_dim).
    col = jax.lax.broadcasted_iota(jnp.int32, (1, dp), 1)
    attn_mask_xattn = mask_ref[...]                      # (L, S) f32, loaded once

    def layer_norm(y, gamma, beta):
        # LayerNorm over the first d_model lanes; pad lanes of y are zero and
        # gamma/beta are zero there, so the output stays zero-padded.
        inv_d = 1.0 / float(d_model)
        mean = jnp.sum(y, axis=-1, keepdims=True) * inv_d
        diff = y - mean
        dvalid = jnp.where(col < d_model, diff, 0.0)
        var = jnp.sum(dvalid * dvalid, axis=-1, keepdims=True) * inv_d
        return diff * jax.lax.rsqrt(var + LN_EPS) * gamma + beta

    def mha(x_res, q, k, v, wo, bo, attn_mask):
        """Multi-head attention + output projection + residual.

        q: (Lq, dp), k/v: (Lk, dp) with head h occupying lanes
        [h*d_head, (h+1)*d_head).  Per-head extraction is done by masking K/V
        lanes (contraction over zeroed lanes contributes nothing), so no
        reshapes / non-aligned lane slices are needed.  Each head's context
        lands in its own lanes of a (Lq, dp) accumulator -> one compact bf16
        output-projection matmul.
        """
        qb = q.astype(bf16)                              # hoisted out of head loop
        ctx = None
        for h in range(n_head):                          # static unroll (n_head=4)
            lo, hi = h * d_head, (h + 1) * d_head
            hm = jnp.logical_and(col >= lo, col < hi)    # (1, dp)
            kh = jnp.where(hm, k, 0.0).astype(bf16)      # (Lk, dp)
            vh = jnp.where(hm, v, 0.0).astype(bf16)      # (Lk, dp)
            s = jax.lax.dot_general(qb, kh, (((1,), (1,)), ((), ())),
                                    preferred_element_type=f32) * scale
            if attn_mask is not None:
                s = s + attn_mask
            s = s - jnp.max(s, axis=-1, keepdims=True)
            p = jnp.exp(s)
            p = p * pl.reciprocal(jnp.sum(p, axis=-1, keepdims=True), approx=True)
            c = jnp.dot(p.astype(bf16), vh, preferred_element_type=f32)  # (Lq, dp)
            ctx = c if ctx is None else ctx + c
        return jnp.dot(ctx.astype(bf16), wo, preferred_element_type=f32) + bo + x_res

    def qkv_proj(x, wqkv, bqkv):
        qkv = jnp.dot(x.astype(bf16), wqkv, preferred_element_type=f32) + bqkv
        return qkv[:, :dp], qkv[:, dp:2 * dp], qkv[:, 2 * dp:]

    def ffn(x, w1, b1, w2, b2):
        h = jnp.dot(x.astype(bf16), w1, preferred_element_type=f32) + b1
        h = jnp.maximum(h, 0.0)
        return jnp.dot(h.astype(bf16), w2, preferred_element_type=f32) + b2 + x

    # ------------------------------ encoder -------------------------------
    x = src_ref[0]                                       # (S, dp) f32
    for i in range(n_enc):                               # static unroll
        vecs = e_vecs[i]                                 # (6, dp) f32
        bo, b2 = vecs[0:1], vecs[1:2]
        g1, be1, g2, be2 = vecs[2:3], vecs[3:4], vecs[4:5], vecs[5:6]
        q, k, v = qkv_proj(x, e_wqkv[i], e_bqkv[i])
        x = layer_norm(mha(x, q, k, v, e_wo[i], bo, None), g1, be1)
        x = layer_norm(ffn(x, e_w1[i], e_b1[i], e_w2[i], b2), g2, be2)
    memory = x                                           # (S, dp) stays in VMEM/vregs

    # ------------------------------ decoder -------------------------------
    # TODO(synk): the (L, S) mask is applied only to decoder cross-attention
    # (memory mask); decoder self-attention is unmasked, as in the reference wrapper.
    y = tgt_ref[0]                                       # (L, dp) f32
    for i in range(n_dec):                               # static unroll
        vecs = d_vecs[i]                                 # (10, dp) f32
        sa_bo, ca_bq, ca_bo, b2 = vecs[0:1], vecs[1:2], vecs[2:3], vecs[3:4]
        g1, be1 = vecs[4:5], vecs[5:6]
        g2, be2 = vecs[6:7], vecs[7:8]
        g3, be3 = vecs[8:9], vecs[9:10]
        # self-attention (fused qkv)
        q, k, v = qkv_proj(y, d_sa_wqkv[i], d_sa_bqkv[i])
        y = layer_norm(mha(y, q, k, v, d_sa_wo[i], sa_bo, None), g1, be1)
        # cross-attention on encoder memory (separate wq, fused wkv)
        qc = jnp.dot(y.astype(bf16), d_ca_wq[i], preferred_element_type=f32) + ca_bq
        kv = jnp.dot(memory.astype(bf16), d_ca_wkv[i],
                     preferred_element_type=f32) + d_ca_bkv[i]
        kc, vc = kv[:, :dp], kv[:, dp:]
        y = layer_norm(mha(y, qc, kc, vc, d_ca_wo[i], ca_bo, attn_mask_xattn), g2, be2)
        # feed-forward
        y = layer_norm(ffn(y, d_w1[i], d_b1[i], d_w2[i], b2), g3, be3)

    # ------------------------------ LM head -------------------------------
    out_ref[0] = (jnp.dot(y.astype(bf16), fc_w[...],
                          preferred_element_type=f32) + fc_b[...])


# ---------------------------------------------------------------------------
# pallas_call wrapper
# ---------------------------------------------------------------------------

def fused_transformer(src, tgt, mask, params, cfg):
    B, S, Dp = src.shape
    L = tgt.shape[1]
    Vp = params["fc_w"].shape[1]
    d_head = cfg["d_model"] // cfg["n_head"]

    kernel = functools.partial(
        _transformer_kernel,
        n_enc=cfg["n_enc"], n_dec=cfg["n_dec"], n_head=cfg["n_head"],
        d_model=cfg["d_model"], d_head=d_head, dp=Dp,
        scale=1.0 / math.sqrt(d_head))

    def whole(shape):
        # Full-array block, same block index for every grid step (DMA'd once).
        if len(shape) == 2:
            return pl.BlockSpec(shape, lambda b: (0, 0))
        return pl.BlockSpec(shape, lambda b: (0, 0, 0))

    args = [
        src, tgt, mask.astype(jnp.float32),
        params["enc_wqkv"], params["enc_wo"], params["enc_w1"], params["enc_w2"],
        params["enc_bqkv"], params["enc_b1"], params["enc_vecs"],
        params["dec_sa_wqkv"], params["dec_sa_wo"], params["dec_ca_wq"],
        params["dec_ca_wkv"], params["dec_ca_wo"], params["dec_w1"], params["dec_w2"],
        params["dec_sa_bqkv"], params["dec_ca_bkv"], params["dec_b1"], params["dec_vecs"],
        params["fc_w"], params["fc_b"],
    ]
    in_specs = [
        pl.BlockSpec((1, S, Dp), lambda b: (b, 0, 0)),       # src activations
        pl.BlockSpec((1, L, Dp), lambda b: (b, 0, 0)),       # tgt activations
        whole((L, S)),                                       # additive cross mask
    ] + [whole(a.shape) for a in args[3:]]                   # all weights, whole-array

    return pl.pallas_call(
        kernel,
        grid=(B,),
        out_shape=jax.ShapeDtypeStruct((B, L, Vp), jnp.float32),
        in_specs=in_specs,
        out_specs=pl.BlockSpec((1, L, Vp), lambda b: (b, 0, 0)),
        compiler_params=pltpu.CompilerParams(
            dimension_semantics=("parallel",),               # v7x: 1 batch per TC
            vmem_limit_bytes=32 * 1024 * 1024),
    )(*args)


# ---------------------------------------------------------------------------
# Model glue (embeddings + positional encoding in plain JAX)
# ---------------------------------------------------------------------------

def positional_encoding_table(max_len, d_model):
    pos = jnp.arange(max_len, dtype=jnp.float32)[:, None]
    div = jnp.exp(
        jnp.arange(0, d_model, 2, dtype=jnp.float32) * (-math.log(10000.0) / d_model)
    )
    pe = jnp.zeros((max_len, d_model), jnp.float32)
    pe = pe.at[:, 0::2].set(jnp.sin(pos * div))
    pe = pe.at[:, 1::2].set(jnp.cos(pos * div))
    return pe


def transformer_forward(src_tokens, tgt_tokens, mask, params, cfg):
    S, L = src_tokens.shape[1], tgt_tokens.shape[1]
    # Embedding lookup + positional encoding (gather stays in the XLA wrapper;
    # tables are already zero-padded to the 128-lane model width).
    src = params["src_emb"][src_tokens] + params["pe"][:S][None]
    tgt = params["tgt_emb"][tgt_tokens] + params["pe"][:L][None]
    # TODO(synk): dropout layers are identity here (eval-mode semantics).
    logits = fused_transformer(src, tgt, mask, params, cfg)
    return logits[:, :, : cfg["tgt_vocab"]]                  # drop lane padding


# ---------------------------------------------------------------------------
# Deterministic parameter init (compact, lane-padded, layer-stacked, bf16 mats)
# ---------------------------------------------------------------------------

def init_params(key, cfg):
    D, F, H, V = cfg["d_model"], cfg["d_ff"], cfg["n_head"], cfg["tgt_vocab"]
    Dp = _round_up(D, LANE)
    Fp = _round_up(F, LANE)
    Vp = _round_up(V, LANE)
    keys = iter(jax.random.split(key, 256))

    def dense(shape, scale=0.02):
        return scale * jax.random.normal(next(keys), shape, dtype=jnp.float32)

    def pad(w, r, c):
        return jnp.zeros((r, c), jnp.float32).at[: w.shape[0], : w.shape[1]].set(w)

    def padvec(v, n):
        return jnp.zeros((n,), jnp.float32).at[: v.shape[0]].set(v)

    ones_d = jnp.ones((D,), jnp.float32)
    zero_p = jnp.zeros((Dp,), jnp.float32)
    gamma_p = padvec(ones_d, Dp)

    def wqkv():
        return jnp.concatenate(
            [pad(dense((D, D)), Dp, Dp) for _ in range(3)], axis=1).astype(jnp.bfloat16)

    def square():
        return pad(dense((D, D)), Dp, Dp).astype(jnp.bfloat16)

    def enc_layer():
        return dict(
            wqkv=wqkv(),
            wo=square(),
            w1=pad(dense((D, F)), Dp, Fp).astype(jnp.bfloat16),
            w2=pad(dense((F, D)), Fp, Dp).astype(jnp.bfloat16),
            bqkv=jnp.zeros((1, 3 * Dp), jnp.float32),
            b1=jnp.zeros((1, Fp), jnp.float32),
            #          bo      b2      ln1_g   ln1_b   ln2_g   ln2_b
            vecs=jnp.stack([zero_p, zero_p, gamma_p, zero_p, gamma_p, zero_p], axis=0),
        )

    def dec_layer():
        return dict(
            sa_wqkv=wqkv(),
            sa_wo=square(),
            ca_wq=square(),
            ca_wkv=jnp.concatenate(
                [pad(dense((D, D)), Dp, Dp) for _ in range(2)],
                axis=1).astype(jnp.bfloat16),
            ca_wo=square(),
            w1=pad(dense((D, F)), Dp, Fp).astype(jnp.bfloat16),
            w2=pad(dense((F, D)), Fp, Dp).astype(jnp.bfloat16),
            sa_bqkv=jnp.zeros((1, 3 * Dp), jnp.float32),
            ca_bkv=jnp.zeros((1, 2 * Dp), jnp.float32),
            b1=jnp.zeros((1, Fp), jnp.float32),
            # rows: sa_bo, ca_bq, ca_bo, b2, ln1_g, ln1_b, ln2_g, ln2_b, ln3_g, ln3_b
            vecs=jnp.stack([zero_p, zero_p, zero_p, zero_p,
                            gamma_p, zero_p, gamma_p, zero_p, gamma_p, zero_p], axis=0),
        )

    enc_layers = [enc_layer() for _ in range(cfg["n_enc"])]
    dec_layers = [dec_layer() for _ in range(cfg["n_dec"])]

    def stack(layers, name):
        return jnp.stack([l[name] for l in layers], axis=0)

    return {
        "src_emb": jnp.pad(dense((cfg["src_vocab"], D), scale=1.0),
                           ((0, 0), (0, Dp - D))),
        "tgt_emb": jnp.pad(dense((cfg["tgt_vocab"], D), scale=1.0),
                           ((0, 0), (0, Dp - D))),
        "pe": jnp.pad(positional_encoding_table(cfg["max_len"], D),
                      ((0, 0), (0, Dp - D))),
        # encoder stack (leading axis = layer)
        "enc_wqkv": stack(enc_layers, "wqkv"),
        "enc_wo": stack(enc_layers, "wo"),
        "enc_w1": stack(enc_layers, "w1"),
        "enc_w2": stack(enc_layers, "w2"),
        "enc_bqkv": stack(enc_layers, "bqkv"),
        "enc_b1": stack(enc_layers, "b1"),
        "enc_vecs": stack(enc_layers, "vecs"),
        # decoder stack
        "dec_sa_wqkv": stack(dec_layers, "sa_wqkv"),
        "dec_sa_wo": stack(dec_layers, "sa_wo"),
        "dec_ca_wq": stack(dec_layers, "ca_wq"),
        "dec_ca_wkv": stack(dec_layers, "ca_wkv"),
        "dec_ca_wo": stack(dec_layers, "ca_wo"),
        "dec_w1": stack(dec_layers, "w1"),
        "dec_w2": stack(dec_layers, "w2"),
        "dec_sa_bqkv": stack(dec_layers, "sa_bqkv"),
        "dec_ca_bkv": stack(dec_layers, "ca_bkv"),
        "dec_b1": stack(dec_layers, "b1"),
        "dec_vecs": stack(dec_layers, "vecs"),
        # LM head
        "fc_w": pad(dense((D, V)), Dp, Vp).astype(jnp.bfloat16),
        "fc_b": jnp.zeros((1, Vp), jnp.float32),
    }


# ---------------------------------------------------------------------------
# Main
# ---------------------------------------------------------------------------

if __name__ == "__main__":
    cfg = dict(
        src_vocab=50, tgt_vocab=50, max_len=16,
        d_model=32, d_ff=64, n_head=4, n_enc=2, n_dec=2,
    )
    B, S, L = 2, 8, 8

    key = jax.random.PRNGKey(0)
    k_src, k_tgt, k_params = jax.random.split(key, 3)
    src_tokens = jax.random.randint(k_src, (B, S), 0, cfg["src_vocab"], dtype=jnp.int32)
    tgt_tokens = jax.random.randint(k_tgt, (B, L), 0, cfg["tgt_vocab"], dtype=jnp.int32)
    # additive (L, S) mask; zeros = fully visible
    mask = jnp.zeros((L, S), jnp.float32)

    params = init_params(k_params, cfg)

    fwd = jax.jit(functools.partial(transformer_forward, cfg=cfg))
    out = jax.block_until_ready(fwd(src_tokens, tgt_tokens, mask, params))

    assert out.shape == (B, L, cfg["tgt_vocab"]), out.shape
    assert bool(jnp.all(jnp.isfinite(out)))
    print("KERNEL_OK")
</pallas_src>

<mosaic_0001>
module attributes {stable_mosaic.version = 11 : i64} {
  func.func @_transformer_kernel(%arg0: i32, %arg1: memref<1x8x128xf32, #tpu.memory_space<vmem>>, %arg2: memref<1x8x128xf32, #tpu.memory_space<vmem>>, %arg3: memref<8x8xf32, #tpu.memory_space<vmem>>, %arg4: memref<2x128x384xbf16, #tpu.memory_space<vmem>>, %arg5: memref<2x128x128xbf16, #tpu.memory_space<vmem>>, %arg6: memref<2x128x128xbf16, #tpu.memory_space<vmem>>, %arg7: memref<2x128x128xbf16, #tpu.memory_space<vmem>>, %arg8: memref<2x1x384xf32, #tpu.memory_space<vmem>>, %arg9: memref<2x1x128xf32, #tpu.memory_space<vmem>>, %arg10: memref<2x6x128xf32, #tpu.memory_space<vmem>>, %arg11: memref<2x128x384xbf16, #tpu.memory_space<vmem>>, %arg12: memref<2x128x128xbf16, #tpu.memory_space<vmem>>, %arg13: memref<2x128x128xbf16, #tpu.memory_space<vmem>>, %arg14: memref<2x128x256xbf16, #tpu.memory_space<vmem>>, %arg15: memref<2x128x128xbf16, #tpu.memory_space<vmem>>, %arg16: memref<2x128x128xbf16, #tpu.memory_space<vmem>>, %arg17: memref<2x128x128xbf16, #tpu.memory_space<vmem>>, %arg18: memref<2x1x384xf32, #tpu.memory_space<vmem>>, %arg19: memref<2x1x256xf32, #tpu.memory_space<vmem>>, %arg20: memref<2x1x128xf32, #tpu.memory_space<vmem>>, %arg21: memref<2x10x128xf32, #tpu.memory_space<vmem>>, %arg22: memref<128x128xbf16, #tpu.memory_space<vmem>>, %arg23: memref<1x128xf32, #tpu.memory_space<vmem>>, %arg24: memref<1x8x128xf32, #tpu.memory_space<vmem>>) attributes {dimension_semantics = [#tpu.dimension_semantics<parallel>], iteration_bounds = array<i64: 2>, scalar_prefetch = 0 : i64, scratch_operands = 0 : i64, tpu.core_type = #tpu.core_type<tc>, window_params = [{transform_indices = @transform_0, window_bounds = array<i64: 1, 8, 128>}, {transform_indices = @transform_1, window_bounds = array<i64: 1, 8, 128>}, {pipeline_mode = #tpu.pipeline_mode<synchronous>, transform_indices = @transform_2, window_bounds = array<i64: 8, 8>}, {pipeline_mode = #tpu.pipeline_mode<synchronous>, transform_indices = @transform_3, window_bounds = array<i64: 2, 128, 384>}, {pipeline_mode = #tpu.pipeline_mode<synchronous>, transform_indices = @transform_4, window_bounds = array<i64: 2, 128, 128>}, {pipeline_mode = #tpu.pipeline_mode<synchronous>, transform_indices = @transform_5, window_bounds = array<i64: 2, 128, 128>}, {pipeline_mode = #tpu.pipeline_mode<synchronous>, transform_indices = @transform_6, window_bounds = array<i64: 2, 128, 128>}, {pipeline_mode = #tpu.pipeline_mode<synchronous>, transform_indices = @transform_7, window_bounds = array<i64: 2, 1, 384>}, {pipeline_mode = #tpu.pipeline_mode<synchronous>, transform_indices = @transform_8, window_bounds = array<i64: 2, 1, 128>}, {pipeline_mode = #tpu.pipeline_mode<synchronous>, transform_indices = @transform_9, window_bounds = array<i64: 2, 6, 128>}, {pipeline_mode = #tpu.pipeline_mode<synchronous>, transform_indices = @transform_10, window_bounds = array<i64: 2, 128, 384>}, {pipeline_mode = #tpu.pipeline_mode<synchronous>, transform_indices = @transform_11, window_bounds = array<i64: 2, 128, 128>}, {pipeline_mode = #tpu.pipeline_mode<synchronous>, transform_indices = @transform_12, window_bounds = array<i64: 2, 128, 128>}, {pipeline_mode = #tpu.pipeline_mode<synchronous>, transform_indices = @transform_13, window_bounds = array<i64: 2, 128, 256>}, {pipeline_mode = #tpu.pipeline_mode<synchronous>, transform_indices = @transform_14, window_bounds = array<i64: 2, 128, 128>}, {pipeline_mode = #tpu.pipeline_mode<synchronous>, transform_indices = @transform_15, window_bounds = array<i64: 2, 128, 128>}, {pipeline_mode = #tpu.pipeline_mode<synchronous>, transform_indices = @transform_16, window_bounds = array<i64: 2, 128, 128>}, {pipeline_mode = #tpu.pipeline_mode<synchronous>, transform_indices = @transform_17, window_bounds = array<i64: 2, 1, 384>}, {pipeline_mode = #tpu.pipeline_mode<synchronous>, transform_indices = @transform_18, window_bounds = array<i64: 2, 1, 256>}, {pipeline_mode = #tpu.pipeline_mode<synchronous>, transform_indices = @transform_19, window_bounds = array<i64: 2, 1, 128>}, {pipeline_mode = #tpu.pipeline_mode<synchronous>, transform_indices = @transform_20, window_bounds = array<i64: 2, 10, 128>}, {pipeline_mode = #tpu.pipeline_mode<synchronous>, transform_indices = @transform_21, window_bounds = array<i64: 128, 128>}, {pipeline_mode = #tpu.pipeline_mode<synchronous>, transform_indices = @transform_22, window_bounds = array<i64: 1, 128>}, {transform_indices = @transform_23, window_bounds = array<i64: 1, 8, 128>}]} {
    %0 = tpu.iota {dimensions = array<i32: 1>} : vector<1x128xi32>
    %c0 = arith.constant 0 : index
    %c0_0 = arith.constant 0 : index
    %1 = vector.load %arg3[%c0, %c0_0] : memref<8x8xf32, #tpu.memory_space<vmem>>, vector<8x8xf32>
    %c0_1 = arith.constant 0 : index
    %c0_2 = arith.constant 0 : index
    %c0_3 = arith.constant 0 : index
    %2 = vector.load %arg1[%c0_1, %c0_2, %c0_3] : memref<1x8x128xf32, #tpu.memory_space<vmem>>, vector<1x8x128xf32>
    %3 = vector.shape_cast %2 : vector<1x8x128xf32> to vector<8x128xf32>
    %c0_4 = arith.constant 0 : index
    %c0_5 = arith.constant 0 : index
    %c0_6 = arith.constant 0 : index
    %4 = vector.load %arg10[%c0_4, %c0_5, %c0_6] : memref<2x6x128xf32, #tpu.memory_space<vmem>>, vector<1x6x128xf32>
    %5 = vector.shape_cast %4 : vector<1x6x128xf32> to vector<6x128xf32>
    %6 = vector.extract_strided_slice %5 {offsets = [0, 0], sizes = [1, 128], strides = [1, 1]} : vector<6x128xf32> to vector<1x128xf32>
    %7 = vector.extract_strided_slice %5 {offsets = [1, 0], sizes = [1, 128], strides = [1, 1]} : vector<6x128xf32> to vector<1x128xf32>
    %8 = vector.extract_strided_slice %5 {offsets = [2, 0], sizes = [1, 128], strides = [1, 1]} : vector<6x128xf32> to vector<1x128xf32>
    %9 = vector.extract_strided_slice %5 {offsets = [3, 0], sizes = [1, 128], strides = [1, 1]} : vector<6x128xf32> to vector<1x128xf32>
    %10 = vector.extract_strided_slice %5 {offsets = [4, 0], sizes = [1, 128], strides = [1, 1]} : vector<6x128xf32> to vector<1x128xf32>
    %11 = vector.extract_strided_slice %5 {offsets = [5, 0], sizes = [1, 128], strides = [1, 1]} : vector<6x128xf32> to vector<1x128xf32>
    %c0_7 = arith.constant 0 : index
    %c0_8 = arith.constant 0 : index
    %c0_9 = arith.constant 0 : index
    %12 = vector.load %arg4[%c0_7, %c0_8, %c0_9] : memref<2x128x384xbf16, #tpu.memory_space<vmem>>, vector<1x128x384xbf16>
    %13 = vector.shape_cast %12 : vector<1x128x384xbf16> to vector<128x384xbf16>
    %c0_10 = arith.constant 0 : index
    %c0_11 = arith.constant 0 : index
    %c0_12 = arith.constant 0 : index
    %14 = vector.load %arg8[%c0_10, %c0_11, %c0_12] : memref<2x1x384xf32, #tpu.memory_space<vmem>>, vector<1x1x384xf32>
    %15 = vector.shape_cast %14 : vector<1x1x384xf32> to vector<1x384xf32>
    %16 = arith.truncf %3 : vector<8x128xf32> to vector<8x128xbf16>
    %cst = arith.constant dense<0.000000e+00> : vector<8x384xf32>
    %17 = tpu.matmul %16, %13, %cst {dimension_numbers = #tpu.dot_dimension_numbers<[1], [0], [0], [1], [0, 0, 1, 1], [], []>} : vector<8x128xbf16>, vector<128x384xbf16>, vector<8x384xf32> -> vector<8x384xf32>
    %18 = vector.broadcast %15 : vector<1x384xf32> to vector<8x384xf32>
    %19 = arith.addf %17, %18 : vector<8x384xf32>
    %20 = vector.extract_strided_slice %19 {offsets = [0, 0], sizes = [8, 128], strides = [1, 1]} : vector<8x384xf32> to vector<8x128xf32>
    %21 = vector.extract_strided_slice %19 {offsets = [0, 128], sizes = [8, 128], strides = [1, 1]} : vector<8x384xf32> to vector<8x128xf32>
    %22 = vector.extract_strided_slice %19 {offsets = [0, 256], sizes = [8, 128], strides = [1, 1]} : vector<8x384xf32> to vector<8x128xf32>
    %c0_13 = arith.constant 0 : index
    %c0_14 = arith.constant 0 : index
    %c0_15 = arith.constant 0 : index
    %23 = vector.load %arg5[%c0_13, %c0_14, %c0_15] : memref<2x128x128xbf16, #tpu.memory_space<vmem>>, vector<1x128x128xbf16>
    %24 = vector.shape_cast %23 : vector<1x128x128xbf16> to vector<128x128xbf16>
    %25 = arith.truncf %20 : vector<8x128xf32> to vector<8x128xbf16>
    %c0_i32 = arith.constant 0 : i32
    %26 = vector.broadcast %c0_i32 : i32 to vector<1x128xi32>
    %27 = arith.cmpi sge, %0, %26 : vector<1x128xi32>
    %c8_i32 = arith.constant 8 : i32
    %28 = vector.broadcast %c8_i32 : i32 to vector<1x128xi32>
    %29 = arith.cmpi slt, %0, %28 : vector<1x128xi32>
    %30 = arith.andi %27, %29 : vector<1x128xi1>
    %cst_16 = arith.constant 0.000000e+00 : f32
    %31 = vector.shape_cast %30 : vector<1x128xi1> to vector<1x128xi1>
    %32 = vector.broadcast %31 : vector<1x128xi1> to vector<8x128xi1>
    %33 = vector.broadcast %cst_16 : f32 to vector<8x128xf32>
    %34 = arith.select %32, %21, %33 : vector<8x128xi1>, vector<8x128xf32>
    %35 = arith.truncf %34 : vector<8x128xf32> to vector<8x128xbf16>
    %cst_17 = arith.constant 0.000000e+00 : f32
    %36 = vector.shape_cast %30 : vector<1x128xi1> to vector<1x128xi1>
    %37 = vector.broadcast %36 : vector<1x128xi1> to vector<8x128xi1>
    %38 = vector.broadcast %cst_17 : f32 to vector<8x128xf32>
    %39 = arith.select %37, %22, %38 : vector<8x128xi1>, vector<8x128xf32>
    %40 = arith.truncf %39 : vector<8x128xf32> to vector<8x128xbf16>
    %cst_18 = arith.constant dense<0.000000e+00> : vector<8x8xf32>
    %41 = tpu.matmul %25, %35, %cst_18 {dimension_numbers = #tpu.dot_dimension_numbers<[1], [1], [0], [0], [0, 0, 1, 0], [], []>} : vector<8x128xbf16>, vector<8x128xbf16>, vector<8x8xf32> -> vector<8x8xf32>
    %cst_19 = arith.constant 0.353553385 : f32
    %42 = vector.broadcast %cst_19 : f32 to vector<8x8xf32>
    %43 = arith.mulf %41, %42 : vector<8x8xf32>
    %cst_20 = arith.constant dense<0xFF800000> : vector<8xf32>
    %44 = vector.multi_reduction <maximumf>, %43, %cst_20 [1] : vector<8x8xf32> to vector<8xf32>
    %45 = vector.shape_cast %44 : vector<8xf32> to vector<8x1xf32>
    %46 = vector.broadcast %45 : vector<8x1xf32> to vector<8x8xf32>
    %47 = arith.subf %43, %46 : vector<8x8xf32>
    %48 = math.exp %47 : vector<8x8xf32>
    %cst_21 = arith.constant dense<0.000000e+00> : vector<8xf32>
    %49 = vector.multi_reduction <add>, %48, %cst_21 [1] : vector<8x8xf32> to vector<8xf32>
    %50 = vector.shape_cast %49 : vector<8xf32> to vector<8x1xf32>
    %51 = tpu.reciprocal %50 {approx = true} : vector<8x1xf32> -> vector<8x1xf32>
    %52 = vector.broadcast %51 : vector<8x1xf32> to vector<8x8xf32>
    %53 = arith.mulf %48, %52 : vector<8x8xf32>
    %54 = arith.truncf %53 : vector<8x8xf32> to vector<8x8xbf16>
    %cst_22 = arith.constant dense<0.000000e+00> : vector<8x128xf32>
    %55 = tpu.matmul %54, %40, %cst_22 {dimension_numbers = #tpu.dot_dimension_numbers<[1], [0], [0], [1], [0, 0, 1, 1], [], []>} : vector<8x8xbf16>, vector<8x128xbf16>, vector<8x128xf32> -> vector<8x128xf32>
    %c8_i32_23 = arith.constant 8 : i32
    %56 = vector.broadcast %c8_i32_23 : i32 to vector<1x128xi32>
    %57 = arith.cmpi sge, %0, %56 : vector<1x128xi32>
    %c16_i32 = arith.constant 16 : i32
    %58 = vector.broadcast %c16_i32 : i32 to vector<1x128xi32>
    %59 = arith.cmpi slt, %0, %58 : vector<1x128xi32>
    %60 = arith.andi %57, %59 : vector<1x128xi1>
    %cst_24 = arith.constant 0.000000e+00 : f32
    %61 = vector.shape_cast %60 : vector<1x128xi1> to vector<1x128xi1>
    %62 = vector.broadcast %61 : vector<1x128xi1> to vector<8x128xi1>
    %63 = vector.broadcast %cst_24 : f32 to vector<8x128xf32>
    %64 = arith.select %62, %21, %63 : vector<8x128xi1>, vector<8x128xf32>
    %65 = arith.truncf %64 : vector<8x128xf32> to vector<8x128xbf16>
    %cst_25 = arith.constant 0.000000e+00 : f32
    %66 = vector.shape_cast %60 : vector<1x128xi1> to vector<1x128xi1>
    %67 = vector.broadcast %66 : vector<1x128xi1> to vector<8x128xi1>
    %68 = vector.broadcast %cst_25 : f32 to vector<8x128xf32>
    %69 = arith.select %67, %22, %68 : vector<8x128xi1>, vector<8x128xf32>
    %70 = arith.truncf %69 : vector<8x128xf32> to vector<8x128xbf16>
    %cst_26 = arith.constant dense<0.000000e+00> : vector<8x8xf32>
    %71 = tpu.matmul %25, %65, %cst_26 {dimension_numbers = #tpu.dot_dimension_numbers<[1], [1], [0], [0], [0, 0, 1, 0], [], []>} : vector<8x128xbf16>, vector<8x128xbf16>, vector<8x8xf32> -> vector<8x8xf32>
    %cst_27 = arith.constant 0.353553385 : f32
    %72 = vector.broadcast %cst_27 : f32 to vector<8x8xf32>
    %73 = arith.mulf %71, %72 : vector<8x8xf32>
    %cst_28 = arith.constant dense<0xFF800000> : vector<8xf32>
    %74 = vector.multi_reduction <maximumf>, %73, %cst_28 [1] : vector<8x8xf32> to vector<8xf32>
    %75 = vector.shape_cast %74 : vector<8xf32> to vector<8x1xf32>
    %76 = vector.broadcast %75 : vector<8x1xf32> to vector<8x8xf32>
    %77 = arith.subf %73, %76 : vector<8x8xf32>
    %78 = math.exp %77 : vector<8x8xf32>
    %cst_29 = arith.constant dense<0.000000e+00> : vector<8xf32>
    %79 = vector.multi_reduction <add>, %78, %cst_29 [1] : vector<8x8xf32> to vector<8xf32>
    %80 = vector.shape_cast %79 : vector<8xf32> to vector<8x1xf32>
    %81 = tpu.reciprocal %80 {approx = true} : vector<8x1xf32> -> vector<8x1xf32>
    %82 = vector.broadcast %81 : vector<8x1xf32> to vector<8x8xf32>
    %83 = arith.mulf %78, %82 : vector<8x8xf32>
    %84 = arith.truncf %83 : vector<8x8xf32> to vector<8x8xbf16>
    %cst_30 = arith.constant dense<0.000000e+00> : vector<8x128xf32>
    %85 = tpu.matmul %84, %70, %cst_30 {dimension_numbers = #tpu.dot_dimension_numbers<[1], [0], [0], [1], [0, 0, 1, 1], [], []>} : vector<8x8xbf16>, vector<8x128xbf16>, vector<8x128xf32> -> vector<8x128xf32>
    %86 = arith.addf %55, %85 : vector<8x128xf32>
    %c16_i32_31 = arith.constant 16 : i32
    %87 = vector.broadcast %c16_i32_31 : i32 to vector<1x128xi32>
    %88 = arith.cmpi sge, %0, %87 : vector<1x128xi32>
    %c24_i32 = arith.constant 24 : i32
    %89 = vector.broadcast %c24_i32 : i32 to vector<1x128xi32>
    %90 = arith.cmpi slt, %0, %89 : vector<1x128xi32>
    %91 = arith.andi %88, %90 : vector<1x128xi1>
    %cst_32 = arith.constant 0.000000e+00 : f32
    %92 = vector.shape_cast %91 : vector<1x128xi1> to vector<1x128xi1>
    %93 = vector.broadcast %92 : vector<1x128xi1> to vector<8x128xi1>
    %94 = vector.broadcast %cst_32 : f32 to vector<8x128xf32>
    %95 = arith.select %93, %21, %94 : vector<8x128xi1>, vector<8x128xf32>
    %96 = arith.truncf %95 : vector<8x128xf32> to vector<8x128xbf16>
    %cst_33 = arith.constant 0.000000e+00 : f32
    %97 = vector.shape_cast %91 : vector<1x128xi1> to vector<1x128xi1>
    %98 = vector.broadcast %97 : vector<1x128xi1> to vector<8x128xi1>
    %99 = vector.broadcast %cst_33 : f32 to vector<8x128xf32>
    %100 = arith.select %98, %22, %99 : vector<8x128xi1>, vector<8x128xf32>
    %101 = arith.truncf %100 : vector<8x128xf32> to vector<8x128xbf16>
    %cst_34 = arith.constant dense<0.000000e+00> : vector<8x8xf32>
    %102 = tpu.matmul %25, %96, %cst_34 {dimension_numbers = #tpu.dot_dimension_numbers<[1], [1], [0], [0], [0, 0, 1, 0], [], []>} : vector<8x128xbf16>, vector<8x128xbf16>, vector<8x8xf32> -> vector<8x8xf32>
    %cst_35 = arith.constant 0.353553385 : f32
    %103 = vector.broadcast %cst_35 : f32 to vector<8x8xf32>
    %104 = arith.mulf %102, %103 : vector<8x8xf32>
    %cst_36 = arith.constant dense<0xFF800000> : vector<8xf32>
    %105 = vector.multi_reduction <maximumf>, %104, %cst_36 [1] : vector<8x8xf32> to vector<8xf32>
    %106 = vector.shape_cast %105 : vector<8xf32> to vector<8x1xf32>
    %107 = vector.broadcast %106 : vector<8x1xf32> to vector<8x8xf32>
    %108 = arith.subf %104, %107 : vector<8x8xf32>
    %109 = math.exp %108 : vector<8x8xf32>
    %cst_37 = arith.constant dense<0.000000e+00> : vector<8xf32>
    %110 = vector.multi_reduction <add>, %109, %cst_37 [1] : vector<8x8xf32> to vector<8xf32>
    %111 = vector.shape_cast %110 : vector<8xf32> to vector<8x1xf32>
    %112 = tpu.reciprocal %111 {approx = true} : vector<8x1xf32> -> vector<8x1xf32>
    %113 = vector.broadcast %112 : vector<8x1xf32> to vector<8x8xf32>
    %114 = arith.mulf %109, %113 : vector<8x8xf32>
    %115 = arith.truncf %114 : vector<8x8xf32> to vector<8x8xbf16>
    %cst_38 = arith.constant dense<0.000000e+00> : vector<8x128xf32>
    %116 = tpu.matmul %115, %101, %cst_38 {dimension_numbers = #tpu.dot_dimension_numbers<[1], [0], [0], [1], [0, 0, 1, 1], [], []>} : vector<8x8xbf16>, vector<8x128xbf16>, vector<8x128xf32> -> vector<8x128xf32>
    %117 = arith.addf %86, %116 : vector<8x128xf32>
    %c24_i32_39 = arith.constant 24 : i32
    %118 = vector.broadcast %c24_i32_39 : i32 to vector<1x128xi32>
    %119 = arith.cmpi sge, %0, %118 : vector<1x128xi32>
    %c32_i32 = arith.constant 32 : i32
    %120 = vector.broadcast %c32_i32 : i32 to vector<1x128xi32>
    %121 = arith.cmpi slt, %0, %120 : vector<1x128xi32>
    %122 = arith.andi %119, %121 : vector<1x128xi1>
    %cst_40 = arith.constant 0.000000e+00 : f32
    %123 = vector.shape_cast %122 : vector<1x128xi1> to vector<1x128xi1>
    %124 = vector.broadcast %123 : vector<1x128xi1> to vector<8x128xi1>
    %125 = vector.broadcast %cst_40 : f32 to vector<8x128xf32>
    %126 = arith.select %124, %21, %125 : vector<8x128xi1>, vector<8x128xf32>
    %127 = arith.truncf %126 : vector<8x128xf32> to vector<8x128xbf16>
    %cst_41 = arith.constant 0.000000e+00 : f32
    %128 = vector.shape_cast %122 : vector<1x128xi1> to vector<1x128xi1>
    %129 = vector.broadcast %128 : vector<1x128xi1> to vector<8x128xi1>
    %130 = vector.broadcast %cst_41 : f32 to vector<8x128xf32>
    %131 = arith.select %129, %22, %130 : vector<8x128xi1>, vector<8x128xf32>
    %132 = arith.truncf %131 : vector<8x128xf32> to vector<8x128xbf16>
    %cst_42 = arith.constant dense<0.000000e+00> : vector<8x8xf32>
    %133 = tpu.matmul %25, %127, %cst_42 {dimension_numbers = #tpu.dot_dimension_numbers<[1], [1], [0], [0], [0, 0, 1, 0], [], []>} : vector<8x128xbf16>, vector<8x128xbf16>, vector<8x8xf32> -> vector<8x8xf32>
    %cst_43 = arith.constant 0.353553385 : f32
    %134 = vector.broadcast %cst_43 : f32 to vector<8x8xf32>
    %135 = arith.mulf %133, %134 : vector<8x8xf32>
    %cst_44 = arith.constant dense<0xFF800000> : vector<8xf32>
    %136 = vector.multi_reduction <maximumf>, %135, %cst_44 [1] : vector<8x8xf32> to vector<8xf32>
    %137 = vector.shape_cast %136 : vector<8xf32> to vector<8x1xf32>
    %138 = vector.broadcast %137 : vector<8x1xf32> to vector<8x8xf32>
    %139 = arith.subf %135, %138 : vector<8x8xf32>
    %140 = math.exp %139 : vector<8x8xf32>
    %cst_45 = arith.constant dense<0.000000e+00> : vector<8xf32>
    %141 = vector.multi_reduction <add>, %140, %cst_45 [1] : vector<8x8xf32> to vector<8xf32>
    %142 = vector.shape_cast %141 : vector<8xf32> to vector<8x1xf32>
    %143 = tpu.reciprocal %142 {approx = true} : vector<8x1xf32> -> vector<8x1xf32>
    %144 = vector.broadcast %143 : vector<8x1xf32> to vector<8x8xf32>
    %145 = arith.mulf %140, %144 : vector<8x8xf32>
    %146 = arith.truncf %145 : vector<8x8xf32> to vector<8x8xbf16>
    %cst_46 = arith.constant dense<0.000000e+00> : vector<8x128xf32>
    %147 = tpu.matmul %146, %132, %cst_46 {dimension_numbers = #tpu.dot_dimension_numbers<[1], [0], [0], [1], [0, 0, 1, 1], [], []>} : vector<8x8xbf16>, vector<8x128xbf16>, vector<8x128xf32> -> vector<8x128xf32>
    %148 = arith.addf %117, %147 : vector<8x128xf32>
    %149 = arith.truncf %148 : vector<8x128xf32> to vector<8x128xbf16>
    %cst_47 = arith.constant dense<0.000000e+00> : vector<8x128xf32>
    %150 = tpu.matmul %149, %24, %cst_47 {dimension_numbers = #tpu.dot_dimension_numbers<[1], [0], [0], [1], [0, 0, 1, 1], [], []>} : vector<8x128xbf16>, vector<128x128xbf16>, vector<8x128xf32> -> vector<8x128xf32>
    %151 = vector.broadcast %6 : vector<1x128xf32> to vector<8x128xf32>
    %152 = arith.addf %150, %151 : vector<8x128xf32>
    %153 = arith.addf %152, %3 : vector<8x128xf32>
    %cst_48 = arith.constant dense<0.000000e+00> : vector<8xf32>
    %154 = vector.multi_reduction <add>, %153, %cst_48 [1] : vector<8x128xf32> to vector<8xf32>
    %155 = vector.shape_cast %154 : vector<8xf32> to vector<8x1xf32>
    %cst_49 = arith.constant 3.125000e-02 : f32
    %156 = vector.broadcast %cst_49 : f32 to vector<8x1xf32>
    %157 = arith.mulf %155, %156 : vector<8x1xf32>
    %158 = vector.broadcast %157 : vector<8x1xf32> to vector<8x128xf32>
    %159 = arith.subf %153, %158 : vector<8x128xf32>
    %c32_i32_50 = arith.constant 32 : i32
    %160 = vector.broadcast %c32_i32_50 : i32 to vector<1x128xi32>
    %161 = arith.cmpi slt, %0, %160 : vector<1x128xi32>
    %cst_51 = arith.constant 0.000000e+00 : f32
    %162 = vector.shape_cast %161 : vector<1x128xi1> to vector<1x128xi1>
    %163 = vector.broadcast %162 : vector<1x128xi1> to vector<8x128xi1>
    %164 = vector.broadcast %cst_51 : f32 to vector<8x128xf32>
    %165 = arith.select %163, %159, %164 : vector<8x128xi1>, vector<8x128xf32>
    %166 = arith.mulf %165, %165 : vector<8x128xf32>
    %cst_52 = arith.constant dense<0.000000e+00> : vector<8xf32>
    %167 = vector.multi_reduction <add>, %166, %cst_52 [1] : vector<8x128xf32> to vector<8xf32>
    %168 = vector.shape_cast %167 : vector<8xf32> to vector<8x1xf32>
    %cst_53 = arith.constant 3.125000e-02 : f32
    %169 = vector.broadcast %cst_53 : f32 to vector<8x1xf32>
    %170 = arith.mulf %168, %169 : vector<8x1xf32>
    %cst_54 = arith.constant 9.99999974E-6 : f32
    %171 = vector.broadcast %cst_54 : f32 to vector<8x1xf32>
    %172 = arith.addf %170, %171 : vector<8x1xf32>
    %173 = math.rsqrt %172 : vector<8x1xf32>
    %174 = vector.broadcast %173 : vector<8x1xf32> to vector<8x128xf32>
    %175 = arith.mulf %159, %174 : vector<8x128xf32>
    %176 = vector.broadcast %8 : vector<1x128xf32> to vector<8x128xf32>
    %177 = arith.mulf %175, %176 : vector<8x128xf32>
    %178 = vector.broadcast %9 : vector<1x128xf32> to vector<8x128xf32>
    %179 = arith.addf %177, %178 : vector<8x128xf32>
    %c0_55 = arith.constant 0 : index
    %c0_56 = arith.constant 0 : index
    %c0_57 = arith.constant 0 : index
    %180 = vector.load %arg6[%c0_55, %c0_56, %c0_57] : memref<2x128x128xbf16, #tpu.memory_space<vmem>>, vector<1x128x128xbf16>
    %181 = vector.shape_cast %180 : vector<1x128x128xbf16> to vector<128x128xbf16>
    %c0_58 = arith.constant 0 : index
    %c0_59 = arith.constant 0 : index
    %c0_60 = arith.constant 0 : index
    %182 = vector.load %arg9[%c0_58, %c0_59, %c0_60] : memref<2x1x128xf32, #tpu.memory_space<vmem>>, vector<1x1x128xf32>
    %183 = vector.shape_cast %182 : vector<1x1x128xf32> to vector<1x128xf32>
    %c0_61 = arith.constant 0 : index
    %c0_62 = arith.constant 0 : index
    %c0_63 = arith.constant 0 : index
    %184 = vector.load %arg7[%c0_61, %c0_62, %c0_63] : memref<2x128x128xbf16, #tpu.memory_space<vmem>>, vector<1x128x128xbf16>
    %185 = vector.shape_cast %184 : vector<1x128x128xbf16> to vector<128x128xbf16>
    %186 = arith.truncf %179 : vector<8x128xf32> to vector<8x128xbf16>
    %cst_64 = arith.constant dense<0.000000e+00> : vector<8x128xf32>
    %187 = tpu.matmul %186, %181, %cst_64 {dimension_numbers = #tpu.dot_dimension_numbers<[1], [0], [0], [1], [0, 0, 1, 1], [], []>} : vector<8x128xbf16>, vector<128x128xbf16>, vector<8x128xf32> -> vector<8x128xf32>
    %188 = vector.broadcast %183 : vector<1x128xf32> to vector<8x128xf32>
    %189 = arith.addf %187, %188 : vector<8x128xf32>
    %cst_65 = arith.constant 0.000000e+00 : f32
    %190 = vector.broadcast %cst_65 : f32 to vector<8x128xf32>
    %191 = arith.maximumf %189, %190 : vector<8x128xf32>
    %192 = arith.truncf %191 : vector<8x128xf32> to vector<8x128xbf16>
    %cst_66 = arith.constant dense<0.000000e+00> : vector<8x128xf32>
    %193 = tpu.matmul %192, %185, %cst_66 {dimension_numbers = #tpu.dot_dimension_numbers<[1], [0], [0], [1], [0, 0, 1, 1], [], []>} : vector<8x128xbf16>, vector<128x128xbf16>, vector<8x128xf32> -> vector<8x128xf32>
    %194 = vector.broadcast %7 : vector<1x128xf32> to vector<8x128xf32>
    %195 = arith.addf %193, %194 : vector<8x128xf32>
    %196 = arith.addf %195, %179 : vector<8x128xf32>
    %cst_67 = arith.constant dense<0.000000e+00> : vector<8xf32>
    %197 = vector.multi_reduction <add>, %196, %cst_67 [1] : vector<8x128xf32> to vector<8xf32>
    %198 = vector.shape_cast %197 : vector<8xf32> to vector<8x1xf32>
    %cst_68 = arith.constant 3.125000e-02 : f32
    %199 = vector.broadcast %cst_68 : f32 to vector<8x1xf32>
    %200 = arith.mulf %198, %199 : vector<8x1xf32>
    %201 = vector.broadcast %200 : vector<8x1xf32> to vector<8x128xf32>
    %202 = arith.subf %196, %201 : vector<8x128xf32>
    %c32_i32_69 = arith.constant 32 : i32
    %203 = vector.broadcast %c32_i32_69 : i32 to vector<1x128xi32>
    %204 = arith.cmpi slt, %0, %203 : vector<1x128xi32>
    %cst_70 = arith.constant 0.000000e+00 : f32
    %205 = vector.shape_cast %204 : vector<1x128xi1> to vector<1x128xi1>
    %206 = vector.broadcast %205 : vector<1x128xi1> to vector<8x128xi1>
    %207 = vector.broadcast %cst_70 : f32 to vector<8x128xf32>
    %208 = arith.select %206, %202, %207 : vector<8x128xi1>, vector<8x128xf32>
    %209 = arith.mulf %208, %208 : vector<8x128xf32>
    %cst_71 = arith.constant dense<0.000000e+00> : vector<8xf32>
    %210 = vector.multi_reduction <add>, %209, %cst_71 [1] : vector<8x128xf32> to vector<8xf32>
    %211 = vector.shape_cast %210 : vector<8xf32> to vector<8x1xf32>
    %cst_72 = arith.constant 3.125000e-02 : f32
    %212 = vector.broadcast %cst_72 : f32 to vector<8x1xf32>
    %213 = arith.mulf %211, %212 : vector<8x1xf32>
    %cst_73 = arith.constant 9.99999974E-6 : f32
    %214 = vector.broadcast %cst_73 : f32 to vector<8x1xf32>
    %215 = arith.addf %213, %214 : vector<8x1xf32>
    %216 = math.rsqrt %215 : vector<8x1xf32>
    %217 = vector.broadcast %216 : vector<8x1xf32> to vector<8x128xf32>
    %218 = arith.mulf %202, %217 : vector<8x128xf32>
    %219 = vector.broadcast %10 : vector<1x128xf32> to vector<8x128xf32>
    %220 = arith.mulf %218, %219 : vector<8x128xf32>
    %221 = vector.broadcast %11 : vector<1x128xf32> to vector<8x128xf32>
    %222 = arith.addf %220, %221 : vector<8x128xf32>
    %c1 = arith.constant 1 : index
    %c0_74 = arith.constant 0 : index
    %c0_75 = arith.constant 0 : index
    %223 = vector.load %arg10[%c1, %c0_74, %c0_75] : memref<2x6x128xf32, #tpu.memory_space<vmem>>, vector<1x6x128xf32>
    %224 = vector.shape_cast %223 : vector<1x6x128xf32> to vector<6x128xf32>
    %225 = vector.extract_strided_slice %224 {offsets = [0, 0], sizes = [1, 128], strides = [1, 1]} : vector<6x128xf32> to vector<1x128xf32>
    %226 = vector.extract_strided_slice %224 {offsets = [1, 0], sizes = [1, 128], strides = [1, 1]} : vector<6x128xf32> to vector<1x128xf32>
    %227 = vector.extract_strided_slice %224 {offsets = [2, 0], sizes = [1, 128], strides = [1, 1]} : vector<6x128xf32> to vector<1x128xf32>
    %228 = vector.extract_strided_slice %224 {offsets = [3, 0], sizes = [1, 128], strides = [1, 1]} : vector<6x128xf32> to vector<1x128xf32>
    %229 = vector.extract_strided_slice %224 {offsets = [4, 0], sizes = [1, 128], strides = [1, 1]} : vector<6x128xf32> to vector<1x128xf32>
    %230 = vector.extract_strided_slice %224 {offsets = [5, 0], sizes = [1, 128], strides = [1, 1]} : vector<6x128xf32> to vector<1x128xf32>
    %c1_76 = arith.constant 1 : index
    %c0_77 = arith.constant 0 : index
    %c0_78 = arith.constant 0 : index
    %231 = vector.load %arg4[%c1_76, %c0_77, %c0_78] : memref<2x128x384xbf16, #tpu.memory_space<vmem>>, vector<1x128x384xbf16>
    %232 = vector.shape_cast %231 : vector<1x128x384xbf16> to vector<128x384xbf16>
    %c1_79 = arith.constant 1 : index
    %c0_80 = arith.constant 0 : index
    %c0_81 = arith.constant 0 : index
    %233 = vector.load %arg8[%c1_79, %c0_80, %c0_81] : memref<2x1x384xf32, #tpu.memory_space<vmem>>, vector<1x1x384xf32>
    %234 = vector.shape_cast %233 : vector<1x1x384xf32> to vector<1x384xf32>
    %235 = arith.truncf %222 : vector<8x128xf32> to vector<8x128xbf16>
    %cst_82 = arith.constant dense<0.000000e+00> : vector<8x384xf32>
    %236 = tpu.matmul %235, %232, %cst_82 {dimension_numbers = #tpu.dot_dimension_numbers<[1], [0], [0], [1], [0, 0, 1, 1], [], []>} : vector<8x128xbf16>, vector<128x384xbf16>, vector<8x384xf32> -> vector<8x384xf32>
    %237 = vector.broadcast %234 : vector<1x384xf32> to vector<8x384xf32>
    %238 = arith.addf %236, %237 : vector<8x384xf32>
    %239 = vector.extract_strided_slice %238 {offsets = [0, 0], sizes = [8, 128], strides = [1, 1]} : vector<8x384xf32> to vector<8x128xf32>
    %240 = vector.extract_strided_slice %238 {offsets = [0, 128], sizes = [8, 128], strides = [1, 1]} : vector<8x384xf32> to vector<8x128xf32>
    %241 = vector.extract_strided_slice %238 {offsets = [0, 256], sizes = [8, 128], strides = [1, 1]} : vector<8x384xf32> to vector<8x128xf32>
    %c1_83 = arith.constant 1 : index
    %c0_84 = arith.constant 0 : index
    %c0_85 = arith.constant 0 : index
    %242 = vector.load %arg5[%c1_83, %c0_84, %c0_85] : memref<2x128x128xbf16, #tpu.memory_space<vmem>>, vector<1x128x128xbf16>
    %243 = vector.shape_cast %242 : vector<1x128x128xbf16> to vector<128x128xbf16>
    %244 = arith.truncf %239 : vector<8x128xf32> to vector<8x128xbf16>
    %c0_i32_86 = arith.constant 0 : i32
    %245 = vector.broadcast %c0_i32_86 : i32 to vector<1x128xi32>
    %246 = arith.cmpi sge, %0, %245 : vector<1x128xi32>
    %c8_i32_87 = arith.constant 8 : i32
    %247 = vector.broadcast %c8_i32_87 : i32 to vector<1x128xi32>
    %248 = arith.cmpi slt, %0, %247 : vector<1x128xi32>
    %249 = arith.andi %246, %248 : vector<1x128xi1>
    %cst_88 = arith.constant 0.000000e+00 : f32
    %250 = vector.shape_cast %249 : vector<1x128xi1> to vector<1x128xi1>
    %251 = vector.broadcast %250 : vector<1x128xi1> to vector<8x128xi1>
    %252 = vector.broadcast %cst_88 : f32 to vector<8x128xf32>
    %253 = arith.select %251, %240, %252 : vector<8x128xi1>, vector<8x128xf32>
    %254 = arith.truncf %253 : vector<8x128xf32> to vector<8x128xbf16>
    %cst_89 = arith.constant 0.000000e+00 : f32
    %255 = vector.shape_cast %249 : vector<1x128xi1> to vector<1x128xi1>
    %256 = vector.broadcast %255 : vector<1x128xi1> to vector<8x128xi1>
    %257 = vector.broadcast %cst_89 : f32 to vector<8x128xf32>
    %258 = arith.select %256, %241, %257 : vector<8x128xi1>, vector<8x128xf32>
    %259 = arith.truncf %258 : vector<8x128xf32> to vector<8x128xbf16>
    %cst_90 = arith.constant dense<0.000000e+00> : vector<8x8xf32>
    %260 = tpu.matmul %244, %254, %cst_90 {dimension_numbers = #tpu.dot_dimension_numbers<[1], [1], [0], [0], [0, 0, 1, 0], [], []>} : vector<8x128xbf16>, vector<8x128xbf16>, vector<8x8xf32> -> vector<8x8xf32>
    %cst_91 = arith.constant 0.353553385 : f32
    %261 = vector.broadcast %cst_91 : f32 to vector<8x8xf32>
    %262 = arith.mulf %260, %261 : vector<8x8xf32>
    %cst_92 = arith.constant dense<0xFF800000> : vector<8xf32>
    %263 = vector.multi_reduction <maximumf>, %262, %cst_92 [1] : vector<8x8xf32> to vector<8xf32>
    %264 = vector.shape_cast %263 : vector<8xf32> to vector<8x1xf32>
    %265 = vector.broadcast %264 : vector<8x1xf32> to vector<8x8xf32>
    %266 = arith.subf %262, %265 : vector<8x8xf32>
    %267 = math.exp %266 : vector<8x8xf32>
    %cst_93 = arith.constant dense<0.000000e+00> : vector<8xf32>
    %268 = vector.multi_reduction <add>, %267, %cst_93 [1] : vector<8x8xf32> to vector<8xf32>
    %269 = vector.shape_cast %268 : vector<8xf32> to vector<8x1xf32>
    %270 = tpu.reciprocal %269 {approx = true} : vector<8x1xf32> -> vector<8x1xf32>
    %271 = vector.broadcast %270 : vector<8x1xf32> to vector<8x8xf32>
    %272 = arith.mulf %267, %271 : vector<8x8xf32>
    %273 = arith.truncf %272 : vector<8x8xf32> to vector<8x8xbf16>
    %cst_94 = arith.constant dense<0.000000e+00> : vector<8x128xf32>
    %274 = tpu.matmul %273, %259, %cst_94 {dimension_numbers = #tpu.dot_dimension_numbers<[1], [0], [0], [1], [0, 0, 1, 1], [], []>} : vector<8x8xbf16>, vector<8x128xbf16>, vector<8x128xf32> -> vector<8x128xf32>
    %c8_i32_95 = arith.constant 8 : i32
    %275 = vector.broadcast %c8_i32_95 : i32 to vector<1x128xi32>
    %276 = arith.cmpi sge, %0, %275 : vector<1x128xi32>
    %c16_i32_96 = arith.constant 16 : i32
    %277 = vector.broadcast %c16_i32_96 : i32 to vector<1x128xi32>
    %278 = arith.cmpi slt, %0, %277 : vector<1x128xi32>
    %279 = arith.andi %276, %278 : vector<1x128xi1>
    %cst_97 = arith.constant 0.000000e+00 : f32
    %280 = vector.shape_cast %279 : vector<1x128xi1> to vector<1x128xi1>
    %281 = vector.broadcast %280 : vector<1x128xi1> to vector<8x128xi1>
    %282 = vector.broadcast %cst_97 : f32 to vector<8x128xf32>
    %283 = arith.select %281, %240, %282 : vector<8x128xi1>, vector<8x128xf32>
    %284 = arith.truncf %283 : vector<8x128xf32> to vector<8x128xbf16>
    %cst_98 = arith.constant 0.000000e+00 : f32
    %285 = vector.shape_cast %279 : vector<1x128xi1> to vector<1x128xi1>
    %286 = vector.broadcast %285 : vector<1x128xi1> to vector<8x128xi1>
    %287 = vector.broadcast %cst_98 : f32 to vector<8x128xf32>
    %288 = arith.select %286, %241, %287 : vector<8x128xi1>, vector<8x128xf32>
    %289 = arith.truncf %288 : vector<8x128xf32> to vector<8x128xbf16>
    %cst_99 = arith.constant dense<0.000000e+00> : vector<8x8xf32>
    %290 = tpu.matmul %244, %284, %cst_99 {dimension_numbers = #tpu.dot_dimension_numbers<[1], [1], [0], [0], [0, 0, 1, 0], [], []>} : vector<8x128xbf16>, vector<8x128xbf16>, vector<8x8xf32> -> vector<8x8xf32>
    %cst_100 = arith.constant 0.353553385 : f32
    %291 = vector.broadcast %cst_100 : f32 to vector<8x8xf32>
    %292 = arith.mulf %290, %291 : vector<8x8xf32>
    %cst_101 = arith.constant dense<0xFF800000> : vector<8xf32>
    %293 = vector.multi_reduction <maximumf>, %292, %cst_101 [1] : vector<8x8xf32> to vector<8xf32>
    %294 = vector.shape_cast %293 : vector<8xf32> to vector<8x1xf32>
    %295 = vector.broadcast %294 : vector<8x1xf32> to vector<8x8xf32>
    %296 = arith.subf %292, %295 : vector<8x8xf32>
    %297 = math.exp %296 : vector<8x8xf32>
    %cst_102 = arith.constant dense<0.000000e+00> : vector<8xf32>
    %298 = vector.multi_reduction <add>, %297, %cst_102 [1] : vector<8x8xf32> to vector<8xf32>
    %299 = vector.shape_cast %298 : vector<8xf32> to vector<8x1xf32>
    %300 = tpu.reciprocal %299 {approx = true} : vector<8x1xf32> -> vector<8x1xf32>
    %301 = vector.broadcast %300 : vector<8x1xf32> to vector<8x8xf32>
    %302 = arith.mulf %297, %301 : vector<8x8xf32>
    %303 = arith.truncf %302 : vector<8x8xf32> to vector<8x8xbf16>
    %cst_103 = arith.constant dense<0.000000e+00> : vector<8x128xf32>
    %304 = tpu.matmul %303, %289, %cst_103 {dimension_numbers = #tpu.dot_dimension_numbers<[1], [0], [0], [1], [0, 0, 1, 1], [], []>} : vector<8x8xbf16>, vector<8x128xbf16>, vector<8x128xf32> -> vector<8x128xf32>
    %305 = arith.addf %274, %304 : vector<8x128xf32>
    %c16_i32_104 = arith.constant 16 : i32
    %306 = vector.broadcast %c16_i32_104 : i32 to vector<1x128xi32>
    %307 = arith.cmpi sge, %0, %306 : vector<1x128xi32>
    %c24_i32_105 = arith.constant 24 : i32
    %308 = vector.broadcast %c24_i32_105 : i32 to vector<1x128xi32>
    %309 = arith.cmpi slt, %0, %308 : vector<1x128xi32>
    %310 = arith.andi %307, %309 : vector<1x128xi1>
    %cst_106 = arith.constant 0.000000e+00 : f32
    %311 = vector.shape_cast %310 : vector<1x128xi1> to vector<1x128xi1>
    %312 = vector.broadcast %311 : vector<1x128xi1> to vector<8x128xi1>
    %313 = vector.broadcast %cst_106 : f32 to vector<8x128xf32>
    %314 = arith.select %312, %240, %313 : vector<8x128xi1>, vector<8x128xf32>
    %315 = arith.truncf %314 : vector<8x128xf32> to vector<8x128xbf16>
    %cst_107 = arith.constant 0.000000e+00 : f32
    %316 = vector.shape_cast %310 : vector<1x128xi1> to vector<1x128xi1>
    %317 = vector.broadcast %316 : vector<1x128xi1> to vector<8x128xi1>
    %318 = vector.broadcast %cst_107 : f32 to vector<8x128xf32>
    %319 = arith.select %317, %241, %318 : vector<8x128xi1>, vector<8x128xf32>
    %320 = arith.truncf %319 : vector<8x128xf32> to vector<8x128xbf16>
    %cst_108 = arith.constant dense<0.000000e+00> : vector<8x8xf32>
    %321 = tpu.matmul %244, %315, %cst_108 {dimension_numbers = #tpu.dot_dimension_numbers<[1], [1], [0], [0], [0, 0, 1, 0], [], []>} : vector<8x128xbf16>, vector<8x128xbf16>, vector<8x8xf32> -> vector<8x8xf32>
    %cst_109 = arith.constant 0.353553385 : f32
    %322 = vector.broadcast %cst_109 : f32 to vector<8x8xf32>
    %323 = arith.mulf %321, %322 : vector<8x8xf32>
    %cst_110 = arith.constant dense<0xFF800000> : vector<8xf32>
    %324 = vector.multi_reduction <maximumf>, %323, %cst_110 [1] : vector<8x8xf32> to vector<8xf32>
    %325 = vector.shape_cast %324 : vector<8xf32> to vector<8x1xf32>
    %326 = vector.broadcast %325 : vector<8x1xf32> to vector<8x8xf32>
    %327 = arith.subf %323, %326 : vector<8x8xf32>
    %328 = math.exp %327 : vector<8x8xf32>
    %cst_111 = arith.constant dense<0.000000e+00> : vector<8xf32>
    %329 = vector.multi_reduction <add>, %328, %cst_111 [1] : vector<8x8xf32> to vector<8xf32>
    %330 = vector.shape_cast %329 : vector<8xf32> to vector<8x1xf32>
    %331 = tpu.reciprocal %330 {approx = true} : vector<8x1xf32> -> vector<8x1xf32>
    %332 = vector.broadcast %331 : vector<8x1xf32> to vector<8x8xf32>
    %333 = arith.mulf %328, %332 : vector<8x8xf32>
    %334 = arith.truncf %333 : vector<8x8xf32> to vector<8x8xbf16>
    %cst_112 = arith.constant dense<0.000000e+00> : vector<8x128xf32>
    %335 = tpu.matmul %334, %320, %cst_112 {dimension_numbers = #tpu.dot_dimension_numbers<[1], [0], [0], [1], [0, 0, 1, 1], [], []>} : vector<8x8xbf16>, vector<8x128xbf16>, vector<8x128xf32> -> vector<8x128xf32>
    %336 = arith.addf %305, %335 : vector<8x128xf32>
    %c24_i32_113 = arith.constant 24 : i32
    %337 = vector.broadcast %c24_i32_113 : i32 to vector<1x128xi32>
    %338 = arith.cmpi sge, %0, %337 : vector<1x128xi32>
    %c32_i32_114 = arith.constant 32 : i32
    %339 = vector.broadcast %c32_i32_114 : i32 to vector<1x128xi32>
    %340 = arith.cmpi slt, %0, %339 : vector<1x128xi32>
    %341 = arith.andi %338, %340 : vector<1x128xi1>
    %cst_115 = arith.constant 0.000000e+00 : f32
    %342 = vector.shape_cast %341 : vector<1x128xi1> to vector<1x128xi1>
    %343 = vector.broadcast %342 : vector<1x128xi1> to vector<8x128xi1>
    %344 = vector.broadcast %cst_115 : f32 to vector<8x128xf32>
    %345 = arith.select %343, %240, %344 : vector<8x128xi1>, vector<8x128xf32>
    %346 = arith.truncf %345 : vector<8x128xf32> to vector<8x128xbf16>
    %cst_116 = arith.constant 0.000000e+00 : f32
    %347 = vector.shape_cast %341 : vector<1x128xi1> to vector<1x128xi1>
    %348 = vector.broadcast %347 : vector<1x128xi1> to vector<8x128xi1>
    %349 = vector.broadcast %cst_116 : f32 to vector<8x128xf32>
    %350 = arith.select %348, %241, %349 : vector<8x128xi1>, vector<8x128xf32>
    %351 = arith.truncf %350 : vector<8x128xf32> to vector<8x128xbf16>
    %cst_117 = arith.constant dense<0.000000e+00> : vector<8x8xf32>
    %352 = tpu.matmul %244, %346, %cst_117 {dimension_numbers = #tpu.dot_dimension_numbers<[1], [1], [0], [0], [0, 0, 1, 0], [], []>} : vector<8x128xbf16>, vector<8x128xbf16>, vector<8x8xf32> -> vector<8x8xf32>
    %cst_118 = arith.constant 0.353553385 : f32
    %353 = vector.broadcast %cst_118 : f32 to vector<8x8xf32>
    %354 = arith.mulf %352, %353 : vector<8x8xf32>
    %cst_119 = arith.constant dense<0xFF800000> : vector<8xf32>
    %355 = vector.multi_reduction <maximumf>, %354, %cst_119 [1] : vector<8x8xf32> to vector<8xf32>
    %356 = vector.shape_cast %355 : vector<8xf32> to vector<8x1xf32>
    %357 = vector.broadcast %356 : vector<8x1xf32> to vector<8x8xf32>
    %358 = arith.subf %354, %357 : vector<8x8xf32>
    %359 = math.exp %358 : vector<8x8xf32>
    %cst_120 = arith.constant dense<0.000000e+00> : vector<8xf32>
    %360 = vector.multi_reduction <add>, %359, %cst_120 [1] : vector<8x8xf32> to vector<8xf32>
    %361 = vector.shape_cast %360 : vector<8xf32> to vector<8x1xf32>
    %362 = tpu.reciprocal %361 {approx = true} : vector<8x1xf32> -> vector<8x1xf32>
    %363 = vector.broadcast %362 : vector<8x1xf32> to vector<8x8xf32>
    %364 = arith.mulf %359, %363 : vector<8x8xf32>
    %365 = arith.truncf %364 : vector<8x8xf32> to vector<8x8xbf16>
    %cst_121 = arith.constant dense<0.000000e+00> : vector<8x128xf32>
    %366 = tpu.matmul %365, %351, %cst_121 {dimension_numbers = #tpu.dot_dimension_numbers<[1], [0], [0], [1], [0, 0, 1, 1], [], []>} : vector<8x8xbf16>, vector<8x128xbf16>, vector<8x128xf32> -> vector<8x128xf32>
    %367 = arith.addf %336, %366 : vector<8x128xf32>
    %368 = arith.truncf %367 : vector<8x128xf32> to vector<8x128xbf16>
    %cst_122 = arith.constant dense<0.000000e+00> : vector<8x128xf32>
    %369 = tpu.matmul %368, %243, %cst_122 {dimension_numbers = #tpu.dot_dimension_numbers<[1], [0], [0], [1], [0, 0, 1, 1], [], []>} : vector<8x128xbf16>, vector<128x128xbf16>, vector<8x128xf32> -> vector<8x128xf32>
    %370 = vector.broadcast %225 : vector<1x128xf32> to vector<8x128xf32>
    %371 = arith.addf %369, %370 : vector<8x128xf32>
    %372 = arith.addf %371, %222 : vector<8x128xf32>
    %cst_123 = arith.constant dense<0.000000e+00> : vector<8xf32>
    %373 = vector.multi_reduction <add>, %372, %cst_123 [1] : vector<8x128xf32> to vector<8xf32>
    %374 = vector.shape_cast %373 : vector<8xf32> to vector<8x1xf32>
    %cst_124 = arith.constant 3.125000e-02 : f32
    %375 = vector.broadcast %cst_124 : f32 to vector<8x1xf32>
    %376 = arith.mulf %374, %375 : vector<8x1xf32>
    %377 = vector.broadcast %376 : vector<8x1xf32> to vector<8x128xf32>
    %378 = arith.subf %372, %377 : vector<8x128xf32>
    %c32_i32_125 = arith.constant 32 : i32
    %379 = vector.broadcast %c32_i32_125 : i32 to vector<1x128xi32>
    %380 = arith.cmpi slt, %0, %379 : vector<1x128xi32>
    %cst_126 = arith.constant 0.000000e+00 : f32
    %381 = vector.shape_cast %380 : vector<1x128xi1> to vector<1x128xi1>
    %382 = vector.broadcast %381 : vector<1x128xi1> to vector<8x128xi1>
    %383 = vector.broadcast %cst_126 : f32 to vector<8x128xf32>
    %384 = arith.select %382, %378, %383 : vector<8x128xi1>, vector<8x128xf32>
    %385 = arith.mulf %384, %384 : vector<8x128xf32>
    %cst_127 = arith.constant dense<0.000000e+00> : vector<8xf32>
    %386 = vector.multi_reduction <add>, %385, %cst_127 [1] : vector<8x128xf32> to vector<8xf32>
    %387 = vector.shape_cast %386 : vector<8xf32> to vector<8x1xf32>
    %cst_128 = arith.constant 3.125000e-02 : f32
    %388 = vector.broadcast %cst_128 : f32 to vector<8x1xf32>
    %389 = arith.mulf %387, %388 : vector<8x1xf32>
    %cst_129 = arith.constant 9.99999974E-6 : f32
    %390 = vector.broadcast %cst_129 : f32 to vector<8x1xf32>
    %391 = arith.addf %389, %390 : vector<8x1xf32>
    %392 = math.rsqrt %391 : vector<8x1xf32>
    %393 = vector.broadcast %392 : vector<8x1xf32> to vector<8x128xf32>
    %394 = arith.mulf %378, %393 : vector<8x128xf32>
    %395 = vector.broadcast %227 : vector<1x128xf32> to vector<8x128xf32>
    %396 = arith.mulf %394, %395 : vector<8x128xf32>
    %397 = vector.broadcast %228 : vector<1x128xf32> to vector<8x128xf32>
    %398 = arith.addf %396, %397 : vector<8x128xf32>
    %c1_130 = arith.constant 1 : index
    %c0_131 = arith.constant 0 : index
    %c0_132 = arith.constant 0 : index
    %399 = vector.load %arg6[%c1_130, %c0_131, %c0_132] : memref<2x128x128xbf16, #tpu.memory_space<vmem>>, vector<1x128x128xbf16>
    %400 = vector.shape_cast %399 : vector<1x128x128xbf16> to vector<128x128xbf16>
    %c1_133 = arith.constant 1 : index
    %c0_134 = arith.constant 0 : index
    %c0_135 = arith.constant 0 : index
    %401 = vector.load %arg9[%c1_133, %c0_134, %c0_135] : memref<2x1x128xf32, #tpu.memory_space<vmem>>, vector<1x1x128xf32>
    %402 = vector.shape_cast %401 : vector<1x1x128xf32> to vector<1x128xf32>
    %c1_136 = arith.constant 1 : index
    %c0_137 = arith.constant 0 : index
    %c0_138 = arith.constant 0 : index
    %403 = vector.load %arg7[%c1_136, %c0_137, %c0_138] : memref<2x128x128xbf16, #tpu.memory_space<vmem>>, vector<1x128x128xbf16>
    %404 = vector.shape_cast %403 : vector<1x128x128xbf16> to vector<128x128xbf16>
    %405 = arith.truncf %398 : vector<8x128xf32> to vector<8x128xbf16>
    %cst_139 = arith.constant dense<0.000000e+00> : vector<8x128xf32>
    %406 = tpu.matmul %405, %400, %cst_139 {dimension_numbers = #tpu.dot_dimension_numbers<[1], [0], [0], [1], [0, 0, 1, 1], [], []>} : vector<8x128xbf16>, vector<128x128xbf16>, vector<8x128xf32> -> vector<8x128xf32>
    %407 = vector.broadcast %402 : vector<1x128xf32> to vector<8x128xf32>
    %408 = arith.addf %406, %407 : vector<8x128xf32>
    %cst_140 = arith.constant 0.000000e+00 : f32
    %409 = vector.broadcast %cst_140 : f32 to vector<8x128xf32>
    %410 = arith.maximumf %408, %409 : vector<8x128xf32>
    %411 = arith.truncf %410 : vector<8x128xf32> to vector<8x128xbf16>
    %cst_141 = arith.constant dense<0.000000e+00> : vector<8x128xf32>
    %412 = tpu.matmul %411, %404, %cst_141 {dimension_numbers = #tpu.dot_dimension_numbers<[1], [0], [0], [1], [0, 0, 1, 1], [], []>} : vector<8x128xbf16>, vector<128x128xbf16>, vector<8x128xf32> -> vector<8x128xf32>
    %413 = vector.broadcast %226 : vector<1x128xf32> to vector<8x128xf32>
    %414 = arith.addf %412, %413 : vector<8x128xf32>
    %415 = arith.addf %414, %398 : vector<8x128xf32>
    %cst_142 = arith.constant dense<0.000000e+00> : vector<8xf32>
    %416 = vector.multi_reduction <add>, %415, %cst_142 [1] : vector<8x128xf32> to vector<8xf32>
    %417 = vector.shape_cast %416 : vector<8xf32> to vector<8x1xf32>
    %cst_143 = arith.constant 3.125000e-02 : f32
    %418 = vector.broadcast %cst_143 : f32 to vector<8x1xf32>
    %419 = arith.mulf %417, %418 : vector<8x1xf32>
    %420 = vector.broadcast %419 : vector<8x1xf32> to vector<8x128xf32>
    %421 = arith.subf %415, %420 : vector<8x128xf32>
    %c32_i32_144 = arith.constant 32 : i32
    %422 = vector.broadcast %c32_i32_144 : i32 to vector<1x128xi32>
    %423 = arith.cmpi slt, %0, %422 : vector<1x128xi32>
    %cst_145 = arith.constant 0.000000e+00 : f32
    %424 = vector.shape_cast %423 : vector<1x128xi1> to vector<1x128xi1>
    %425 = vector.broadcast %424 : vector<1x128xi1> to vector<8x128xi1>
    %426 = vector.broadcast %cst_145 : f32 to vector<8x128xf32>
    %427 = arith.select %425, %421, %426 : vector<8x128xi1>, vector<8x128xf32>
    %428 = arith.mulf %427, %427 : vector<8x128xf32>
    %cst_146 = arith.constant dense<0.000000e+00> : vector<8xf32>
    %429 = vector.multi_reduction <add>, %428, %cst_146 [1] : vector<8x128xf32> to vector<8xf32>
    %430 = vector.shape_cast %429 : vector<8xf32> to vector<8x1xf32>
    %cst_147 = arith.constant 3.125000e-02 : f32
    %431 = vector.broadcast %cst_147 : f32 to vector<8x1xf32>
    %432 = arith.mulf %430, %431 : vector<8x1xf32>
    %cst_148 = arith.constant 9.99999974E-6 : f32
    %433 = vector.broadcast %cst_148 : f32 to vector<8x1xf32>
    %434 = arith.addf %432, %433 : vector<8x1xf32>
    %435 = math.rsqrt %434 : vector<8x1xf32>
    %436 = vector.broadcast %435 : vector<8x1xf32> to vector<8x128xf32>
    %437 = arith.mulf %421, %436 : vector<8x128xf32>
    %438 = vector.broadcast %229 : vector<1x128xf32> to vector<8x128xf32>
    %439 = arith.mulf %437, %438 : vector<8x128xf32>
    %440 = vector.broadcast %230 : vector<1x128xf32> to vector<8x128xf32>
    %441 = arith.addf %439, %440 : vector<8x128xf32>
    %c0_149 = arith.constant 0 : index
    %c0_150 = arith.constant 0 : index
    %c0_151 = arith.constant 0 : index
    %442 = vector.load %arg2[%c0_149, %c0_150, %c0_151] : memref<1x8x128xf32, #tpu.memory_space<vmem>>, vector<1x8x128xf32>
    %443 = vector.shape_cast %442 : vector<1x8x128xf32> to vector<8x128xf32>
    %c0_152 = arith.constant 0 : index
    %c0_153 = arith.constant 0 : index
    %c0_154 = arith.constant 0 : index
    %444 = vector.load %arg21[%c0_152, %c0_153, %c0_154] : memref<2x10x128xf32, #tpu.memory_space<vmem>>, vector<1x10x128xf32>
    %445 = vector.shape_cast %444 : vector<1x10x128xf32> to vector<10x128xf32>
    %446 = vector.extract_strided_slice %445 {offsets = [0, 0], sizes = [1, 128], strides = [1, 1]} : vector<10x128xf32> to vector<1x128xf32>
    %447 = vector.extract_strided_slice %445 {offsets = [1, 0], sizes = [1, 128], strides = [1, 1]} : vector<10x128xf32> to vector<1x128xf32>
    %448 = vector.extract_strided_slice %445 {offsets = [2, 0], sizes = [1, 128], strides = [1, 1]} : vector<10x128xf32> to vector<1x128xf32>
    %449 = vector.extract_strided_slice %445 {offsets = [3, 0], sizes = [1, 128], strides = [1, 1]} : vector<10x128xf32> to vector<1x128xf32>
    %450 = vector.extract_strided_slice %445 {offsets = [4, 0], sizes = [1, 128], strides = [1, 1]} : vector<10x128xf32> to vector<1x128xf32>
    %451 = vector.extract_strided_slice %445 {offsets = [5, 0], sizes = [1, 128], strides = [1, 1]} : vector<10x128xf32> to vector<1x128xf32>
    %452 = vector.extract_strided_slice %445 {offsets = [6, 0], sizes = [1, 128], strides = [1, 1]} : vector<10x128xf32> to vector<1x128xf32>
    %453 = vector.extract_strided_slice %445 {offsets = [7, 0], sizes = [1, 128], strides = [1, 1]} : vector<10x128xf32> to vector<1x128xf32>
    %454 = vector.extract_strided_slice %445 {offsets = [8, 0], sizes = [1, 128], strides = [1, 1]} : vector<10x128xf32> to vector<1x128xf32>
    %455 = vector.extract_strided_slice %445 {offsets = [9, 0], sizes = [1, 128], strides = [1, 1]} : vector<10x128xf32> to vector<1x128xf32>
    %c0_155 = arith.constant 0 : index
    %c0_156 = arith.constant 0 : index
    %c0_157 = arith.constant 0 : index
    %456 = vector.load %arg11[%c0_155, %c0_156, %c0_157] : memref<2x128x384xbf16, #tpu.memory_space<vmem>>, vector<1x128x384xbf16>
    %457 = vector.shape_cast %456 : vector<1x128x384xbf16> to vector<128x384xbf16>
    %c0_158 = arith.constant 0 : index
    %c0_159 = arith.constant 0 : index
    %c0_160 = arith.constant 0 : index
    %458 = vector.load %arg18[%c0_158, %c0_159, %c0_160] : memref<2x1x384xf32, #tpu.memory_space<vmem>>, vector<1x1x384xf32>
    %459 = vector.shape_cast %458 : vector<1x1x384xf32> to vector<1x384xf32>
    %460 = arith.truncf %443 : vector<8x128xf32> to vector<8x128xbf16>
    %cst_161 = arith.constant dense<0.000000e+00> : vector<8x384xf32>
    %461 = tpu.matmul %460, %457, %cst_161 {dimension_numbers = #tpu.dot_dimension_numbers<[1], [0], [0], [1], [0, 0, 1, 1], [], []>} : vector<8x128xbf16>, vector<128x384xbf16>, vector<8x384xf32> -> vector<8x384xf32>
    %462 = vector.broadcast %459 : vector<1x384xf32> to vector<8x384xf32>
    %463 = arith.addf %461, %462 : vector<8x384xf32>
    %464 = vector.extract_strided_slice %463 {offsets = [0, 0], sizes = [8, 128], strides = [1, 1]} : vector<8x384xf32> to vector<8x128xf32>
    %465 = vector.extract_strided_slice %463 {offsets = [0, 128], sizes = [8, 128], strides = [1, 1]} : vector<8x384xf32> to vector<8x128xf32>
    %466 = vector.extract_strided_slice %463 {offsets = [0, 256], sizes = [8, 128], strides = [1, 1]} : vector<8x384xf32> to vector<8x128xf32>
    %c0_162 = arith.constant 0 : index
    %c0_163 = arith.constant 0 : index
    %c0_164 = arith.constant 0 : index
    %467 = vector.load %arg12[%c0_162, %c0_163, %c0_164] : memref<2x128x128xbf16, #tpu.memory_space<vmem>>, vector<1x128x128xbf16>
    %468 = vector.shape_cast %467 : vector<1x128x128xbf16> to vector<128x128xbf16>
    %469 = arith.truncf %464 : vector<8x128xf32> to vector<8x128xbf16>
    %c0_i32_165 = arith.constant 0 : i32
    %470 = vector.broadcast %c0_i32_165 : i32 to vector<1x128xi32>
    %471 = arith.cmpi sge, %0, %470 : vector<1x128xi32>
    %c8_i32_166 = arith.constant 8 : i32
    %472 = vector.broadcast %c8_i32_166 : i32 to vector<1x128xi32>
    %473 = arith.cmpi slt, %0, %472 : vector<1x128xi32>
    %474 = arith.andi %471, %473 : vector<1x128xi1>
    %cst_167 = arith.constant 0.000000e+00 : f32
    %475 = vector.shape_cast %474 : vector<1x128xi1> to vector<1x128xi1>
    %476 = vector.broadcast %475 : vector<1x128xi1> to vector<8x128xi1>
    %477 = vector.broadcast %cst_167 : f32 to vector<8x128xf32>
    %478 = arith.select %476, %465, %477 : vector<8x128xi1>, vector<8x128xf32>
    %479 = arith.truncf %478 : vector<8x128xf32> to vector<8x128xbf16>
    %cst_168 = arith.constant 0.000000e+00 : f32
    %480 = vector.shape_cast %474 : vector<1x128xi1> to vector<1x128xi1>
    %481 = vector.broadcast %480 : vector<1x128xi1> to vector<8x128xi1>
    %482 = vector.broadcast %cst_168 : f32 to vector<8x128xf32>
    %483 = arith.select %481, %466, %482 : vector<8x128xi1>, vector<8x128xf32>
    %484 = arith.truncf %483 : vector<8x128xf32> to vector<8x128xbf16>
    %cst_169 = arith.constant dense<0.000000e+00> : vector<8x8xf32>
    %485 = tpu.matmul %469, %479, %cst_169 {dimension_numbers = #tpu.dot_dimension_numbers<[1], [1], [0], [0], [0, 0, 1, 0], [], []>} : vector<8x128xbf16>, vector<8x128xbf16>, vector<8x8xf32> -> vector<8x8xf32>
    %cst_170 = arith.constant 0.353553385 : f32
    %486 = vector.broadcast %cst_170 : f32 to vector<8x8xf32>
    %487 = arith.mulf %485, %486 : vector<8x8xf32>
    %cst_171 = arith.constant dense<0xFF800000> : vector<8xf32>
    %488 = vector.multi_reduction <maximumf>, %487, %cst_171 [1] : vector<8x8xf32> to vector<8xf32>
    %489 = vector.shape_cast %488 : vector<8xf32> to vector<8x1xf32>
    %490 = vector.broadcast %489 : vector<8x1xf32> to vector<8x8xf32>
    %491 = arith.subf %487, %490 : vector<8x8xf32>
    %492 = math.exp %491 : vector<8x8xf32>
    %cst_172 = arith.constant dense<0.000000e+00> : vector<8xf32>
    %493 = vector.multi_reduction <add>, %492, %cst_172 [1] : vector<8x8xf32> to vector<8xf32>
    %494 = vector.shape_cast %493 : vector<8xf32> to vector<8x1xf32>
    %495 = tpu.reciprocal %494 {approx = true} : vector<8x1xf32> -> vector<8x1xf32>
    %496 = vector.broadcast %495 : vector<8x1xf32> to vector<8x8xf32>
    %497 = arith.mulf %492, %496 : vector<8x8xf32>
    %498 = arith.truncf %497 : vector<8x8xf32> to vector<8x8xbf16>
    %cst_173 = arith.constant dense<0.000000e+00> : vector<8x128xf32>
    %499 = tpu.matmul %498, %484, %cst_173 {dimension_numbers = #tpu.dot_dimension_numbers<[1], [0], [0], [1], [0, 0, 1, 1], [], []>} : vector<8x8xbf16>, vector<8x128xbf16>, vector<8x128xf32> -> vector<8x128xf32>
    %c8_i32_174 = arith.constant 8 : i32
    %500 = vector.broadcast %c8_i32_174 : i32 to vector<1x128xi32>
    %501 = arith.cmpi sge, %0, %500 : vector<1x128xi32>
    %c16_i32_175 = arith.constant 16 : i32
    %502 = vector.broadcast %c16_i32_175 : i32 to vector<1x128xi32>
    %503 = arith.cmpi slt, %0, %502 : vector<1x128xi32>
    %504 = arith.andi %501, %503 : vector<1x128xi1>
    %cst_176 = arith.constant 0.000000e+00 : f32
    %505 = vector.shape_cast %504 : vector<1x128xi1> to vector<1x128xi1>
    %506 = vector.broadcast %505 : vector<1x128xi1> to vector<8x128xi1>
    %507 = vector.broadcast %cst_176 : f32 to vector<8x128xf32>
    %508 = arith.select %506, %465, %507 : vector<8x128xi1>, vector<8x128xf32>
    %509 = arith.truncf %508 : vector<8x128xf32> to vector<8x128xbf16>
    %cst_177 = arith.constant 0.000000e+00 : f32
    %510 = vector.shape_cast %504 : vector<1x128xi1> to vector<1x128xi1>
    %511 = vector.broadcast %510 : vector<1x128xi1> to vector<8x128xi1>
    %512 = vector.broadcast %cst_177 : f32 to vector<8x128xf32>
    %513 = arith.select %511, %466, %512 : vector<8x128xi1>, vector<8x128xf32>
    %514 = arith.truncf %513 : vector<8x128xf32> to vector<8x128xbf16>
    %cst_178 = arith.constant dense<0.000000e+00> : vector<8x8xf32>
    %515 = tpu.matmul %469, %509, %cst_178 {dimension_numbers = #tpu.dot_dimension_numbers<[1], [1], [0], [0], [0, 0, 1, 0], [], []>} : vector<8x128xbf16>, vector<8x128xbf16>, vector<8x8xf32> -> vector<8x8xf32>
    %cst_179 = arith.constant 0.353553385 : f32
    %516 = vector.broadcast %cst_179 : f32 to vector<8x8xf32>
    %517 = arith.mulf %515, %516 : vector<8x8xf32>
    %cst_180 = arith.constant dense<0xFF800000> : vector<8xf32>
    %518 = vector.multi_reduction <maximumf>, %517, %cst_180 [1] : vector<8x8xf32> to vector<8xf32>
    %519 = vector.shape_cast %518 : vector<8xf32> to vector<8x1xf32>
    %520 = vector.broadcast %519 : vector<8x1xf32> to vector<8x8xf32>
    %521 = arith.subf %517, %520 : vector<8x8xf32>
    %522 = math.exp %521 : vector<8x8xf32>
    %cst_181 = arith.constant dense<0.000000e+00> : vector<8xf32>
    %523 = vector.multi_reduction <add>, %522, %cst_181 [1] : vector<8x8xf32> to vector<8xf32>
    %524 = vector.shape_cast %523 : vector<8xf32> to vector<8x1xf32>
    %525 = tpu.reciprocal %524 {approx = true} : vector<8x1xf32> -> vector<8x1xf32>
    %526 = vector.broadcast %525 : vector<8x1xf32> to vector<8x8xf32>
    %527 = arith.mulf %522, %526 : vector<8x8xf32>
    %528 = arith.truncf %527 : vector<8x8xf32> to vector<8x8xbf16>
    %cst_182 = arith.constant dense<0.000000e+00> : vector<8x128xf32>
    %529 = tpu.matmul %528, %514, %cst_182 {dimension_numbers = #tpu.dot_dimension_numbers<[1], [0], [0], [1], [0, 0, 1, 1], [], []>} : vector<8x8xbf16>, vector<8x128xbf16>, vector<8x128xf32> -> vector<8x128xf32>
    %530 = arith.addf %499, %529 : vector<8x128xf32>
    %c16_i32_183 = arith.constant 16 : i32
    %531 = vector.broadcast %c16_i32_183 : i32 to vector<1x128xi32>
    %532 = arith.cmpi sge, %0, %531 : vector<1x128xi32>
    %c24_i32_184 = arith.constant 24 : i32
    %533 = vector.broadcast %c24_i32_184 : i32 to vector<1x128xi32>
    %534 = arith.cmpi slt, %0, %533 : vector<1x128xi32>
    %535 = arith.andi %532, %534 : vector<1x128xi1>
    %cst_185 = arith.constant 0.000000e+00 : f32
    %536 = vector.shape_cast %535 : vector<1x128xi1> to vector<1x128xi1>
    %537 = vector.broadcast %536 : vector<1x128xi1> to vector<8x128xi1>
    %538 = vector.broadcast %cst_185 : f32 to vector<8x128xf32>
    %539 = arith.select %537, %465, %538 : vector<8x128xi1>, vector<8x128xf32>
    %540 = arith.truncf %539 : vector<8x128xf32> to vector<8x128xbf16>
    %cst_186 = arith.constant 0.000000e+00 : f32
    %541 = vector.shape_cast %535 : vector<1x128xi1> to vector<1x128xi1>
    %542 = vector.broadcast %541 : vector<1x128xi1> to vector<8x128xi1>
    %543 = vector.broadcast %cst_186 : f32 to vector<8x128xf32>
    %544 = arith.select %542, %466, %543 : vector<8x128xi1>, vector<8x128xf32>
    %545 = arith.truncf %544 : vector<8x128xf32> to vector<8x128xbf16>
    %cst_187 = arith.constant dense<0.000000e+00> : vector<8x8xf32>
    %546 = tpu.matmul %469, %540, %cst_187 {dimension_numbers = #tpu.dot_dimension_numbers<[1], [1], [0], [0], [0, 0, 1, 0], [], []>} : vector<8x128xbf16>, vector<8x128xbf16>, vector<8x8xf32> -> vector<8x8xf32>
    %cst_188 = arith.constant 0.353553385 : f32
    %547 = vector.broadcast %cst_188 : f32 to vector<8x8xf32>
    %548 = arith.mulf %546, %547 : vector<8x8xf32>
    %cst_189 = arith.constant dense<0xFF800000> : vector<8xf32>
    %549 = vector.multi_reduction <maximumf>, %548, %cst_189 [1] : vector<8x8xf32> to vector<8xf32>
    %550 = vector.shape_cast %549 : vector<8xf32> to vector<8x1xf32>
    %551 = vector.broadcast %550 : vector<8x1xf32> to vector<8x8xf32>
    %552 = arith.subf %548, %551 : vector<8x8xf32>
    %553 = math.exp %552 : vector<8x8xf32>
    %cst_190 = arith.constant dense<0.000000e+00> : vector<8xf32>
    %554 = vector.multi_reduction <add>, %553, %cst_190 [1] : vector<8x8xf32> to vector<8xf32>
    %555 = vector.shape_cast %554 : vector<8xf32> to vector<8x1xf32>
    %556 = tpu.reciprocal %555 {approx = true} : vector<8x1xf32> -> vector<8x1xf32>
    %557 = vector.broadcast %556 : vector<8x1xf32> to vector<8x8xf32>
    %558 = arith.mulf %553, %557 : vector<8x8xf32>
    %559 = arith.truncf %558 : vector<8x8xf32> to vector<8x8xbf16>
    %cst_191 = arith.constant dense<0.000000e+00> : vector<8x128xf32>
    %560 = tpu.matmul %559, %545, %cst_191 {dimension_numbers = #tpu.dot_dimension_numbers<[1], [0], [0], [1], [0, 0, 1, 1], [], []>} : vector<8x8xbf16>, vector<8x128xbf16>, vector<8x128xf32> -> vector<8x128xf32>
    %561 = arith.addf %530, %560 : vector<8x128xf32>
    %c24_i32_192 = arith.constant 24 : i32
    %562 = vector.broadcast %c24_i32_192 : i32 to vector<1x128xi32>
    %563 = arith.cmpi sge, %0, %562 : vector<1x128xi32>
    %c32_i32_193 = arith.constant 32 : i32
    %564 = vector.broadcast %c32_i32_193 : i32 to vector<1x128xi32>
    %565 = arith.cmpi slt, %0, %564 : vector<1x128xi32>
    %566 = arith.andi %563, %565 : vector<1x128xi1>
    %cst_194 = arith.constant 0.000000e+00 : f32
    %567 = vector.shape_cast %566 : vector<1x128xi1> to vector<1x128xi1>
    %568 = vector.broadcast %567 : vector<1x128xi1> to vector<8x128xi1>
    %569 = vector.broadcast %cst_194 : f32 to vector<8x128xf32>
    %570 = arith.select %568, %465, %569 : vector<8x128xi1>, vector<8x128xf32>
    %571 = arith.truncf %570 : vector<8x128xf32> to vector<8x128xbf16>
    %cst_195 = arith.constant 0.000000e+00 : f32
    %572 = vector.shape_cast %566 : vector<1x128xi1> to vector<1x128xi1>
    %573 = vector.broadcast %572 : vector<1x128xi1> to vector<8x128xi1>
    %574 = vector.broadcast %cst_195 : f32 to vector<8x128xf32>
    %575 = arith.select %573, %466, %574 : vector<8x128xi1>, vector<8x128xf32>
    %576 = arith.truncf %575 : vector<8x128xf32> to vector<8x128xbf16>
    %cst_196 = arith.constant dense<0.000000e+00> : vector<8x8xf32>
    %577 = tpu.matmul %469, %571, %cst_196 {dimension_numbers = #tpu.dot_dimension_numbers<[1], [1], [0], [0], [0, 0, 1, 0], [], []>} : vector<8x128xbf16>, vector<8x128xbf16>, vector<8x8xf32> -> vector<8x8xf32>
    %cst_197 = arith.constant 0.353553385 : f32
    %578 = vector.broadcast %cst_197 : f32 to vector<8x8xf32>
    %579 = arith.mulf %577, %578 : vector<8x8xf32>
    %cst_198 = arith.constant dense<0xFF800000> : vector<8xf32>
    %580 = vector.multi_reduction <maximumf>, %579, %cst_198 [1] : vector<8x8xf32> to vector<8xf32>
    %581 = vector.shape_cast %580 : vector<8xf32> to vector<8x1xf32>
    %582 = vector.broadcast %581 : vector<8x1xf32> to vector<8x8xf32>
    %583 = arith.subf %579, %582 : vector<8x8xf32>
    %584 = math.exp %583 : vector<8x8xf32>
    %cst_199 = arith.constant dense<0.000000e+00> : vector<8xf32>
    %585 = vector.multi_reduction <add>, %584, %cst_199 [1] : vector<8x8xf32> to vector<8xf32>
    %586 = vector.shape_cast %585 : vector<8xf32> to vector<8x1xf32>
    %587 = tpu.reciprocal %586 {approx = true} : vector<8x1xf32> -> vector<8x1xf32>
    %588 = vector.broadcast %587 : vector<8x1xf32> to vector<8x8xf32>
    %589 = arith.mulf %584, %588 : vector<8x8xf32>
    %590 = arith.truncf %589 : vector<8x8xf32> to vector<8x8xbf16>
    %cst_200 = arith.constant dense<0.000000e+00> : vector<8x128xf32>
    %591 = tpu.matmul %590, %576, %cst_200 {dimension_numbers = #tpu.dot_dimension_numbers<[1], [0], [0], [1], [0, 0, 1, 1], [], []>} : vector<8x8xbf16>, vector<8x128xbf16>, vector<8x128xf32> -> vector<8x128xf32>
    %592 = arith.addf %561, %591 : vector<8x128xf32>
    %593 = arith.truncf %592 : vector<8x128xf32> to vector<8x128xbf16>
    %cst_201 = arith.constant dense<0.000000e+00> : vector<8x128xf32>
    %594 = tpu.matmul %593, %468, %cst_201 {dimension_numbers = #tpu.dot_dimension_numbers<[1], [0], [0], [1], [0, 0, 1, 1], [], []>} : vector<8x128xbf16>, vector<128x128xbf16>, vector<8x128xf32> -> vector<8x128xf32>
    %595 = vector.broadcast %446 : vector<1x128xf32> to vector<8x128xf32>
    %596 = arith.addf %594, %595 : vector<8x128xf32>
    %597 = arith.addf %596, %443 : vector<8x128xf32>
    %cst_202 = arith.constant dense<0.000000e+00> : vector<8xf32>
    %598 = vector.multi_reduction <add>, %597, %cst_202 [1] : vector<8x128xf32> to vector<8xf32>
    %599 = vector.shape_cast %598 : vector<8xf32> to vector<8x1xf32>
    %cst_203 = arith.constant 3.125000e-02 : f32
    %600 = vector.broadcast %cst_203 : f32 to vector<8x1xf32>
    %601 = arith.mulf %599, %600 : vector<8x1xf32>
    %602 = vector.broadcast %601 : vector<8x1xf32> to vector<8x128xf32>
    %603 = arith.subf %597, %602 : vector<8x128xf32>
    %c32_i32_204 = arith.constant 32 : i32
    %604 = vector.broadcast %c32_i32_204 : i32 to vector<1x128xi32>
    %605 = arith.cmpi slt, %0, %604 : vector<1x128xi32>
    %cst_205 = arith.constant 0.000000e+00 : f32
    %606 = vector.shape_cast %605 : vector<1x128xi1> to vector<1x128xi1>
    %607 = vector.broadcast %606 : vector<1x128xi1> to vector<8x128xi1>
    %608 = vector.broadcast %cst_205 : f32 to vector<8x128xf32>
    %609 = arith.select %607, %603, %608 : vector<8x128xi1>, vector<8x128xf32>
    %610 = arith.mulf %609, %609 : vector<8x128xf32>
    %cst_206 = arith.constant dense<0.000000e+00> : vector<8xf32>
    %611 = vector.multi_reduction <add>, %610, %cst_206 [1] : vector<8x128xf32> to vector<8xf32>
    %612 = vector.shape_cast %611 : vector<8xf32> to vector<8x1xf32>
    %cst_207 = arith.constant 3.125000e-02 : f32
    %613 = vector.broadcast %cst_207 : f32 to vector<8x1xf32>
    %614 = arith.mulf %612, %613 : vector<8x1xf32>
    %cst_208 = arith.constant 9.99999974E-6 : f32
    %615 = vector.broadcast %cst_208 : f32 to vector<8x1xf32>
    %616 = arith.addf %614, %615 : vector<8x1xf32>
    %617 = math.rsqrt %616 : vector<8x1xf32>
    %618 = vector.broadcast %617 : vector<8x1xf32> to vector<8x128xf32>
    %619 = arith.mulf %603, %618 : vector<8x128xf32>
    %620 = vector.broadcast %450 : vector<1x128xf32> to vector<8x128xf32>
    %621 = arith.mulf %619, %620 : vector<8x128xf32>
    %622 = vector.broadcast %451 : vector<1x128xf32> to vector<8x128xf32>
    %623 = arith.addf %621, %622 : vector<8x128xf32>
    %624 = arith.truncf %623 : vector<8x128xf32> to vector<8x128xbf16>
    %c0_209 = arith.constant 0 : index
    %c0_210 = arith.constant 0 : index
    %c0_211 = arith.constant 0 : index
    %625 = vector.load %arg13[%c0_209, %c0_210, %c0_211] : memref<2x128x128xbf16, #tpu.memory_space<vmem>>, vector<1x128x128xbf16>
    %626 = vector.shape_cast %625 : vector<1x128x128xbf16> to vector<128x128xbf16>
    %cst_212 = arith.constant dense<0.000000e+00> : vector<8x128xf32>
    %627 = tpu.matmul %624, %626, %cst_212 {dimension_numbers = #tpu.dot_dimension_numbers<[1], [0], [0], [1], [0, 0, 1, 1], [], []>} : vector<8x128xbf16>, vector<128x128xbf16>, vector<8x128xf32> -> vector<8x128xf32>
    %628 = vector.broadcast %447 : vector<1x128xf32> to vector<8x128xf32>
    %629 = arith.addf %627, %628 : vector<8x128xf32>
    %630 = arith.truncf %441 : vector<8x128xf32> to vector<8x128xbf16>
    %c0_213 = arith.constant 0 : index
    %c0_214 = arith.constant 0 : index
    %c0_215 = arith.constant 0 : index
    %631 = vector.load %arg14[%c0_213, %c0_214, %c0_215] : memref<2x128x256xbf16, #tpu.memory_space<vmem>>, vector<1x128x256xbf16>
    %632 = vector.shape_cast %631 : vector<1x128x256xbf16> to vector<128x256xbf16>
    %cst_216 = arith.constant dense<0.000000e+00> : vector<8x256xf32>
    %633 = tpu.matmul %630, %632, %cst_216 {dimension_numbers = #tpu.dot_dimension_numbers<[1], [0], [0], [1], [0, 0, 1, 1], [], []>} : vector<8x128xbf16>, vector<128x256xbf16>, vector<8x256xf32> -> vector<8x256xf32>
    %c0_217 = arith.constant 0 : index
    %c0_218 = arith.constant 0 : index
    %c0_219 = arith.constant 0 : index
    %634 = vector.load %arg19[%c0_217, %c0_218, %c0_219] : memref<2x1x256xf32, #tpu.memory_space<vmem>>, vector<1x1x256xf32>
    %635 = vector.shape_cast %634 : vector<1x1x256xf32> to vector<1x256xf32>
    %636 = vector.broadcast %635 : vector<1x256xf32> to vector<8x256xf32>
    %637 = arith.addf %633, %636 : vector<8x256xf32>
    %638 = vector.extract_strided_slice %637 {offsets = [0, 0], sizes = [8, 128], strides = [1, 1]} : vector<8x256xf32> to vector<8x128xf32>
    %639 = vector.extract_strided_slice %637 {offsets = [0, 128], sizes = [8, 128], strides = [1, 1]} : vector<8x256xf32> to vector<8x128xf32>
    %c0_220 = arith.constant 0 : index
    %c0_221 = arith.constant 0 : index
    %c0_222 = arith.constant 0 : index
    %640 = vector.load %arg15[%c0_220, %c0_221, %c0_222] : memref<2x128x128xbf16, #tpu.memory_space<vmem>>, vector<1x128x128xbf16>
    %641 = vector.shape_cast %640 : vector<1x128x128xbf16> to vector<128x128xbf16>
    %642 = arith.truncf %629 : vector<8x128xf32> to vector<8x128xbf16>
    %c0_i32_223 = arith.constant 0 : i32
    %643 = vector.broadcast %c0_i32_223 : i32 to vector<1x128xi32>
    %644 = arith.cmpi sge, %0, %643 : vector<1x128xi32>
    %c8_i32_224 = arith.constant 8 : i32
    %645 = vector.broadcast %c8_i32_224 : i32 to vector<1x128xi32>
    %646 = arith.cmpi slt, %0, %645 : vector<1x128xi32>
    %647 = arith.andi %644, %646 : vector<1x128xi1>
    %cst_225 = arith.constant 0.000000e+00 : f32
    %648 = vector.shape_cast %647 : vector<1x128xi1> to vector<1x128xi1>
    %649 = vector.broadcast %648 : vector<1x128xi1> to vector<8x128xi1>
    %650 = vector.broadcast %cst_225 : f32 to vector<8x128xf32>
    %651 = arith.select %649, %638, %650 : vector<8x128xi1>, vector<8x128xf32>
    %652 = arith.truncf %651 : vector<8x128xf32> to vector<8x128xbf16>
    %cst_226 = arith.constant 0.000000e+00 : f32
    %653 = vector.shape_cast %647 : vector<1x128xi1> to vector<1x128xi1>
    %654 = vector.broadcast %653 : vector<1x128xi1> to vector<8x128xi1>
    %655 = vector.broadcast %cst_226 : f32 to vector<8x128xf32>
    %656 = arith.select %654, %639, %655 : vector<8x128xi1>, vector<8x128xf32>
    %657 = arith.truncf %656 : vector<8x128xf32> to vector<8x128xbf16>
    %cst_227 = arith.constant dense<0.000000e+00> : vector<8x8xf32>
    %658 = tpu.matmul %642, %652, %cst_227 {dimension_numbers = #tpu.dot_dimension_numbers<[1], [1], [0], [0], [0, 0, 1, 0], [], []>} : vector<8x128xbf16>, vector<8x128xbf16>, vector<8x8xf32> -> vector<8x8xf32>
    %cst_228 = arith.constant 0.353553385 : f32
    %659 = vector.broadcast %cst_228 : f32 to vector<8x8xf32>
    %660 = arith.mulf %658, %659 : vector<8x8xf32>
    %661 = arith.addf %660, %1 : vector<8x8xf32>
    %cst_229 = arith.constant dense<0xFF800000> : vector<8xf32>
    %662 = vector.multi_reduction <maximumf>, %661, %cst_229 [1] : vector<8x8xf32> to vector<8xf32>
    %663 = vector.shape_cast %662 : vector<8xf32> to vector<8x1xf32>
    %664 = vector.broadcast %663 : vector<8x1xf32> to vector<8x8xf32>
    %665 = arith.subf %661, %664 : vector<8x8xf32>
    %666 = math.exp %665 : vector<8x8xf32>
    %cst_230 = arith.constant dense<0.000000e+00> : vector<8xf32>
    %667 = vector.multi_reduction <add>, %666, %cst_230 [1] : vector<8x8xf32> to vector<8xf32>
    %668 = vector.shape_cast %667 : vector<8xf32> to vector<8x1xf32>
    %669 = tpu.reciprocal %668 {approx = true} : vector<8x1xf32> -> vector<8x1xf32>
    %670 = vector.broadcast %669 : vector<8x1xf32> to vector<8x8xf32>
    %671 = arith.mulf %666, %670 : vector<8x8xf32>
    %672 = arith.truncf %671 : vector<8x8xf32> to vector<8x8xbf16>
    %cst_231 = arith.constant dense<0.000000e+00> : vector<8x128xf32>
    %673 = tpu.matmul %672, %657, %cst_231 {dimension_numbers = #tpu.dot_dimension_numbers<[1], [0], [0], [1], [0, 0, 1, 1], [], []>} : vector<8x8xbf16>, vector<8x128xbf16>, vector<8x128xf32> -> vector<8x128xf32>
    %c8_i32_232 = arith.constant 8 : i32
    %674 = vector.broadcast %c8_i32_232 : i32 to vector<1x128xi32>
    %675 = arith.cmpi sge, %0, %674 : vector<1x128xi32>
    %c16_i32_233 = arith.constant 16 : i32
    %676 = vector.broadcast %c16_i32_233 : i32 to vector<1x128xi32>
    %677 = arith.cmpi slt, %0, %676 : vector<1x128xi32>
    %678 = arith.andi %675, %677 : vector<1x128xi1>
    %cst_234 = arith.constant 0.000000e+00 : f32
    %679 = vector.shape_cast %678 : vector<1x128xi1> to vector<1x128xi1>
    %680 = vector.broadcast %679 : vector<1x128xi1> to vector<8x128xi1>
    %681 = vector.broadcast %cst_234 : f32 to vector<8x128xf32>
    %682 = arith.select %680, %638, %681 : vector<8x128xi1>, vector<8x128xf32>
    %683 = arith.truncf %682 : vector<8x128xf32> to vector<8x128xbf16>
    %cst_235 = arith.constant 0.000000e+00 : f32
    %684 = vector.shape_cast %678 : vector<1x128xi1> to vector<1x128xi1>
    %685 = vector.broadcast %684 : vector<1x128xi1> to vector<8x128xi1>
    %686 = vector.broadcast %cst_235 : f32 to vector<8x128xf32>
    %687 = arith.select %685, %639, %686 : vector<8x128xi1>, vector<8x128xf32>
    %688 = arith.truncf %687 : vector<8x128xf32> to vector<8x128xbf16>
    %cst_236 = arith.constant dense<0.000000e+00> : vector<8x8xf32>
    %689 = tpu.matmul %642, %683, %cst_236 {dimension_numbers = #tpu.dot_dimension_numbers<[1], [1], [0], [0], [0, 0, 1, 0], [], []>} : vector<8x128xbf16>, vector<8x128xbf16>, vector<8x8xf32> -> vector<8x8xf32>
    %cst_237 = arith.constant 0.353553385 : f32
    %690 = vector.broadcast %cst_237 : f32 to vector<8x8xf32>
    %691 = arith.mulf %689, %690 : vector<8x8xf32>
    %692 = arith.addf %691, %1 : vector<8x8xf32>
    %cst_238 = arith.constant dense<0xFF800000> : vector<8xf32>
    %693 = vector.multi_reduction <maximumf>, %692, %cst_238 [1] : vector<8x8xf32> to vector<8xf32>
    %694 = vector.shape_cast %693 : vector<8xf32> to vector<8x1xf32>
    %695 = vector.broadcast %694 : vector<8x1xf32> to vector<8x8xf32>
    %696 = arith.subf %692, %695 : vector<8x8xf32>
    %697 = math.exp %696 : vector<8x8xf32>
    %cst_239 = arith.constant dense<0.000000e+00> : vector<8xf32>
    %698 = vector.multi_reduction <add>, %697, %cst_239 [1] : vector<8x8xf32> to vector<8xf32>
    %699 = vector.shape_cast %698 : vector<8xf32> to vector<8x1xf32>
    %700 = tpu.reciprocal %699 {approx = true} : vector<8x1xf32> -> vector<8x1xf32>
    %701 = vector.broadcast %700 : vector<8x1xf32> to vector<8x8xf32>
    %702 = arith.mulf %697, %701 : vector<8x8xf32>
    %703 = arith.truncf %702 : vector<8x8xf32> to vector<8x8xbf16>
    %cst_240 = arith.constant dense<0.000000e+00> : vector<8x128xf32>
    %704 = tpu.matmul %703, %688, %cst_240 {dimension_numbers = #tpu.dot_dimension_numbers<[1], [0], [0], [1], [0, 0, 1, 1], [], []>} : vector<8x8xbf16>, vector<8x128xbf16>, vector<8x128xf32> -> vector<8x128xf32>
    %705 = arith.addf %673, %704 : vector<8x128xf32>
    %c16_i32_241 = arith.constant 16 : i32
    %706 = vector.broadcast %c16_i32_241 : i32 to vector<1x128xi32>
    %707 = arith.cmpi sge, %0, %706 : vector<1x128xi32>
    %c24_i32_242 = arith.constant 24 : i32
    %708 = vector.broadcast %c24_i32_242 : i32 to vector<1x128xi32>
    %709 = arith.cmpi slt, %0, %708 : vector<1x128xi32>
    %710 = arith.andi %707, %709 : vector<1x128xi1>
    %cst_243 = arith.constant 0.000000e+00 : f32
    %711 = vector.shape_cast %710 : vector<1x128xi1> to vector<1x128xi1>
    %712 = vector.broadcast %711 : vector<1x128xi1> to vector<8x128xi1>
    %713 = vector.broadcast %cst_243 : f32 to vector<8x128xf32>
    %714 = arith.select %712, %638, %713 : vector<8x128xi1>, vector<8x128xf32>
    %715 = arith.truncf %714 : vector<8x128xf32> to vector<8x128xbf16>
    %cst_244 = arith.constant 0.000000e+00 : f32
    %716 = vector.shape_cast %710 : vector<1x128xi1> to vector<1x128xi1>
    %717 = vector.broadcast %716 : vector<1x128xi1> to vector<8x128xi1>
    %718 = vector.broadcast %cst_244 : f32 to vector<8x128xf32>
    %719 = arith.select %717, %639, %718 : vector<8x128xi1>, vector<8x128xf32>
    %720 = arith.truncf %719 : vector<8x128xf32> to vector<8x128xbf16>
    %cst_245 = arith.constant dense<0.000000e+00> : vector<8x8xf32>
    %721 = tpu.matmul %642, %715, %cst_245 {dimension_numbers = #tpu.dot_dimension_numbers<[1], [1], [0], [0], [0, 0, 1, 0], [], []>} : vector<8x128xbf16>, vector<8x128xbf16>, vector<8x8xf32> -> vector<8x8xf32>
    %cst_246 = arith.constant 0.353553385 : f32
    %722 = vector.broadcast %cst_246 : f32 to vector<8x8xf32>
    %723 = arith.mulf %721, %722 : vector<8x8xf32>
    %724 = arith.addf %723, %1 : vector<8x8xf32>
    %cst_247 = arith.constant dense<0xFF800000> : vector<8xf32>
    %725 = vector.multi_reduction <maximumf>, %724, %cst_247 [1] : vector<8x8xf32> to vector<8xf32>
    %726 = vector.shape_cast %725 : vector<8xf32> to vector<8x1xf32>
    %727 = vector.broadcast %726 : vector<8x1xf32> to vector<8x8xf32>
    %728 = arith.subf %724, %727 : vector<8x8xf32>
    %729 = math.exp %728 : vector<8x8xf32>
    %cst_248 = arith.constant dense<0.000000e+00> : vector<8xf32>
    %730 = vector.multi_reduction <add>, %729, %cst_248 [1] : vector<8x8xf32> to vector<8xf32>
    %731 = vector.shape_cast %730 : vector<8xf32> to vector<8x1xf32>
    %732 = tpu.reciprocal %731 {approx = true} : vector<8x1xf32> -> vector<8x1xf32>
    %733 = vector.broadcast %732 : vector<8x1xf32> to vector<8x8xf32>
    %734 = arith.mulf %729, %733 : vector<8x8xf32>
    %735 = arith.truncf %734 : vector<8x8xf32> to vector<8x8xbf16>
    %cst_249 = arith.constant dense<0.000000e+00> : vector<8x128xf32>
    %736 = tpu.matmul %735, %720, %cst_249 {dimension_numbers = #tpu.dot_dimension_numbers<[1], [0], [0], [1], [0, 0, 1, 1], [], []>} : vector<8x8xbf16>, vector<8x128xbf16>, vector<8x128xf32> -> vector<8x128xf32>
    %737 = arith.addf %705, %736 : vector<8x128xf32>
    %c24_i32_250 = arith.constant 24 : i32
    %738 = vector.broadcast %c24_i32_250 : i32 to vector<1x128xi32>
    %739 = arith.cmpi sge, %0, %738 : vector<1x128xi32>
    %c32_i32_251 = arith.constant 32 : i32
    %740 = vector.broadcast %c32_i32_251 : i32 to vector<1x128xi32>
    %741 = arith.cmpi slt, %0, %740 : vector<1x128xi32>
    %742 = arith.andi %739, %741 : vector<1x128xi1>
    %cst_252 = arith.constant 0.000000e+00 : f32
    %743 = vector.shape_cast %742 : vector<1x128xi1> to vector<1x128xi1>
    %744 = vector.broadcast %743 : vector<1x128xi1> to vector<8x128xi1>
    %745 = vector.broadcast %cst_252 : f32 to vector<8x128xf32>
    %746 = arith.select %744, %638, %745 : vector<8x128xi1>, vector<8x128xf32>
    %747 = arith.truncf %746 : vector<8x128xf32> to vector<8x128xbf16>
    %cst_253 = arith.constant 0.000000e+00 : f32
    %748 = vector.shape_cast %742 : vector<1x128xi1> to vector<1x128xi1>
    %749 = vector.broadcast %748 : vector<1x128xi1> to vector<8x128xi1>
    %750 = vector.broadcast %cst_253 : f32 to vector<8x128xf32>
    %751 = arith.select %749, %639, %750 : vector<8x128xi1>, vector<8x128xf32>
    %752 = arith.truncf %751 : vector<8x128xf32> to vector<8x128xbf16>
    %cst_254 = arith.constant dense<0.000000e+00> : vector<8x8xf32>
    %753 = tpu.matmul %642, %747, %cst_254 {dimension_numbers = #tpu.dot_dimension_numbers<[1], [1], [0], [0], [0, 0, 1, 0], [], []>} : vector<8x128xbf16>, vector<8x128xbf16>, vector<8x8xf32> -> vector<8x8xf32>
    %cst_255 = arith.constant 0.353553385 : f32
    %754 = vector.broadcast %cst_255 : f32 to vector<8x8xf32>
    %755 = arith.mulf %753, %754 : vector<8x8xf32>
    %756 = arith.addf %755, %1 : vector<8x8xf32>
    %cst_256 = arith.constant dense<0xFF800000> : vector<8xf32>
    %757 = vector.multi_reduction <maximumf>, %756, %cst_256 [1] : vector<8x8xf32> to vector<8xf32>
    %758 = vector.shape_cast %757 : vector<8xf32> to vector<8x1xf32>
    %759 = vector.broadcast %758 : vector<8x1xf32> to vector<8x8xf32>
    %760 = arith.subf %756, %759 : vector<8x8xf32>
    %761 = math.exp %760 : vector<8x8xf32>
    %cst_257 = arith.constant dense<0.000000e+00> : vector<8xf32>
    %762 = vector.multi_reduction <add>, %761, %cst_257 [1] : vector<8x8xf32> to vector<8xf32>
    %763 = vector.shape_cast %762 : vector<8xf32> to vector<8x1xf32>
    %764 = tpu.reciprocal %763 {approx = true} : vector<8x1xf32> -> vector<8x1xf32>
    %765 = vector.broadcast %764 : vector<8x1xf32> to vector<8x8xf32>
    %766 = arith.mulf %761, %765 : vector<8x8xf32>
    %767 = arith.truncf %766 : vector<8x8xf32> to vector<8x8xbf16>
    %cst_258 = arith.constant dense<0.000000e+00> : vector<8x128xf32>
    %768 = tpu.matmul %767, %752, %cst_258 {dimension_numbers = #tpu.dot_dimension_numbers<[1], [0], [0], [1], [0, 0, 1, 1], [], []>} : vector<8x8xbf16>, vector<8x128xbf16>, vector<8x128xf32> -> vector<8x128xf32>
    %769 = arith.addf %737, %768 : vector<8x128xf32>
    %770 = arith.truncf %769 : vector<8x128xf32> to vector<8x128xbf16>
    %cst_259 = arith.constant dense<0.000000e+00> : vector<8x128xf32>
    %771 = tpu.matmul %770, %641, %cst_259 {dimension_numbers = #tpu.dot_dimension_numbers<[1], [0], [0], [1], [0, 0, 1, 1], [], []>} : vector<8x128xbf16>, vector<128x128xbf16>, vector<8x128xf32> -> vector<8x128xf32>
    %772 = vector.broadcast %448 : vector<1x128xf32> to vector<8x128xf32>
    %773 = arith.addf %771, %772 : vector<8x128xf32>
    %774 = arith.addf %773, %623 : vector<8x128xf32>
    %cst_260 = arith.constant dense<0.000000e+00> : vector<8xf32>
    %775 = vector.multi_reduction <add>, %774, %cst_260 [1] : vector<8x128xf32> to vector<8xf32>
    %776 = vector.shape_cast %775 : vector<8xf32> to vector<8x1xf32>
    %cst_261 = arith.constant 3.125000e-02 : f32
    %777 = vector.broadcast %cst_261 : f32 to vector<8x1xf32>
    %778 = arith.mulf %776, %777 : vector<8x1xf32>
    %779 = vector.broadcast %778 : vector<8x1xf32> to vector<8x128xf32>
    %780 = arith.subf %774, %779 : vector<8x128xf32>
    %c32_i32_262 = arith.constant 32 : i32
    %781 = vector.broadcast %c32_i32_262 : i32 to vector<1x128xi32>
    %782 = arith.cmpi slt, %0, %781 : vector<1x128xi32>
    %cst_263 = arith.constant 0.000000e+00 : f32
    %783 = vector.shape_cast %782 : vector<1x128xi1> to vector<1x128xi1>
    %784 = vector.broadcast %783 : vector<1x128xi1> to vector<8x128xi1>
    %785 = vector.broadcast %cst_263 : f32 to vector<8x128xf32>
    %786 = arith.select %784, %780, %785 : vector<8x128xi1>, vector<8x128xf32>
    %787 = arith.mulf %786, %786 : vector<8x128xf32>
    %cst_264 = arith.constant dense<0.000000e+00> : vector<8xf32>
    %788 = vector.multi_reduction <add>, %787, %cst_264 [1] : vector<8x128xf32> to vector<8xf32>
    %789 = vector.shape_cast %788 : vector<8xf32> to vector<8x1xf32>
    %cst_265 = arith.constant 3.125000e-02 : f32
    %790 = vector.broadcast %cst_265 : f32 to vector<8x1xf32>
    %791 = arith.mulf %789, %790 : vector<8x1xf32>
    %cst_266 = arith.constant 9.99999974E-6 : f32
    %792 = vector.broadcast %cst_266 : f32 to vector<8x1xf32>
    %793 = arith.addf %791, %792 : vector<8x1xf32>
    %794 = math.rsqrt %793 : vector<8x1xf32>
    %795 = vector.broadcast %794 : vector<8x1xf32> to vector<8x128xf32>
    %796 = arith.mulf %780, %795 : vector<8x128xf32>
    %797 = vector.broadcast %452 : vector<1x128xf32> to vector<8x128xf32>
    %798 = arith.mulf %796, %797 : vector<8x128xf32>
    %799 = vector.broadcast %453 : vector<1x128xf32> to vector<8x128xf32>
    %800 = arith.addf %798, %799 : vector<8x128xf32>
    %c0_267 = arith.constant 0 : index
    %c0_268 = arith.constant 0 : index
    %c0_269 = arith.constant 0 : index
    %801 = vector.load %arg16[%c0_267, %c0_268, %c0_269] : memref<2x128x128xbf16, #tpu.memory_space<vmem>>, vector<1x128x128xbf16>
    %802 = vector.shape_cast %801 : vector<1x128x128xbf16> to vector<128x128xbf16>
    %c0_270 = arith.constant 0 : index
    %c0_271 = arith.constant 0 : index
    %c0_272 = arith.constant 0 : index
    %803 = vector.load %arg20[%c0_270, %c0_271, %c0_272] : memref<2x1x128xf32, #tpu.memory_space<vmem>>, vector<1x1x128xf32>
    %804 = vector.shape_cast %803 : vector<1x1x128xf32> to vector<1x128xf32>
    %c0_273 = arith.constant 0 : index
    %c0_274 = arith.constant 0 : index
    %c0_275 = arith.constant 0 : index
    %805 = vector.load %arg17[%c0_273, %c0_274, %c0_275] : memref<2x128x128xbf16, #tpu.memory_space<vmem>>, vector<1x128x128xbf16>
    %806 = vector.shape_cast %805 : vector<1x128x128xbf16> to vector<128x128xbf16>
    %807 = arith.truncf %800 : vector<8x128xf32> to vector<8x128xbf16>
    %cst_276 = arith.constant dense<0.000000e+00> : vector<8x128xf32>
    %808 = tpu.matmul %807, %802, %cst_276 {dimension_numbers = #tpu.dot_dimension_numbers<[1], [0], [0], [1], [0, 0, 1, 1], [], []>} : vector<8x128xbf16>, vector<128x128xbf16>, vector<8x128xf32> -> vector<8x128xf32>
    %809 = vector.broadcast %804 : vector<1x128xf32> to vector<8x128xf32>
    %810 = arith.addf %808, %809 : vector<8x128xf32>
    %cst_277 = arith.constant 0.000000e+00 : f32
    %811 = vector.broadcast %cst_277 : f32 to vector<8x128xf32>
    %812 = arith.maximumf %810, %811 : vector<8x128xf32>
    %813 = arith.truncf %812 : vector<8x128xf32> to vector<8x128xbf16>
    %cst_278 = arith.constant dense<0.000000e+00> : vector<8x128xf32>
    %814 = tpu.matmul %813, %806, %cst_278 {dimension_numbers = #tpu.dot_dimension_numbers<[1], [0], [0], [1], [0, 0, 1, 1], [], []>} : vector<8x128xbf16>, vector<128x128xbf16>, vector<8x128xf32> -> vector<8x128xf32>
    %815 = vector.broadcast %449 : vector<1x128xf32> to vector<8x128xf32>
    %816 = arith.addf %814, %815 : vector<8x128xf32>
    %817 = arith.addf %816, %800 : vector<8x128xf32>
    %cst_279 = arith.constant dense<0.000000e+00> : vector<8xf32>
    %818 = vector.multi_reduction <add>, %817, %cst_279 [1] : vector<8x128xf32> to vector<8xf32>
    %819 = vector.shape_cast %818 : vector<8xf32> to vector<8x1xf32>
    %cst_280 = arith.constant 3.125000e-02 : f32
    %820 = vector.broadcast %cst_280 : f32 to vector<8x1xf32>
    %821 = arith.mulf %819, %820 : vector<8x1xf32>
    %822 = vector.broadcast %821 : vector<8x1xf32> to vector<8x128xf32>
    %823 = arith.subf %817, %822 : vector<8x128xf32>
    %c32_i32_281 = arith.constant 32 : i32
    %824 = vector.broadcast %c32_i32_281 : i32 to vector<1x128xi32>
    %825 = arith.cmpi slt, %0, %824 : vector<1x128xi32>
    %cst_282 = arith.constant 0.000000e+00 : f32
    %826 = vector.shape_cast %825 : vector<1x128xi1> to vector<1x128xi1>
    %827 = vector.broadcast %826 : vector<1x128xi1> to vector<8x128xi1>
    %828 = vector.broadcast %cst_282 : f32 to vector<8x128xf32>
    %829 = arith.select %827, %823, %828 : vector<8x128xi1>, vector<8x128xf32>
    %830 = arith.mulf %829, %829 : vector<8x128xf32>
    %cst_283 = arith.constant dense<0.000000e+00> : vector<8xf32>
    %831 = vector.multi_reduction <add>, %830, %cst_283 [1] : vector<8x128xf32> to vector<8xf32>
    %832 = vector.shape_cast %831 : vector<8xf32> to vector<8x1xf32>
    %cst_284 = arith.constant 3.125000e-02 : f32
    %833 = vector.broadcast %cst_284 : f32 to vector<8x1xf32>
    %834 = arith.mulf %832, %833 : vector<8x1xf32>
    %cst_285 = arith.constant 9.99999974E-6 : f32
    %835 = vector.broadcast %cst_285 : f32 to vector<8x1xf32>
    %836 = arith.addf %834, %835 : vector<8x1xf32>
    %837 = math.rsqrt %836 : vector<8x1xf32>
    %838 = vector.broadcast %837 : vector<8x1xf32> to vector<8x128xf32>
    %839 = arith.mulf %823, %838 : vector<8x128xf32>
    %840 = vector.broadcast %454 : vector<1x128xf32> to vector<8x128xf32>
    %841 = arith.mulf %839, %840 : vector<8x128xf32>
    %842 = vector.broadcast %455 : vector<1x128xf32> to vector<8x128xf32>
    %843 = arith.addf %841, %842 : vector<8x128xf32>
    %c1_286 = arith.constant 1 : index
    %c0_287 = arith.constant 0 : index
    %c0_288 = arith.constant 0 : index
    %844 = vector.load %arg21[%c1_286, %c0_287, %c0_288] : memref<2x10x128xf32, #tpu.memory_space<vmem>>, vector<1x10x128xf32>
    %845 = vector.shape_cast %844 : vector<1x10x128xf32> to vector<10x128xf32>
    %846 = vector.extract_strided_slice %845 {offsets = [0, 0], sizes = [1, 128], strides = [1, 1]} : vector<10x128xf32> to vector<1x128xf32>
    %847 = vector.extract_strided_slice %845 {offsets = [1, 0], sizes = [1, 128], strides = [1, 1]} : vector<10x128xf32> to vector<1x128xf32>
    %848 = vector.extract_strided_slice %845 {offsets = [2, 0], sizes = [1, 128], strides = [1, 1]} : vector<10x128xf32> to vector<1x128xf32>
    %849 = vector.extract_strided_slice %845 {offsets = [3, 0], sizes = [1, 128], strides = [1, 1]} : vector<10x128xf32> to vector<1x128xf32>
    %850 = vector.extract_strided_slice %845 {offsets = [4, 0], sizes = [1, 128], strides = [1, 1]} : vector<10x128xf32> to vector<1x128xf32>
    %851 = vector.extract_strided_slice %845 {offsets = [5, 0], sizes = [1, 128], strides = [1, 1]} : vector<10x128xf32> to vector<1x128xf32>
    %852 = vector.extract_strided_slice %845 {offsets = [6, 0], sizes = [1, 128], strides = [1, 1]} : vector<10x128xf32> to vector<1x128xf32>
    %853 = vector.extract_strided_slice %845 {offsets = [7, 0], sizes = [1, 128], strides = [1, 1]} : vector<10x128xf32> to vector<1x128xf32>
    %854 = vector.extract_strided_slice %845 {offsets = [8, 0], sizes = [1, 128], strides = [1, 1]} : vector<10x128xf32> to vector<1x128xf32>
    %855 = vector.extract_strided_slice %845 {offsets = [9, 0], sizes = [1, 128], strides = [1, 1]} : vector<10x128xf32> to vector<1x128xf32>
    %c1_289 = arith.constant 1 : index
    %c0_290 = arith.constant 0 : index
    %c0_291 = arith.constant 0 : index
    %856 = vector.load %arg11[%c1_289, %c0_290, %c0_291] : memref<2x128x384xbf16, #tpu.memory_space<vmem>>, vector<1x128x384xbf16>
    %857 = vector.shape_cast %856 : vector<1x128x384xbf16> to vector<128x384xbf16>
    %c1_292 = arith.constant 1 : index
    %c0_293 = arith.constant 0 : index
    %c0_294 = arith.constant 0 : index
    %858 = vector.load %arg18[%c1_292, %c0_293, %c0_294] : memref<2x1x384xf32, #tpu.memory_space<vmem>>, vector<1x1x384xf32>
    %859 = vector.shape_cast %858 : vector<1x1x384xf32> to vector<1x384xf32>
    %860 = arith.truncf %843 : vector<8x128xf32> to vector<8x128xbf16>
    %cst_295 = arith.constant dense<0.000000e+00> : vector<8x384xf32>
    %861 = tpu.matmul %860, %857, %cst_295 {dimension_numbers = #tpu.dot_dimension_numbers<[1], [0], [0], [1], [0, 0, 1, 1], [], []>} : vector<8x128xbf16>, vector<128x384xbf16>, vector<8x384xf32> -> vector<8x384xf32>
    %862 = vector.broadcast %859 : vector<1x384xf32> to vector<8x384xf32>
    %863 = arith.addf %861, %862 : vector<8x384xf32>
    %864 = vector.extract_strided_slice %863 {offsets = [0, 0], sizes = [8, 128], strides = [1, 1]} : vector<8x384xf32> to vector<8x128xf32>
    %865 = vector.extract_strided_slice %863 {offsets = [0, 128], sizes = [8, 128], strides = [1, 1]} : vector<8x384xf32> to vector<8x128xf32>
    %866 = vector.extract_strided_slice %863 {offsets = [0, 256], sizes = [8, 128], strides = [1, 1]} : vector<8x384xf32> to vector<8x128xf32>
    %c1_296 = arith.constant 1 : index
    %c0_297 = arith.constant 0 : index
    %c0_298 = arith.constant 0 : index
    %867 = vector.load %arg12[%c1_296, %c0_297, %c0_298] : memref<2x128x128xbf16, #tpu.memory_space<vmem>>, vector<1x128x128xbf16>
    %868 = vector.shape_cast %867 : vector<1x128x128xbf16> to vector<128x128xbf16>
    %869 = arith.truncf %864 : vector<8x128xf32> to vector<8x128xbf16>
    %c0_i32_299 = arith.constant 0 : i32
    %870 = vector.broadcast %c0_i32_299 : i32 to vector<1x128xi32>
    %871 = arith.cmpi sge, %0, %870 : vector<1x128xi32>
    %c8_i32_300 = arith.constant 8 : i32
    %872 = vector.broadcast %c8_i32_300 : i32 to vector<1x128xi32>
    %873 = arith.cmpi slt, %0, %872 : vector<1x128xi32>
    %874 = arith.andi %871, %873 : vector<1x128xi1>
    %cst_301 = arith.constant 0.000000e+00 : f32
    %875 = vector.shape_cast %874 : vector<1x128xi1> to vector<1x128xi1>
    %876 = vector.broadcast %875 : vector<1x128xi1> to vector<8x128xi1>
    %877 = vector.broadcast %cst_301 : f32 to vector<8x128xf32>
    %878 = arith.select %876, %865, %877 : vector<8x128xi1>, vector<8x128xf32>
    %879 = arith.truncf %878 : vector<8x128xf32> to vector<8x128xbf16>
    %cst_302 = arith.constant 0.000000e+00 : f32
    %880 = vector.shape_cast %874 : vector<1x128xi1> to vector<1x128xi1>
    %881 = vector.broadcast %880 : vector<1x128xi1> to vector<8x128xi1>
    %882 = vector.broadcast %cst_302 : f32 to vector<8x128xf32>
    %883 = arith.select %881, %866, %882 : vector<8x128xi1>, vector<8x128xf32>
    %884 = arith.truncf %883 : vector<8x128xf32> to vector<8x128xbf16>
    %cst_303 = arith.constant dense<0.000000e+00> : vector<8x8xf32>
    %885 = tpu.matmul %869, %879, %cst_303 {dimension_numbers = #tpu.dot_dimension_numbers<[1], [1], [0], [0], [0, 0, 1, 0], [], []>} : vector<8x128xbf16>, vector<8x128xbf16>, vector<8x8xf32> -> vector<8x8xf32>
    %cst_304 = arith.constant 0.353553385 : f32
    %886 = vector.broadcast %cst_304 : f32 to vector<8x8xf32>
    %887 = arith.mulf %885, %886 : vector<8x8xf32>
    %cst_305 = arith.constant dense<0xFF800000> : vector<8xf32>
    %888 = vector.multi_reduction <maximumf>, %887, %cst_305 [1] : vector<8x8xf32> to vector<8xf32>
    %889 = vector.shape_cast %888 : vector<8xf32> to vector<8x1xf32>
    %890 = vector.broadcast %889 : vector<8x1xf32> to vector<8x8xf32>
    %891 = arith.subf %887, %890 : vector<8x8xf32>
    %892 = math.exp %891 : vector<8x8xf32>
    %cst_306 = arith.constant dense<0.000000e+00> : vector<8xf32>
    %893 = vector.multi_reduction <add>, %892, %cst_306 [1] : vector<8x8xf32> to vector<8xf32>
    %894 = vector.shape_cast %893 : vector<8xf32> to vector<8x1xf32>
    %895 = tpu.reciprocal %894 {approx = true} : vector<8x1xf32> -> vector<8x1xf32>
    %896 = vector.broadcast %895 : vector<8x1xf32> to vector<8x8xf32>
    %897 = arith.mulf %892, %896 : vector<8x8xf32>
    %898 = arith.truncf %897 : vector<8x8xf32> to vector<8x8xbf16>
    %cst_307 = arith.constant dense<0.000000e+00> : vector<8x128xf32>
    %899 = tpu.matmul %898, %884, %cst_307 {dimension_numbers = #tpu.dot_dimension_numbers<[1], [0], [0], [1], [0, 0, 1, 1], [], []>} : vector<8x8xbf16>, vector<8x128xbf16>, vector<8x128xf32> -> vector<8x128xf32>
    %c8_i32_308 = arith.constant 8 : i32
    %900 = vector.broadcast %c8_i32_308 : i32 to vector<1x128xi32>
    %901 = arith.cmpi sge, %0, %900 : vector<1x128xi32>
    %c16_i32_309 = arith.constant 16 : i32
    %902 = vector.broadcast %c16_i32_309 : i32 to vector<1x128xi32>
    %903 = arith.cmpi slt, %0, %902 : vector<1x128xi32>
    %904 = arith.andi %901, %903 : vector<1x128xi1>
    %cst_310 = arith.constant 0.000000e+00 : f32
    %905 = vector.shape_cast %904 : vector<1x128xi1> to vector<1x128xi1>
    %906 = vector.broadcast %905 : vector<1x128xi1> to vector<8x128xi1>
    %907 = vector.broadcast %cst_310 : f32 to vector<8x128xf32>
    %908 = arith.select %906, %865, %907 : vector<8x128xi1>, vector<8x128xf32>
    %909 = arith.truncf %908 : vector<8x128xf32> to vector<8x128xbf16>
    %cst_311 = arith.constant 0.000000e+00 : f32
    %910 = vector.shape_cast %904 : vector<1x128xi1> to vector<1x128xi1>
    %911 = vector.broadcast %910 : vector<1x128xi1> to vector<8x128xi1>
    %912 = vector.broadcast %cst_311 : f32 to vector<8x128xf32>
    %913 = arith.select %911, %866, %912 : vector<8x128xi1>, vector<8x128xf32>
    %914 = arith.truncf %913 : vector<8x128xf32> to vector<8x128xbf16>
    %cst_312 = arith.constant dense<0.000000e+00> : vector<8x8xf32>
    %915 = tpu.matmul %869, %909, %cst_312 {dimension_numbers = #tpu.dot_dimension_numbers<[1], [1], [0], [0], [0, 0, 1, 0], [], []>} : vector<8x128xbf16>, vector<8x128xbf16>, vector<8x8xf32> -> vector<8x8xf32>
    %cst_313 = arith.constant 0.353553385 : f32
    %916 = vector.broadcast %cst_313 : f32 to vector<8x8xf32>
    %917 = arith.mulf %915, %916 : vector<8x8xf32>
    %cst_314 = arith.constant dense<0xFF800000> : vector<8xf32>
    %918 = vector.multi_reduction <maximumf>, %917, %cst_314 [1] : vector<8x8xf32> to vector<8xf32>
    %919 = vector.shape_cast %918 : vector<8xf32> to vector<8x1xf32>
    %920 = vector.broadcast %919 : vector<8x1xf32> to vector<8x8xf32>
    %921 = arith.subf %917, %920 : vector<8x8xf32>
    %922 = math.exp %921 : vector<8x8xf32>
    %cst_315 = arith.constant dense<0.000000e+00> : vector<8xf32>
    %923 = vector.multi_reduction <add>, %922, %cst_315 [1] : vector<8x8xf32> to vector<8xf32>
    %924 = vector.shape_cast %923 : vector<8xf32> to vector<8x1xf32>
    %925 = tpu.reciprocal %924 {approx = true} : vector<8x1xf32> -> vector<8x1xf32>
    %926 = vector.broadcast %925 : vector<8x1xf32> to vector<8x8xf32>
    %927 = arith.mulf %922, %926 : vector<8x8xf32>
    %928 = arith.truncf %927 : vector<8x8xf32> to vector<8x8xbf16>
    %cst_316 = arith.constant dense<0.000000e+00> : vector<8x128xf32>
    %929 = tpu.matmul %928, %914, %cst_316 {dimension_numbers = #tpu.dot_dimension_numbers<[1], [0], [0], [1], [0, 0, 1, 1], [], []>} : vector<8x8xbf16>, vector<8x128xbf16>, vector<8x128xf32> -> vector<8x128xf32>
    %930 = arith.addf %899, %929 : vector<8x128xf32>
    %c16_i32_317 = arith.constant 16 : i32
    %931 = vector.broadcast %c16_i32_317 : i32 to vector<1x128xi32>
    %932 = arith.cmpi sge, %0, %931 : vector<1x128xi32>
    %c24_i32_318 = arith.constant 24 : i32
    %933 = vector.broadcast %c24_i32_318 : i32 to vector<1x128xi32>
    %934 = arith.cmpi slt, %0, %933 : vector<1x128xi32>
    %935 = arith.andi %932, %934 : vector<1x128xi1>
    %cst_319 = arith.constant 0.000000e+00 : f32
    %936 = vector.shape_cast %935 : vector<1x128xi1> to vector<1x128xi1>
    %937 = vector.broadcast %936 : vector<1x128xi1> to vector<8x128xi1>
    %938 = vector.broadcast %cst_319 : f32 to vector<8x128xf32>
    %939 = arith.select %937, %865, %938 : vector<8x128xi1>, vector<8x128xf32>
    %940 = arith.truncf %939 : vector<8x128xf32> to vector<8x128xbf16>
    %cst_320 = arith.constant 0.000000e+00 : f32
    %941 = vector.shape_cast %935 : vector<1x128xi1> to vector<1x128xi1>
    %942 = vector.broadcast %941 : vector<1x128xi1> to vector<8x128xi1>
    %943 = vector.broadcast %cst_320 : f32 to vector<8x128xf32>
    %944 = arith.select %942, %866, %943 : vector<8x128xi1>, vector<8x128xf32>
    %945 = arith.truncf %944 : vector<8x128xf32> to vector<8x128xbf16>
    %cst_321 = arith.constant dense<0.000000e+00> : vector<8x8xf32>
    %946 = tpu.matmul %869, %940, %cst_321 {dimension_numbers = #tpu.dot_dimension_numbers<[1], [1], [0], [0], [0, 0, 1, 0], [], []>} : vector<8x128xbf16>, vector<8x128xbf16>, vector<8x8xf32> -> vector<8x8xf32>
    %cst_322 = arith.constant 0.353553385 : f32
    %947 = vector.broadcast %cst_322 : f32 to vector<8x8xf32>
    %948 = arith.mulf %946, %947 : vector<8x8xf32>
    %cst_323 = arith.constant dense<0xFF800000> : vector<8xf32>
    %949 = vector.multi_reduction <maximumf>, %948, %cst_323 [1] : vector<8x8xf32> to vector<8xf32>
    %950 = vector.shape_cast %949 : vector<8xf32> to vector<8x1xf32>
    %951 = vector.broadcast %950 : vector<8x1xf32> to vector<8x8xf32>
    %952 = arith.subf %948, %951 : vector<8x8xf32>
    %953 = math.exp %952 : vector<8x8xf32>
    %cst_324 = arith.constant dense<0.000000e+00> : vector<8xf32>
    %954 = vector.multi_reduction <add>, %953, %cst_324 [1] : vector<8x8xf32> to vector<8xf32>
    %955 = vector.shape_cast %954 : vector<8xf32> to vector<8x1xf32>
    %956 = tpu.reciprocal %955 {approx = true} : vector<8x1xf32> -> vector<8x1xf32>
    %957 = vector.broadcast %956 : vector<8x1xf32> to vector<8x8xf32>
    %958 = arith.mulf %953, %957 : vector<8x8xf32>
    %959 = arith.truncf %958 : vector<8x8xf32> to vector<8x8xbf16>
    %cst_325 = arith.constant dense<0.000000e+00> : vector<8x128xf32>
    %960 = tpu.matmul %959, %945, %cst_325 {dimension_numbers = #tpu.dot_dimension_numbers<[1], [0], [0], [1], [0, 0, 1, 1], [], []>} : vector<8x8xbf16>, vector<8x128xbf16>, vector<8x128xf32> -> vector<8x128xf32>
    %961 = arith.addf %930, %960 : vector<8x128xf32>
    %c24_i32_326 = arith.constant 24 : i32
    %962 = vector.broadcast %c24_i32_326 : i32 to vector<1x128xi32>
    %963 = arith.cmpi sge, %0, %962 : vector<1x128xi32>
    %c32_i32_327 = arith.constant 32 : i32
    %964 = vector.broadcast %c32_i32_327 : i32 to vector<1x128xi32>
    %965 = arith.cmpi slt, %0, %964 : vector<1x128xi32>
    %966 = arith.andi %963, %965 : vector<1x128xi1>
    %cst_328 = arith.constant 0.000000e+00 : f32
    %967 = vector.shape_cast %966 : vector<1x128xi1> to vector<1x128xi1>
    %968 = vector.broadcast %967 : vector<1x128xi1> to vector<8x128xi1>
    %969 = vector.broadcast %cst_328 : f32 to vector<8x128xf32>
    %970 = arith.select %968, %865, %969 : vector<8x128xi1>, vector<8x128xf32>
    %971 = arith.truncf %970 : vector<8x128xf32> to vector<8x128xbf16>
    %cst_329 = arith.constant 0.000000e+00 : f32
    %972 = vector.shape_cast %966 : vector<1x128xi1> to vector<1x128xi1>
    %973 = vector.broadcast %972 : vector<1x128xi1> to vector<8x128xi1>
    %974 = vector.broadcast %cst_329 : f32 to vector<8x128xf32>
    %975 = arith.select %973, %866, %974 : vector<8x128xi1>, vector<8x128xf32>
    %976 = arith.truncf %975 : vector<8x128xf32> to vector<8x128xbf16>
    %cst_330 = arith.constant dense<0.000000e+00> : vector<8x8xf32>
    %977 = tpu.matmul %869, %971, %cst_330 {dimension_numbers = #tpu.dot_dimension_numbers<[1], [1], [0], [0], [0, 0, 1, 0], [], []>} : vector<8x128xbf16>, vector<8x128xbf16>, vector<8x8xf32> -> vector<8x8xf32>
    %cst_331 = arith.constant 0.353553385 : f32
    %978 = vector.broadcast %cst_331 : f32 to vector<8x8xf32>
    %979 = arith.mulf %977, %978 : vector<8x8xf32>
    %cst_332 = arith.constant dense<0xFF800000> : vector<8xf32>
    %980 = vector.multi_reduction <maximumf>, %979, %cst_332 [1] : vector<8x8xf32> to vector<8xf32>
    %981 = vector.shape_cast %980 : vector<8xf32> to vector<8x1xf32>
    %982 = vector.broadcast %981 : vector<8x1xf32> to vector<8x8xf32>
    %983 = arith.subf %979, %982 : vector<8x8xf32>
    %984 = math.exp %983 : vector<8x8xf32>
    %cst_333 = arith.constant dense<0.000000e+00> : vector<8xf32>
    %985 = vector.multi_reduction <add>, %984, %cst_333 [1] : vector<8x8xf32> to vector<8xf32>
    %986 = vector.shape_cast %985 : vector<8xf32> to vector<8x1xf32>
    %987 = tpu.reciprocal %986 {approx = true} : vector<8x1xf32> -> vector<8x1xf32>
    %988 = vector.broadcast %987 : vector<8x1xf32> to vector<8x8xf32>
    %989 = arith.mulf %984, %988 : vector<8x8xf32>
    %990 = arith.truncf %989 : vector<8x8xf32> to vector<8x8xbf16>
    %cst_334 = arith.constant dense<0.000000e+00> : vector<8x128xf32>
    %991 = tpu.matmul %990, %976, %cst_334 {dimension_numbers = #tpu.dot_dimension_numbers<[1], [0], [0], [1], [0, 0, 1, 1], [], []>} : vector<8x8xbf16>, vector<8x128xbf16>, vector<8x128xf32> -> vector<8x128xf32>
    %992 = arith.addf %961, %991 : vector<8x128xf32>
    %993 = arith.truncf %992 : vector<8x128xf32> to vector<8x128xbf16>
    %cst_335 = arith.constant dense<0.000000e+00> : vector<8x128xf32>
    %994 = tpu.matmul %993, %868, %cst_335 {dimension_numbers = #tpu.dot_dimension_numbers<[1], [0], [0], [1], [0, 0, 1, 1], [], []>} : vector<8x128xbf16>, vector<128x128xbf16>, vector<8x128xf32> -> vector<8x128xf32>
    %995 = vector.broadcast %846 : vector<1x128xf32> to vector<8x128xf32>
    %996 = arith.addf %994, %995 : vector<8x128xf32>
    %997 = arith.addf %996, %843 : vector<8x128xf32>
    %cst_336 = arith.constant dense<0.000000e+00> : vector<8xf32>
    %998 = vector.multi_reduction <add>, %997, %cst_336 [1] : vector<8x128xf32> to vector<8xf32>
    %999 = vector.shape_cast %998 : vector<8xf32> to vector<8x1xf32>
    %cst_337 = arith.constant 3.125000e-02 : f32
    %1000 = vector.broadcast %cst_337 : f32 to vector<8x1xf32>
    %1001 = arith.mulf %999, %1000 : vector<8x1xf32>
    %1002 = vector.broadcast %1001 : vector<8x1xf32> to vector<8x128xf32>
    %1003 = arith.subf %997, %1002 : vector<8x128xf32>
    %c32_i32_338 = arith.constant 32 : i32
    %1004 = vector.broadcast %c32_i32_338 : i32 to vector<1x128xi32>
    %1005 = arith.cmpi slt, %0, %1004 : vector<1x128xi32>
    %cst_339 = arith.constant 0.000000e+00 : f32
    %1006 = vector.shape_cast %1005 : vector<1x128xi1> to vector<1x128xi1>
    %1007 = vector.broadcast %1006 : vector<1x128xi1> to vector<8x128xi1>
    %1008 = vector.broadcast %cst_339 : f32 to vector<8x128xf32>
    %1009 = arith.select %1007, %1003, %1008 : vector<8x128xi1>, vector<8x128xf32>
    %1010 = arith.mulf %1009, %1009 : vector<8x128xf32>
    %cst_340 = arith.constant dense<0.000000e+00> : vector<8xf32>
    %1011 = vector.multi_reduction <add>, %1010, %cst_340 [1] : vector<8x128xf32> to vector<8xf32>
    %1012 = vector.shape_cast %1011 : vector<8xf32> to vector<8x1xf32>
    %cst_341 = arith.constant 3.125000e-02 : f32
    %1013 = vector.broadcast %cst_341 : f32 to vector<8x1xf32>
    %1014 = arith.mulf %1012, %1013 : vector<8x1xf32>
    %cst_342 = arith.constant 9.99999974E-6 : f32
    %1015 = vector.broadcast %cst_342 : f32 to vector<8x1xf32>
    %1016 = arith.addf %1014, %1015 : vector<8x1xf32>
    %1017 = math.rsqrt %1016 : vector<8x1xf32>
    %1018 = vector.broadcast %1017 : vector<8x1xf32> to vector<8x128xf32>
    %1019 = arith.mulf %1003, %1018 : vector<8x128xf32>
    %1020 = vector.broadcast %850 : vector<1x128xf32> to vector<8x128xf32>
    %1021 = arith.mulf %1019, %1020 : vector<8x128xf32>
    %1022 = vector.broadcast %851 : vector<1x128xf32> to vector<8x128xf32>
    %1023 = arith.addf %1021, %1022 : vector<8x128xf32>
    %1024 = arith.truncf %1023 : vector<8x128xf32> to vector<8x128xbf16>
    %c1_343 = arith.constant 1 : index
    %c0_344 = arith.constant 0 : index
    %c0_345 = arith.constant 0 : index
    %1025 = vector.load %arg13[%c1_343, %c0_344, %c0_345] : memref<2x128x128xbf16, #tpu.memory_space<vmem>>, vector<1x128x128xbf16>
    %1026 = vector.shape_cast %1025 : vector<1x128x128xbf16> to vector<128x128xbf16>
    %cst_346 = arith.constant dense<0.000000e+00> : vector<8x128xf32>
    %1027 = tpu.matmul %1024, %1026, %cst_346 {dimension_numbers = #tpu.dot_dimension_numbers<[1], [0], [0], [1], [0, 0, 1, 1], [], []>} : vector<8x128xbf16>, vector<128x128xbf16>, vector<8x128xf32> -> vector<8x128xf32>
    %1028 = vector.broadcast %847 : vector<1x128xf32> to vector<8x128xf32>
    %1029 = arith.addf %1027, %1028 : vector<8x128xf32>
    %1030 = arith.truncf %441 : vector<8x128xf32> to vector<8x128xbf16>
    %c1_347 = arith.constant 1 : index
    %c0_348 = arith.constant 0 : index
    %c0_349 = arith.constant 0 : index
    %1031 = vector.load %arg14[%c1_347, %c0_348, %c0_349] : memref<2x128x256xbf16, #tpu.memory_space<vmem>>, vector<1x128x256xbf16>
    %1032 = vector.shape_cast %1031 : vector<1x128x256xbf16> to vector<128x256xbf16>
    %cst_350 = arith.constant dense<0.000000e+00> : vector<8x256xf32>
    %1033 = tpu.matmul %1030, %1032, %cst_350 {dimension_numbers = #tpu.dot_dimension_numbers<[1], [0], [0], [1], [0, 0, 1, 1], [], []>} : vector<8x128xbf16>, vector<128x256xbf16>, vector<8x256xf32> -> vector<8x256xf32>
    %c1_351 = arith.constant 1 : index
    %c0_352 = arith.constant 0 : index
    %c0_353 = arith.constant 0 : index
    %1034 = vector.load %arg19[%c1_351, %c0_352, %c0_353] : memref<2x1x256xf32, #tpu.memory_space<vmem>>, vector<1x1x256xf32>
    %1035 = vector.shape_cast %1034 : vector<1x1x256xf32> to vector<1x256xf32>
    %1036 = vector.broadcast %1035 : vector<1x256xf32> to vector<8x256xf32>
    %1037 = arith.addf %1033, %1036 : vector<8x256xf32>
    %1038 = vector.extract_strided_slice %1037 {offsets = [0, 0], sizes = [8, 128], strides = [1, 1]} : vector<8x256xf32> to vector<8x128xf32>
    %1039 = vector.extract_strided_slice %1037 {offsets = [0, 128], sizes = [8, 128], strides = [1, 1]} : vector<8x256xf32> to vector<8x128xf32>
    %c1_354 = arith.constant 1 : index
    %c0_355 = arith.constant 0 : index
    %c0_356 = arith.constant 0 : index
    %1040 = vector.load %arg15[%c1_354, %c0_355, %c0_356] : memref<2x128x128xbf16, #tpu.memory_space<vmem>>, vector<1x128x128xbf16>
    %1041 = vector.shape_cast %1040 : vector<1x128x128xbf16> to vector<128x128xbf16>
    %1042 = arith.truncf %1029 : vector<8x128xf32> to vector<8x128xbf16>
    %c0_i32_357 = arith.constant 0 : i32
    %1043 = vector.broadcast %c0_i32_357 : i32 to vector<1x128xi32>
    %1044 = arith.cmpi sge, %0, %1043 : vector<1x128xi32>
    %c8_i32_358 = arith.constant 8 : i32
    %1045 = vector.broadcast %c8_i32_358 : i32 to vector<1x128xi32>
    %1046 = arith.cmpi slt, %0, %1045 : vector<1x128xi32>
    %1047 = arith.andi %1044, %1046 : vector<1x128xi1>
    %cst_359 = arith.constant 0.000000e+00 : f32
    %1048 = vector.shape_cast %1047 : vector<1x128xi1> to vector<1x128xi1>
    %1049 = vector.broadcast %1048 : vector<1x128xi1> to vector<8x128xi1>
    %1050 = vector.broadcast %cst_359 : f32 to vector<8x128xf32>
    %1051 = arith.select %1049, %1038, %1050 : vector<8x128xi1>, vector<8x128xf32>
    %1052 = arith.truncf %1051 : vector<8x128xf32> to vector<8x128xbf16>
    %cst_360 = arith.constant 0.000000e+00 : f32
    %1053 = vector.shape_cast %1047 : vector<1x128xi1> to vector<1x128xi1>
    %1054 = vector.broadcast %1053 : vector<1x128xi1> to vector<8x128xi1>
    %1055 = vector.broadcast %cst_360 : f32 to vector<8x128xf32>
    %1056 = arith.select %1054, %1039, %1055 : vector<8x128xi1>, vector<8x128xf32>
    %1057 = arith.truncf %1056 : vector<8x128xf32> to vector<8x128xbf16>
    %cst_361 = arith.constant dense<0.000000e+00> : vector<8x8xf32>
    %1058 = tpu.matmul %1042, %1052, %cst_361 {dimension_numbers = #tpu.dot_dimension_numbers<[1], [1], [0], [0], [0, 0, 1, 0], [], []>} : vector<8x128xbf16>, vector<8x128xbf16>, vector<8x8xf32> -> vector<8x8xf32>
    %cst_362 = arith.constant 0.353553385 : f32
    %1059 = vector.broadcast %cst_362 : f32 to vector<8x8xf32>
    %1060 = arith.mulf %1058, %1059 : vector<8x8xf32>
    %1061 = arith.addf %1060, %1 : vector<8x8xf32>
    %cst_363 = arith.constant dense<0xFF800000> : vector<8xf32>
    %1062 = vector.multi_reduction <maximumf>, %1061, %cst_363 [1] : vector<8x8xf32> to vector<8xf32>
    %1063 = vector.shape_cast %1062 : vector<8xf32> to vector<8x1xf32>
    %1064 = vector.broadcast %1063 : vector<8x1xf32> to vector<8x8xf32>
    %1065 = arith.subf %1061, %1064 : vector<8x8xf32>
    %1066 = math.exp %1065 : vector<8x8xf32>
    %cst_364 = arith.constant dense<0.000000e+00> : vector<8xf32>
    %1067 = vector.multi_reduction <add>, %1066, %cst_364 [1] : vector<8x8xf32> to vector<8xf32>
    %1068 = vector.shape_cast %1067 : vector<8xf32> to vector<8x1xf32>
    %1069 = tpu.reciprocal %1068 {approx = true} : vector<8x1xf32> -> vector<8x1xf32>
    %1070 = vector.broadcast %1069 : vector<8x1xf32> to vector<8x8xf32>
    %1071 = arith.mulf %1066, %1070 : vector<8x8xf32>
    %1072 = arith.truncf %1071 : vector<8x8xf32> to vector<8x8xbf16>
    %cst_365 = arith.constant dense<0.000000e+00> : vector<8x128xf32>
    %1073 = tpu.matmul %1072, %1057, %cst_365 {dimension_numbers = #tpu.dot_dimension_numbers<[1], [0], [0], [1], [0, 0, 1, 1], [], []>} : vector<8x8xbf16>, vector<8x128xbf16>, vector<8x128xf32> -> vector<8x128xf32>
    %c8_i32_366 = arith.constant 8 : i32
    %1074 = vector.broadcast %c8_i32_366 : i32 to vector<1x128xi32>
    %1075 = arith.cmpi sge, %0, %1074 : vector<1x128xi32>
    %c16_i32_367 = arith.constant 16 : i32
    %1076 = vector.broadcast %c16_i32_367 : i32 to vector<1x128xi32>
    %1077 = arith.cmpi slt, %0, %1076 : vector<1x128xi32>
    %1078 = arith.andi %1075, %1077 : vector<1x128xi1>
    %cst_368 = arith.constant 0.000000e+00 : f32
    %1079 = vector.shape_cast %1078 : vector<1x128xi1> to vector<1x128xi1>
    %1080 = vector.broadcast %1079 : vector<1x128xi1> to vector<8x128xi1>
    %1081 = vector.broadcast %cst_368 : f32 to vector<8x128xf32>
    %1082 = arith.select %1080, %1038, %1081 : vector<8x128xi1>, vector<8x128xf32>
    %1083 = arith.truncf %1082 : vector<8x128xf32> to vector<8x128xbf16>
    %cst_369 = arith.constant 0.000000e+00 : f32
    %1084 = vector.shape_cast %1078 : vector<1x128xi1> to vector<1x128xi1>
    %1085 = vector.broadcast %1084 : vector<1x128xi1> to vector<8x128xi1>
    %1086 = vector.broadcast %cst_369 : f32 to vector<8x128xf32>
    %1087 = arith.select %1085, %1039, %1086 : vector<8x128xi1>, vector<8x128xf32>
    %1088 = arith.truncf %1087 : vector<8x128xf32> to vector<8x128xbf16>
    %cst_370 = arith.constant dense<0.000000e+00> : vector<8x8xf32>
    %1089 = tpu.matmul %1042, %1083, %cst_370 {dimension_numbers = #tpu.dot_dimension_numbers<[1], [1], [0], [0], [0, 0, 1, 0], [], []>} : vector<8x128xbf16>, vector<8x128xbf16>, vector<8x8xf32> -> vector<8x8xf32>
    %cst_371 = arith.constant 0.353553385 : f32
    %1090 = vector.broadcast %cst_371 : f32 to vector<8x8xf32>
    %1091 = arith.mulf %1089, %1090 : vector<8x8xf32>
    %1092 = arith.addf %1091, %1 : vector<8x8xf32>
    %cst_372 = arith.constant dense<0xFF800000> : vector<8xf32>
    %1093 = vector.multi_reduction <maximumf>, %1092, %cst_372 [1] : vector<8x8xf32> to vector<8xf32>
    %1094 = vector.shape_cast %1093 : vector<8xf32> to vector<8x1xf32>
    %1095 = vector.broadcast %1094 : vector<8x1xf32> to vector<8x8xf32>
    %1096 = arith.subf %1092, %1095 : vector<8x8xf32>
    %1097 = math.exp %1096 : vector<8x8xf32>
    %cst_373 = arith.constant dense<0.000000e+00> : vector<8xf32>
    %1098 = vector.multi_reduction <add>, %1097, %cst_373 [1] : vector<8x8xf32> to vector<8xf32>
    %1099 = vector.shape_cast %1098 : vector<8xf32> to vector<8x1xf32>
    %1100 = tpu.reciprocal %1099 {approx = true} : vector<8x1xf32> -> vector<8x1xf32>
    %1101 = vector.broadcast %1100 : vector<8x1xf32> to vector<8x8xf32>
    %1102 = arith.mulf %1097, %1101 : vector<8x8xf32>
    %1103 = arith.truncf %1102 : vector<8x8xf32> to vector<8x8xbf16>
    %cst_374 = arith.constant dense<0.000000e+00> : vector<8x128xf32>
    %1104 = tpu.matmul %1103, %1088, %cst_374 {dimension_numbers = #tpu.dot_dimension_numbers<[1], [0], [0], [1], [0, 0, 1, 1], [], []>} : vector<8x8xbf16>, vector<8x128xbf16>, vector<8x128xf32> -> vector<8x128xf32>
    %1105 = arith.addf %1073, %1104 : vector<8x128xf32>
    %c16_i32_375 = arith.constant 16 : i32
    %1106 = vector.broadcast %c16_i32_375 : i32 to vector<1x128xi32>
    %1107 = arith.cmpi sge, %0, %1106 : vector<1x128xi32>
    %c24_i32_376 = arith.constant 24 : i32
    %1108 = vector.broadcast %c24_i32_376 : i32 to vector<1x128xi32>
    %1109 = arith.cmpi slt, %0, %1108 : vector<1x128xi32>
    %1110 = arith.andi %1107, %1109 : vector<1x128xi1>
    %cst_377 = arith.constant 0.000000e+00 : f32
    %1111 = vector.shape_cast %1110 : vector<1x128xi1> to vector<1x128xi1>
    %1112 = vector.broadcast %1111 : vector<1x128xi1> to vector<8x128xi1>
    %1113 = vector.broadcast %cst_377 : f32 to vector<8x128xf32>
    %1114 = arith.select %1112, %1038, %1113 : vector<8x128xi1>, vector<8x128xf32>
    %1115 = arith.truncf %1114 : vector<8x128xf32> to vector<8x128xbf16>
    %cst_378 = arith.constant 0.000000e+00 : f32
    %1116 = vector.shape_cast %1110 : vector<1x128xi1> to vector<1x128xi1>
    %1117 = vector.broadcast %1116 : vector<1x128xi1> to vector<8x128xi1>
    %1118 = vector.broadcast %cst_378 : f32 to vector<8x128xf32>
    %1119 = arith.select %1117, %1039, %1118 : vector<8x128xi1>, vector<8x128xf32>
    %1120 = arith.truncf %1119 : vector<8x128xf32> to vector<8x128xbf16>
    %cst_379 = arith.constant dense<0.000000e+00> : vector<8x8xf32>
    %1121 = tpu.matmul %1042, %1115, %cst_379 {dimension_numbers = #tpu.dot_dimension_numbers<[1], [1], [0], [0], [0, 0, 1, 0], [], []>} : vector<8x128xbf16>, vector<8x128xbf16>, vector<8x8xf32> -> vector<8x8xf32>
    %cst_380 = arith.constant 0.353553385 : f32
    %1122 = vector.broadcast %cst_380 : f32 to vector<8x8xf32>
    %1123 = arith.mulf %1121, %1122 : vector<8x8xf32>
    %1124 = arith.addf %1123, %1 : vector<8x8xf32>
    %cst_381 = arith.constant dense<0xFF800000> : vector<8xf32>
    %1125 = vector.multi_reduction <maximumf>, %1124, %cst_381 [1] : vector<8x8xf32> to vector<8xf32>
    %1126 = vector.shape_cast %1125 : vector<8xf32> to vector<8x1xf32>
    %1127 = vector.broadcast %1126 : vector<8x1xf32> to vector<8x8xf32>
    %1128 = arith.subf %1124, %1127 : vector<8x8xf32>
    %1129 = math.exp %1128 : vector<8x8xf32>
    %cst_382 = arith.constant dense<0.000000e+00> : vector<8xf32>
    %1130 = vector.multi_reduction <add>, %1129, %cst_382 [1] : vector<8x8xf32> to vector<8xf32>
    %1131 = vector.shape_cast %1130 : vector<8xf32> to vector<8x1xf32>
    %1132 = tpu.reciprocal %1131 {approx = true} : vector<8x1xf32> -> vector<8x1xf32>
    %1133 = vector.broadcast %1132 : vector<8x1xf32> to vector<8x8xf32>
    %1134 = arith.mulf %1129, %1133 : vector<8x8xf32>
    %1135 = arith.truncf %1134 : vector<8x8xf32> to vector<8x8xbf16>
    %cst_383 = arith.constant dense<0.000000e+00> : vector<8x128xf32>
    %1136 = tpu.matmul %1135, %1120, %cst_383 {dimension_numbers = #tpu.dot_dimension_numbers<[1], [0], [0], [1], [0, 0, 1, 1], [], []>} : vector<8x8xbf16>, vector<8x128xbf16>, vector<8x128xf32> -> vector<8x128xf32>
    %1137 = arith.addf %1105, %1136 : vector<8x128xf32>
    %c24_i32_384 = arith.constant 24 : i32
    %1138 = vector.broadcast %c24_i32_384 : i32 to vector<1x128xi32>
    %1139 = arith.cmpi sge, %0, %1138 : vector<1x128xi32>
    %c32_i32_385 = arith.constant 32 : i32
    %1140 = vector.broadcast %c32_i32_385 : i32 to vector<1x128xi32>
    %1141 = arith.cmpi slt, %0, %1140 : vector<1x128xi32>
    %1142 = arith.andi %1139, %1141 : vector<1x128xi1>
    %cst_386 = arith.constant 0.000000e+00 : f32
    %1143 = vector.shape_cast %1142 : vector<1x128xi1> to vector<1x128xi1>
    %1144 = vector.broadcast %1143 : vector<1x128xi1> to vector<8x128xi1>
    %1145 = vector.broadcast %cst_386 : f32 to vector<8x128xf32>
    %1146 = arith.select %1144, %1038, %1145 : vector<8x128xi1>, vector<8x128xf32>
    %1147 = arith.truncf %1146 : vector<8x128xf32> to vector<8x128xbf16>
    %cst_387 = arith.constant 0.000000e+00 : f32
    %1148 = vector.shape_cast %1142 : vector<1x128xi1> to vector<1x128xi1>
    %1149 = vector.broadcast %1148 : vector<1x128xi1> to vector<8x128xi1>
    %1150 = vector.broadcast %cst_387 : f32 to vector<8x128xf32>
    %1151 = arith.select %1149, %1039, %1150 : vector<8x128xi1>, vector<8x128xf32>
    %1152 = arith.truncf %1151 : vector<8x128xf32> to vector<8x128xbf16>
    %cst_388 = arith.constant dense<0.000000e+00> : vector<8x8xf32>
    %1153 = tpu.matmul %1042, %1147, %cst_388 {dimension_numbers = #tpu.dot_dimension_numbers<[1], [1], [0], [0], [0, 0, 1, 0], [], []>} : vector<8x128xbf16>, vector<8x128xbf16>, vector<8x8xf32> -> vector<8x8xf32>
    %cst_389 = arith.constant 0.353553385 : f32
    %1154 = vector.broadcast %cst_389 : f32 to vector<8x8xf32>
    %1155 = arith.mulf %1153, %1154 : vector<8x8xf32>
    %1156 = arith.addf %1155, %1 : vector<8x8xf32>
    %cst_390 = arith.constant dense<0xFF800000> : vector<8xf32>
    %1157 = vector.multi_reduction <maximumf>, %1156, %cst_390 [1] : vector<8x8xf32> to vector<8xf32>
    %1158 = vector.shape_cast %1157 : vector<8xf32> to vector<8x1xf32>
    %1159 = vector.broadcast %1158 : vector<8x1xf32> to vector<8x8xf32>
    %1160 = arith.subf %1156, %1159 : vector<8x8xf32>
    %1161 = math.exp %1160 : vector<8x8xf32>
    %cst_391 = arith.constant dense<0.000000e+00> : vector<8xf32>
    %1162 = vector.multi_reduction <add>, %1161, %cst_391 [1] : vector<8x8xf32> to vector<8xf32>
    %1163 = vector.shape_cast %1162 : vector<8xf32> to vector<8x1xf32>
    %1164 = tpu.reciprocal %1163 {approx = true} : vector<8x1xf32> -> vector<8x1xf32>
    %1165 = vector.broadcast %1164 : vector<8x1xf32> to vector<8x8xf32>
    %1166 = arith.mulf %1161, %1165 : vector<8x8xf32>
    %1167 = arith.truncf %1166 : vector<8x8xf32> to vector<8x8xbf16>
    %cst_392 = arith.constant dense<0.000000e+00> : vector<8x128xf32>
    %1168 = tpu.matmul %1167, %1152, %cst_392 {dimension_numbers = #tpu.dot_dimension_numbers<[1], [0], [0], [1], [0, 0, 1, 1], [], []>} : vector<8x8xbf16>, vector<8x128xbf16>, vector<8x128xf32> -> vector<8x128xf32>
    %1169 = arith.addf %1137, %1168 : vector<8x128xf32>
    %1170 = arith.truncf %1169 : vector<8x128xf32> to vector<8x128xbf16>
    %cst_393 = arith.constant dense<0.000000e+00> : vector<8x128xf32>
    %1171 = tpu.matmul %1170, %1041, %cst_393 {dimension_numbers = #tpu.dot_dimension_numbers<[1], [0], [0], [1], [0, 0, 1, 1], [], []>} : vector<8x128xbf16>, vector<128x128xbf16>, vector<8x128xf32> -> vector<8x128xf32>
    %1172 = vector.broadcast %848 : vector<1x128xf32> to vector<8x128xf32>
    %1173 = arith.addf %1171, %1172 : vector<8x128xf32>
    %1174 = arith.addf %1173, %1023 : vector<8x128xf32>
    %cst_394 = arith.constant dense<0.000000e+00> : vector<8xf32>
    %1175 = vector.multi_reduction <add>, %1174, %cst_394 [1] : vector<8x128xf32> to vector<8xf32>
    %1176 = vector.shape_cast %1175 : vector<8xf32> to vector<8x1xf32>
    %cst_395 = arith.constant 3.125000e-02 : f32
    %1177 = vector.broadcast %cst_395 : f32 to vector<8x1xf32>
    %1178 = arith.mulf %1176, %1177 : vector<8x1xf32>
    %1179 = vector.broadcast %1178 : vector<8x1xf32> to vector<8x128xf32>
    %1180 = arith.subf %1174, %1179 : vector<8x128xf32>
    %c32_i32_396 = arith.constant 32 : i32
    %1181 = vector.broadcast %c32_i32_396 : i32 to vector<1x128xi32>
    %1182 = arith.cmpi slt, %0, %1181 : vector<1x128xi32>
    %cst_397 = arith.constant 0.000000e+00 : f32
    %1183 = vector.shape_cast %1182 : vector<1x128xi1> to vector<1x128xi1>
    %1184 = vector.broadcast %1183 : vector<1x128xi1> to vector<8x128xi1>
    %1185 = vector.broadcast %cst_397 : f32 to vector<8x128xf32>
    %1186 = arith.select %1184, %1180, %1185 : vector<8x128xi1>, vector<8x128xf32>
    %1187 = arith.mulf %1186, %1186 : vector<8x128xf32>
    %cst_398 = arith.constant dense<0.000000e+00> : vector<8xf32>
    %1188 = vector.multi_reduction <add>, %1187, %cst_398 [1] : vector<8x128xf32> to vector<8xf32>
    %1189 = vector.shape_cast %1188 : vector<8xf32> to vector<8x1xf32>
    %cst_399 = arith.constant 3.125000e-02 : f32
    %1190 = vector.broadcast %cst_399 : f32 to vector<8x1xf32>
    %1191 = arith.mulf %1189, %1190 : vector<8x1xf32>
    %cst_400 = arith.constant 9.99999974E-6 : f32
    %1192 = vector.broadcast %cst_400 : f32 to vector<8x1xf32>
    %1193 = arith.addf %1191, %1192 : vector<8x1xf32>
    %1194 = math.rsqrt %1193 : vector<8x1xf32>
    %1195 = vector.broadcast %1194 : vector<8x1xf32> to vector<8x128xf32>
    %1196 = arith.mulf %1180, %1195 : vector<8x128xf32>
    %1197 = vector.broadcast %852 : vector<1x128xf32> to vector<8x128xf32>
    %1198 = arith.mulf %1196, %1197 : vector<8x128xf32>
    %1199 = vector.broadcast %853 : vector<1x128xf32> to vector<8x128xf32>
    %1200 = arith.addf %1198, %1199 : vector<8x128xf32>
    %c1_401 = arith.constant 1 : index
    %c0_402 = arith.constant 0 : index
    %c0_403 = arith.constant 0 : index
    %1201 = vector.load %arg16[%c1_401, %c0_402, %c0_403] : memref<2x128x128xbf16, #tpu.memory_space<vmem>>, vector<1x128x128xbf16>
    %1202 = vector.shape_cast %1201 : vector<1x128x128xbf16> to vector<128x128xbf16>
    %c1_404 = arith.constant 1 : index
    %c0_405 = arith.constant 0 : index
    %c0_406 = arith.constant 0 : index
    %1203 = vector.load %arg20[%c1_404, %c0_405, %c0_406] : memref<2x1x128xf32, #tpu.memory_space<vmem>>, vector<1x1x128xf32>
    %1204 = vector.shape_cast %1203 : vector<1x1x128xf32> to vector<1x128xf32>
    %c1_407 = arith.constant 1 : index
    %c0_408 = arith.constant 0 : index
    %c0_409 = arith.constant 0 : index
    %1205 = vector.load %arg17[%c1_407, %c0_408, %c0_409] : memref<2x128x128xbf16, #tpu.memory_space<vmem>>, vector<1x128x128xbf16>
    %1206 = vector.shape_cast %1205 : vector<1x128x128xbf16> to vector<128x128xbf16>
    %1207 = arith.truncf %1200 : vector<8x128xf32> to vector<8x128xbf16>
    %cst_410 = arith.constant dense<0.000000e+00> : vector<8x128xf32>
    %1208 = tpu.matmul %1207, %1202, %cst_410 {dimension_numbers = #tpu.dot_dimension_numbers<[1], [0], [0], [1], [0, 0, 1, 1], [], []>} : vector<8x128xbf16>, vector<128x128xbf16>, vector<8x128xf32> -> vector<8x128xf32>
    %1209 = vector.broadcast %1204 : vector<1x128xf32> to vector<8x128xf32>
    %1210 = arith.addf %1208, %1209 : vector<8x128xf32>
    %cst_411 = arith.constant 0.000000e+00 : f32
    %1211 = vector.broadcast %cst_411 : f32 to vector<8x128xf32>
    %1212 = arith.maximumf %1210, %1211 : vector<8x128xf32>
    %1213 = arith.truncf %1212 : vector<8x128xf32> to vector<8x128xbf16>
    %cst_412 = arith.constant dense<0.000000e+00> : vector<8x128xf32>
    %1214 = tpu.matmul %1213, %1206, %cst_412 {dimension_numbers = #tpu.dot_dimension_numbers<[1], [0], [0], [1], [0, 0, 1, 1], [], []>} : vector<8x128xbf16>, vector<128x128xbf16>, vector<8x128xf32> -> vector<8x128xf32>
    %1215 = vector.broadcast %849 : vector<1x128xf32> to vector<8x128xf32>
    %1216 = arith.addf %1214, %1215 : vector<8x128xf32>
    %1217 = arith.addf %1216, %1200 : vector<8x128xf32>
    %cst_413 = arith.constant dense<0.000000e+00> : vector<8xf32>
    %1218 = vector.multi_reduction <add>, %1217, %cst_413 [1] : vector<8x128xf32> to vector<8xf32>
    %1219 = vector.shape_cast %1218 : vector<8xf32> to vector<8x1xf32>
    %cst_414 = arith.constant 3.125000e-02 : f32
    %1220 = vector.broadcast %cst_414 : f32 to vector<8x1xf32>
    %1221 = arith.mulf %1219, %1220 : vector<8x1xf32>
    %1222 = vector.broadcast %1221 : vector<8x1xf32> to vector<8x128xf32>
    %1223 = arith.subf %1217, %1222 : vector<8x128xf32>
    %c32_i32_415 = arith.constant 32 : i32
    %1224 = vector.broadcast %c32_i32_415 : i32 to vector<1x128xi32>
    %1225 = arith.cmpi slt, %0, %1224 : vector<1x128xi32>
    %cst_416 = arith.constant 0.000000e+00 : f32
    %1226 = vector.shape_cast %1225 : vector<1x128xi1> to vector<1x128xi1>
    %1227 = vector.broadcast %1226 : vector<1x128xi1> to vector<8x128xi1>
    %1228 = vector.broadcast %cst_416 : f32 to vector<8x128xf32>
    %1229 = arith.select %1227, %1223, %1228 : vector<8x128xi1>, vector<8x128xf32>
    %1230 = arith.mulf %1229, %1229 : vector<8x128xf32>
    %cst_417 = arith.constant dense<0.000000e+00> : vector<8xf32>
    %1231 = vector.multi_reduction <add>, %1230, %cst_417 [1] : vector<8x128xf32> to vector<8xf32>
    %1232 = vector.shape_cast %1231 : vector<8xf32> to vector<8x1xf32>
    %cst_418 = arith.constant 3.125000e-02 : f32
    %1233 = vector.broadcast %cst_418 : f32 to vector<8x1xf32>
    %1234 = arith.mulf %1232, %1233 : vector<8x1xf32>
    %cst_419 = arith.constant 9.99999974E-6 : f32
    %1235 = vector.broadcast %cst_419 : f32 to vector<8x1xf32>
    %1236 = arith.addf %1234, %1235 : vector<8x1xf32>
    %1237 = math.rsqrt %1236 : vector<8x1xf32>
    %1238 = vector.broadcast %1237 : vector<8x1xf32> to vector<8x128xf32>
    %1239 = arith.mulf %1223, %1238 : vector<8x128xf32>
    %1240 = vector.broadcast %854 : vector<1x128xf32> to vector<8x128xf32>
    %1241 = arith.mulf %1239, %1240 : vector<8x128xf32>
    %1242 = vector.broadcast %855 : vector<1x128xf32> to vector<8x128xf32>
    %1243 = arith.addf %1241, %1242 : vector<8x128xf32>
    %1244 = arith.truncf %1243 : vector<8x128xf32> to vector<8x128xbf16>
    %c0_420 = arith.constant 0 : index
    %c0_421 = arith.constant 0 : index
    %1245 = vector.load %arg22[%c0_420, %c0_421] : memref<128x128xbf16, #tpu.memory_space<vmem>>, vector<128x128xbf16>
    %cst_422 = arith.constant dense<0.000000e+00> : vector<8x128xf32>
    %1246 = tpu.matmul %1244, %1245, %cst_422 {dimension_numbers = #tpu.dot_dimension_numbers<[1], [0], [0], [1], [0, 0, 1, 1], [], []>} : vector<8x128xbf16>, vector<128x128xbf16>, vector<8x128xf32> -> vector<8x128xf32>
    %c0_423 = arith.constant 0 : index
    %c0_424 = arith.constant 0 : index
    %1247 = vector.load %arg23[%c0_423, %c0_424] : memref<1x128xf32, #tpu.memory_space<vmem>>, vector<1x128xf32>
    %1248 = vector.broadcast %1247 : vector<1x128xf32> to vector<8x128xf32>
    %1249 = arith.addf %1246, %1248 : vector<8x128xf32>
    %c0_425 = arith.constant 0 : index
    %c0_426 = arith.constant 0 : index
    %c0_427 = arith.constant 0 : index
    %1250 = vector.load %arg24[%c0_425, %c0_426, %c0_427] : memref<1x8x128xf32, #tpu.memory_space<vmem>>, vector<1x8x128xf32>
    %1251 = vector.shape_cast %1250 : vector<1x8x128xf32> to vector<8x128xf32>
    %1252 = vector.shape_cast %1249 : vector<8x128xf32> to vector<1x8x128xf32>
    tpu.vector_store %arg24[%c0_425, %c0_426, %c0_427], %1252 {strides = array<i32>} : memref<1x8x128xf32, #tpu.memory_space<vmem>>, vector<1x8x128xf32>,
    return
  }
  func.func @transform_0(%arg0: i32) -> (i32, i32, i32) {
    %c0_i32 = arith.constant 0 : i32
    %c0_i32_0 = arith.constant 0 : i32
    %c0_i32_1 = arith.constant 0 : i32
    return %arg0, %c0_i32, %c0_i32_0 : i32, i32, i32
  }
  func.func @transform_1(%arg0: i32) -> (i32, i32, i32) {
    %c0_i32 = arith.constant 0 : i32
    %c0_i32_0 = arith.constant 0 : i32
    %c0_i32_1 = arith.constant 0 : i32
    return %arg0, %c0_i32, %c0_i32_0 : i32, i32, i32
  }
  func.func @transform_2(%arg0: i32) -> (i32, i32) {
    %c0_i32 = arith.constant 0 : i32
    %c0_i32_0 = arith.constant 0 : i32
    %c0_i32_1 = arith.constant 0 : i32
    return %c0_i32, %c0_i32_0 : i32, i32
  }
  func.func @transform_3(%arg0: i32) -> (i32, i32, i32) {
    %c0_i32 = arith.constant 0 : i32
    %c0_i32_0 = arith.constant 0 : i32
    %c0_i32_1 = arith.constant 0 : i32
    %c0_i32_2 = arith.constant 0 : i32
    return %c0_i32, %c0_i32_0, %c0_i32_1 : i32, i32, i32
  }
  func.func @transform_4(%arg0: i32) -> (i32, i32, i32) {
    %c0_i32 = arith.constant 0 : i32
    %c0_i32_0 = arith.constant 0 : i32
    %c0_i32_1 = arith.constant 0 : i32
    %c0_i32_2 = arith.constant 0 : i32
    return %c0_i32, %c0_i32_0, %c0_i32_1 : i32, i32, i32
  }
  func.func @transform_5(%arg0: i32) -> (i32, i32, i32) {
    %c0_i32 = arith.constant 0 : i32
    %c0_i32_0 = arith.constant 0 : i32
    %c0_i32_1 = arith.constant 0 : i32
    %c0_i32_2 = arith.constant 0 : i32
    return %c0_i32, %c0_i32_0, %c0_i32_1 : i32, i32, i32
  }
  func.func @transform_6(%arg0: i32) -> (i32, i32, i32) {
    %c0_i32 = arith.constant 0 : i32
    %c0_i32_0 = arith.constant 0 : i32
    %c0_i32_1 = arith.constant 0 : i32
    %c0_i32_2 = arith.constant 0 : i32
    return %c0_i32, %c0_i32_0, %c0_i32_1 : i32, i32, i32
  }
  func.func @transform_7(%arg0: i32) -> (i32, i32, i32) {
    %c0_i32 = arith.constant 0 : i32
    %c0_i32_0 = arith.constant 0 : i32
    %c0_i32_1 = arith.constant 0 : i32
    %c0_i32_2 = arith.constant 0 : i32
    return %c0_i32, %c0_i32_0, %c0_i32_1 : i32, i32, i32
  }
  func.func @transform_8(%arg0: i32) -> (i32, i32, i32) {
    %c0_i32 = arith.constant 0 : i32
    %c0_i32_0 = arith.constant 0 : i32
    %c0_i32_1 = arith.constant 0 : i32
    %c0_i32_2 = arith.constant 0 : i32
    return %c0_i32, %c0_i32_0, %c0_i32_1 : i32, i32, i32
  }
  func.func @transform_9(%arg0: i32) -> (i32, i32, i32) {
    %c0_i32 = arith.constant 0 : i32
    %c0_i32_0 = arith.constant 0 : i32
    %c0_i32_1 = arith.constant 0 : i32
    %c0_i32_2 = arith.constant 0 : i32
    return %c0_i32, %c0_i32_0, %c0_i32_1 : i32, i32, i32
  }
  func.func @transform_10(%arg0: i32) -> (i32, i32, i32) {
    %c0_i32 = arith.constant 0 : i32
    %c0_i32_0 = arith.constant 0 : i32
    %c0_i32_1 = arith.constant 0 : i32
    %c0_i32_2 = arith.constant 0 : i32
    return %c0_i32, %c0_i32_0, %c0_i32_1 : i32, i32, i32
  }
  func.func @transform_11(%arg0: i32) -> (i32, i32, i32) {
    %c0_i32 = arith.constant 0 : i32
    %c0_i32_0 = arith.constant 0 : i32
    %c0_i32_1 = arith.constant 0 : i32
    %c0_i32_2 = arith.constant 0 : i32
    return %c0_i32, %c0_i32_0, %c0_i32_1 : i32, i32, i32
  }
  func.func @transform_12(%arg0: i32) -> (i32, i32, i32) {
    %c0_i32 = arith.constant 0 : i32
    %c0_i32_0 = arith.constant 0 : i32
    %c0_i32_1 = arith.constant 0 : i32
    %c0_i32_2 = arith.constant 0 : i32
    return %c0_i32, %c0_i32_0, %c0_i32_1 : i32, i32, i32
  }
  func.func @transform_13(%arg0: i32) -> (i32, i32, i32) {
    %c0_i32 = arith.constant 0 : i32
    %c0_i32_0 = arith.constant 0 : i32
    %c0_i32_1 = arith.constant 0 : i32
    %c0_i32_2 = arith.constant 0 : i32
    return %c0_i32, %c0_i32_0, %c0_i32_1 : i32, i32, i32
  }
  func.func @transform_14(%arg0: i32) -> (i32, i32, i32) {
    %c0_i32 = arith.constant 0 : i32
    %c0_i32_0 = arith.constant 0 : i32
    %c0_i32_1 = arith.constant 0 : i32
    %c0_i32_2 = arith.constant 0 : i32
    return %c0_i32, %c0_i32_0, %c0_i32_1 : i32, i32, i32
  }
  func.func @transform_15(%arg0: i32) -> (i32, i32, i32) {
    %c0_i32 = arith.constant 0 : i32
    %c0_i32_0 = arith.constant 0 : i32
    %c0_i32_1 = arith.constant 0 : i32
    %c0_i32_2 = arith.constant 0 : i32
    return %c0_i32, %c0_i32_0, %c0_i32_1 : i32, i32, i32
  }
  func.func @transform_16(%arg0: i32) -> (i32, i32, i32) {
    %c0_i32 = arith.constant 0 : i32
    %c0_i32_0 = arith.constant 0 : i32
    %c0_i32_1 = arith.constant 0 : i32
    %c0_i32_2 = arith.constant 0 : i32
    return %c0_i32, %c0_i32_0, %c0_i32_1 : i32, i32, i32
  }
  func.func @transform_17(%arg0: i32) -> (i32, i32, i32) {
    %c0_i32 = arith.constant 0 : i32
    %c0_i32_0 = arith.constant 0 : i32
    %c0_i32_1 = arith.constant 0 : i32
    %c0_i32_2 = arith.constant 0 : i32
    return %c0_i32, %c0_i32_0, %c0_i32_1 : i32, i32, i32
  }
  func.func @transform_18(%arg0: i32) -> (i32, i32, i32) {
    %c0_i32 = arith.constant 0 : i32
    %c0_i32_0 = arith.constant 0 : i32
    %c0_i32_1 = arith.constant 0 : i32
    %c0_i32_2 = arith.constant 0 : i32
    return %c0_i32, %c0_i32_0, %c0_i32_1 : i32, i32, i32
  }
  func.func @transform_19(%arg0: i32) -> (i32, i32, i32) {
    %c0_i32 = arith.constant 0 : i32
    %c0_i32_0 = arith.constant 0 : i32
    %c0_i32_1 = arith.constant 0 : i32
    %c0_i32_2 = arith.constant 0 : i32
    return %c0_i32, %c0_i32_0, %c0_i32_1 : i32, i32, i32
  }
  func.func @transform_20(%arg0: i32) -> (i32, i32, i32) {
    %c0_i32 = arith.constant 0 : i32
    %c0_i32_0 = arith.constant 0 : i32
    %c0_i32_1 = arith.constant 0 : i32
    %c0_i32_2 = arith.constant 0 : i32
    return %c0_i32, %c0_i32_0, %c0_i32_1 : i32, i32, i32
  }
  func.func @transform_21(%arg0: i32) -> (i32, i32) {
    %c0_i32 = arith.constant 0 : i32
    %c0_i32_0 = arith.constant 0 : i32
    %c0_i32_1 = arith.constant 0 : i32
    return %c0_i32, %c0_i32_0 : i32, i32
  }
  func.func @transform_22(%arg0: i32) -> (i32, i32) {
    %c0_i32 = arith.constant 0 : i32
    %c0_i32_0 = arith.constant 0 : i32
    %c0_i32_1 = arith.constant 0 : i32
    return %c0_i32, %c0_i32_0 : i32, i32
  }
  func.func @transform_23(%arg0: i32) -> (i32, i32, i32) {
    %c0_i32 = arith.constant 0 : i32
    %c0_i32_0 = arith.constant 0 : i32
    %c0_i32_1 = arith.constant 0 : i32
    return %arg0, %c0_i32, %c0_i32_0 : i32, i32, i32
  }
}

</mosaic_0001>

<bundles_post_ra>
// kernel: transformer_forward.1
= control target key start
LH: loop header
LB: loop body
LE: loop exit
PB: predicated region body
PF: predicated region fallthrough
CT: control target
= control target key end

     0   :  { %s8086_s0 = inlined_call_operand.vmem [shape: f32[2,8,128], index: 0, kind: input, shape index: {}]   ;;  %s8087_s1 = inlined_call_operand.vmem [shape: f32[2,8,128], index: 1, kind: input, shape index: {}]   ;;  %s8088_s2 = inlined_call_operand.vmem [shape: f32[8,8], index: 2, kind: input, shape index: {}]   ;;  %s8089_s3 = inlined_call_operand.hbm [shape: bf16[2,128,384], index: 3, kind: input, shape index: {}]   ;;  %s8090_s4 = inlined_call_operand.vmem [shape: bf16[2,128,128], index: 4, kind: input, shape index: {}]   ;;  %s8091_s5 = inlined_call_operand.hbm [shape: bf16[2,128,128], index: 5, kind: input, shape index: {}]   ;;  %s8092_s6 = inlined_call_operand.hbm [shape: bf16[2,128,128], index: 6, kind: input, shape index: {}]   ;;  %s8093_s7 = inlined_call_operand.vmem [shape: f32[2,1,384], index: 7, kind: input, shape index: {}]   ;;  %s8094_s8 = inlined_call_operand.vmem [shape: f32[2,1,128], index: 8, kind: input, shape index: {}]   ;;  %s8095_s9 = inlined_call_operand.vmem [shape: f32[2,6,128], index: 9, kind: input, shape index: {}]   ;;  %s8096_s10 = inlined_call_operand.hbm [shape: bf16[2,128,384], index: 10, kind: input, shape index: {}]   ;;  %s8097_s11 = inlined_call_operand.hbm [shape: bf16[2,128,128], index: 11, kind: input, shape index: {}]   ;;  %s8098_s12 = inlined_call_operand.hbm [shape: bf16[2,128,128], index: 12, kind: input, shape index: {}]   ;;  %s8099_s13 = inlined_call_operand.hbm [shape: bf16[2,128,256], index: 13, kind: input, shape index: {}]   ;;  %s8100_s14 = inlined_call_operand.hbm [shape: bf16[2,128,128], index: 14, kind: input, shape index: {}]   ;;  %s8101_s15 = inlined_call_operand.hbm [shape: bf16[2,128,128], index: 15, kind: input, shape index: {}]   ;;  %s8102_s16 = inlined_call_operand.hbm [shape: bf16[2,128,128], index: 16, kind: input, shape index: {}]   ;;  %s8103_s17 = inlined_call_operand.vmem [shape: f32[2,1,384], index: 17, kind: input, shape index: {}]   ;;  %s8104_s18 = inlined_call_operand.vmem [shape: f32[2,1,256], index: 18, kind: input, shape index: {}]   ;;  %s8105_s19 = inlined_call_operand.vmem [shape: f32[2,1,128], index: 19, kind: input, shape index: {}]   ;;  %s8106_s20 = inlined_call_operand.vmem [shape: f32[2,10,128], index: 20, kind: input, shape index: {}]   ;;  %s8107_s21 = inlined_call_operand.vmem [shape: bf16[128,128], index: 21, kind: input, shape index: {}]   ;;  %s8108_s22 = inlined_call_operand.vmem [shape: f32[1,128], index: 22, kind: input, shape index: {}]   ;;  %s8109_s23 = inlined_call_operand.hbm [shape: f32[2,8,128], index: 23, kind: output, shape index: {}]  }
   0x1   :  { %8124 = sst [smem:[#allocation35_spill]] %s8086_s0 }
   0x2   :  { %8125 = sst [smem:[#allocation36_spill]] %s8087_s1 }
   0x3   :  { %8126 = sst [smem:[#allocation37_spill]] %s8088_s2 }
   0x4   :  { %8127 = sst [smem:[#allocation38_spill]] %s8089_s3 }
   0x5   :  { %8128 = sst [smem:[#allocation39_spill]] %s8090_s4 }
   0x6   :  { %8129 = sst [smem:[#allocation40_spill]] %s8091_s5 }
   0x7   :  { %8130 = sst [smem:[#allocation41_spill]] %s8092_s6 }
   0x8   :  { %8131 = sst [smem:[#allocation42_spill]] %s8093_s7 }
   0x9   :  { %8132 = sst [smem:[#allocation43_spill]] %s8096_s10 }
   0xa   :  { %8133 = sst [smem:[#allocation44_spill]] %s8098_s12 }
   0xb   :  { %8134 = sst [smem:[#allocation45_spill]] %s8100_s14 }
   0xc   :  { %8135 = sst [smem:[#allocation46_spill]] %s8107_s21 }
   0xd   :  { %8136 = sst [smem:[#allocation47_spill]] %s8108_s22 }
   0xe   :  { %8137 = sst [smem:[#allocation48_spill]] %s8109_s23 }
   0xf   :  { %28 = vsyncpa [#allocation3], 0 }
  0x10   :  { %29 = vsyncpa [#allocation6], 0 }
  0x11   :  { %30 = vsyncpa [#allocation9], 0 }
  0x12   :  { %31 = vsyncpa [#allocation12], 0 }
  0x13   :  { %32 = vsyncpa [#allocation15], 0 }
  0x14   :  { %33 = vsyncpa [#allocation18], 0 }
  0x15   :  { %34 = vsyncpa [#allocation4], 0 }
  0x16   :  { %36 = vsyncpa [#allocation4 + $0x1], 0  ;;  %s7305_s4 = smov 0   ;;  %s7307_s30 = smov 0  }
  0x17   :  { %s7309_s24 = smov 0   ;;  %s7311_s25 = smov 0  }
  0x18 LB: > { %8138 = sst [smem:[#allocation27_spill]] %s7155_s4  ;;  %s7326_s5 = sadd.s32 4294967295, %s7167_s25   ;;  %s7167_s25 = sphi %s7311_s25, %s8183_s25   ;;  %s7163_s24 = sphi %s7309_s24, %s8186_s24   ;;  %s7159_s30 = sphi %s7307_s30, %s8185_s30   ;;  %s7155_s4 = sphi %s7305_s4, %s8184_s4  }
  0x19   : > { %8139 = sst [smem:[#allocation28_spill]] %s7159_s30  ;;  %s5042_s1 = sadd.s32 4294967294, %s7167_s25  }
  0x1a   : > { %8140 = sst [smem:[#allocation29_spill]] %s7163_s24  ;;  %s7330_s26 = sadd.s32 1, %s7167_s25  }
  0x1b   : > { %8141 = sst [smem:[#allocation30_spill]] %s7167_s25  ;;  %s542_s2 = sadd.s32 1, %s7163_s24 }
  0x1c   : > { %8142 = sst [smem:[#allocation31_spill]] %s7330_s26  ;;  %s539_s6 = ssub.s32 %s7167_s25, %s7330_s26 }
  0x1d   : > { %p552_p0 = scmp.ne.s32.totalorder %s7163_s24, %s7159_s30  ;;  %p540_p1 = scmp.eq.s32.totalorder %s539_s6, 0 }
  0x1e   : > { %p553_p2 = scmp.eq.s32.totalorder %s7326_s5, 1  ;;  %p558_p3 = scmp.ne.s32.totalorder %s7159_s30, %s7155_s4 }
  0x1f   : > { %p559_p4 = scmp.eq.s32.totalorder %s5042_s1, 1  ;;  %p5043_p7 = scmp.ge.s32.totalorder %s7167_s25, 1 }
  0x20   : > { %s7341_s27 = scalar_select %p540_p1, %s7163_s24, %s542_s2  }
  0x21   : > { %p7343_p5 = por %p553_p2, %p552_p0  ;;  %p7347_p6 = por %p559_p4, %p558_p3 }
  0x22   : > { %8143 = sst [smem:[#allocation32_spill]] %s7341_s27  ;;  %p566_p8 = scmp.lt.s32.totalorder %s7167_s25, 3 }
  0x23   : > { %s8144_s7 = scalar_select %p7343_p5, 1, 0 }
  0x24   : > { %s8146_s28 = scalar_select %p7347_p6, 1, 0 }
  0x25   : > { %8145 = sst [smem:[#allocation33_spill]] %s8144_s7  ;;  %p6590_p9 = scmp.eq.s32.totalorder %s7326_s5, 0 }
  0x26   : > { %8147 = sst [smem:[#allocation34_spill]] %s8146_s28  ;;  %p7354_p10 = pnand %p5043_p7, %p566_p8 }
  0x27   : > { %s8149_s1 = sld [smem:[#allocation40_spill]]  ;;  %s7169_s6 = smov [#allocation5]  }
  0x28   : > { %p6555_p11 = pneg %p7354_p10  ;;  %s599_s27 = sshll.u32 %s7169_s6, 4  ;;  %s600_s27 = int_to_ptr.vmem [resolvable:$true] %s599_s27 }
  0x29   : > { %s8151_s10 = sld [smem:[#allocation43_spill]]  ;;  %s7170_s3 = smov 64  }
  0x2a   : > { %p7365_p12 = pnand %p6590_p9, %p6555_p11  ;;  %s7171_s0 = smov 4  }
  0x2b   : > { %s8152_s12 = sld [smem:[#allocation44_spill]]  ;;  %s7173_s26 = smov 192  }
  0x2c   : > { %s7174_s28 = smov 12   ;;  %s8153_s14 = sld [smem:[#allocation45_spill]] }
  0x2d   : > { %s597_s2 = sshll.u32 %s8149_s1, 4  ;;  %s7172_s1 = smov [#allocation8]   ;;  %s598_s2 = int_to_ptr.hbm [resolvable:$true] %s597_s2 }
  0x2e   : > { %6561 = dma.hbm_to_vmem [thread:$0]  (!%p7365_p12), %s598_s2, 2048, %s600_s27, [#allocation6], %s7170_s3, %s7170_s3, %s7171_s0  }
  0x2f   : > { %s634_s4 = sshll.u32 %s8151_s10, 4  ;;  %s636_s6 = sshll.u32 %s7172_s1, 4  ;;  %s635_s4 = int_to_ptr.hbm [resolvable:$true] %s634_s4  ;;  %s637_s6 = int_to_ptr.vmem [resolvable:$true] %s636_s6 }
  0x30   : > { %6567 = dma.hbm_to_vmem [thread:$0]  (!%p7365_p12), %s635_s4, 6144, %s637_s6, [#allocation9], %s7173_s26, %s7173_s26, %s7174_s28  }
  0x31   : > { %s662_s7 = sshll.u32 %s8152_s12, 4  ;;  %s7175_s21 = smov [#allocation11]   ;;  %s663_s7 = int_to_ptr.hbm [resolvable:$true] %s662_s7 }
  0x32   : > { %s690_s30 = sshll.u32 %s8153_s14, 4  ;;  %s664_s27 = sshll.u32 %s7175_s21, 4  ;;  %s691_s30 = int_to_ptr.hbm [resolvable:$true] %s690_s30  ;;  %s665_s27 = int_to_ptr.vmem [resolvable:$true] %s664_s27 }
  0x33   : > { %6573 = dma.hbm_to_vmem [thread:$0]  (!%p7365_p12), %s663_s7, 2048, %s665_s27, [#allocation12], %s7170_s3, %s7170_s3, %s7171_s0  }
  0x34   : > { %s7176_s22 = smov [#allocation14]   ;;  %s8154_s12 = sld [smem:[#allocation38_spill]] }
  0x35   : > { %s692_s25 = sshll.u32 %s7176_s22, 4  ;;  %s8155_s23 = sld [smem:[#allocation41_spill]]  ;;  %s693_s25 = int_to_ptr.vmem [resolvable:$true] %s692_s25 }
  0x36   : > { %6579 = dma.hbm_to_vmem [thread:$0]  (!%p7365_p12), %s691_s30, 2048, %s693_s25, [#allocation15], %s7170_s3, %s7170_s3, %s7171_s0  }
  0x37   : > { %s7177_s14 = smov [#allocation2]   ;;  %s7178_s27 = smov [#allocation7]  }
  0x38   : > { %s582_s7 = sshll.u32 %s7177_s14, 4  ;;  %s648_s1 = sshll.u32 %s8097_s11, 4  ;;  %s583_s7 = int_to_ptr.vmem [resolvable:$true] %s582_s7  ;;  %s649_s1 = int_to_ptr.hbm [resolvable:$true] %s648_s1 }
  0x39   : > { %s676_s25 = sshll.u32 %s8099_s13, 4  ;;  %s7179_s10 = smov [#allocation10]   ;;  %s677_s25 = int_to_ptr.hbm [resolvable:$true] %s676_s25 }
  0x3a   : > { %s580_s4 = sshll.u32 %s8154_s12, 4  ;;  %s613_s12 = sshll.u32 %s7178_s27, 4  ;;  %s581_s4 = int_to_ptr.hbm [resolvable:$true] %s580_s4  ;;  %s614_s12 = int_to_ptr.vmem [resolvable:$true] %s613_s12 }
  0x3b   : > { %s611_s6 = sshll.u32 %s8155_s23, 4  ;;  %s7181_s21 = smov 128   ;;  %s612_s6 = int_to_ptr.hbm [resolvable:$true] %s611_s6 }
  0x3c   : > { %6558 = dma.hbm_to_vmem [thread:$0]  (!%p7365_p12), %s581_s4, 6144, %s583_s7, [#allocation3], %s7173_s26, %s7173_s26, %s7174_s28  }
  0x3d   : > { %6564 = dma.hbm_to_vmem [thread:$0]  (!%p7365_p12), %s612_s6, 2048, %s614_s12, [#allocation6], %s7170_s3, %s7170_s3, %s7171_s0  }
  0x3e   : > { %s650_s26 = sshll.u32 %s7179_s10, 4  ;;  %s7180_s28 = smov [#allocation13]   ;;  %s651_s26 = int_to_ptr.vmem [resolvable:$true] %s650_s26 }
  0x3f   : > { %6570 = dma.hbm_to_vmem [thread:$0]  (!%p7365_p12), %s649_s1, 2048, %s651_s26, [#allocation9], %s7170_s3, %s7170_s3, %s7171_s0  }
  0x40   : > { %s678_s4 = sshll.u32 %s7180_s28, 4  ;;  %s7182_s23 = smov 8   ;;  %s679_s4 = int_to_ptr.vmem [resolvable:$true] %s678_s4 }
  0x41   : > { %6576 = dma.hbm_to_vmem [thread:$0]  (!%p7365_p12), %s677_s25, 4096, %s679_s4, [#allocation12], %s7181_s21, %s7181_s21, %s7182_s23  }
  0x42   : > { %s704_s27 = sshll.u32 %s8101_s15, 4  ;;  %s7183_s12 = smov [#allocation16]   ;;  %s705_s27 = int_to_ptr.hbm [resolvable:$true] %s704_s27 }
  0x43   : > { %s706_s22 = sshll.u32 %s7183_s12, 4  ;;  %s718_s1 = sshll.u32 %s8102_s16, 4  ;;  %s707_s22 = int_to_ptr.vmem [resolvable:$true] %s706_s22  ;;  %s719_s1 = int_to_ptr.hbm [resolvable:$true] %s718_s1 }
  0x44   : > { %6582 = dma.hbm_to_vmem [thread:$0]  (!%p7365_p12), %s705_s27, 2048, %s707_s22, [#allocation15], %s7170_s3, %s7170_s3, %s7171_s0  }
  0x45   : > { %s7184_s14 = smov [#allocation17]   ;;  %768 = sbr.rel (%p7354_p10) target bundleno = 10308 (0x2844), region = 112 }
  0x46   : > { %s720_s25 = sshll.u32 %s7184_s14, 4  ;;  %s721_s25 = int_to_ptr.vmem [resolvable:$true] %s720_s25 }
  0x47   : > { %6585 = dma.hbm_to_vmem [thread:$0]  (!%p7365_p12), %s719_s1, 2048, %s721_s25, [#allocation18], %s7170_s3, %s7170_s3, %s7171_s0  }
  0x4a   : > { %7126 = dma.done.wait (%p6590_p9), [#allocation3], 6144  }
  0x4b   : > { %7128 = vsyncadd (%p6590_p9), [#allocation3], 4294961152 }
  0x4c   : > { %7130 = dma.done.wait (%p6590_p9), [#allocation6], 4096  }
  0x4d   : > { %7132 = vsyncadd (%p6590_p9), [#allocation6], 4294963200 }
  0x4e   : > { %7134 = dma.done.wait (%p6590_p9), [#allocation9], 8192  }
  0x4f   : > { %7136 = vsyncadd (%p6590_p9), [#allocation9], 4294959104 }
  0x50   : > { %7138 = dma.done.wait (%p6590_p9), [#allocation12], 6144  }
  0x51   : > { %7140 = vsyncadd (%p6590_p9), [#allocation12], 4294961152 }
  0x52   : > { %7142 = dma.done.wait (%p6590_p9), [#allocation15], 4096  }
  0x53   : > { %7144 = vsyncadd (%p6590_p9), [#allocation15], 4294963200 }
  0x54   : > { %7146 = dma.done.wait (%p6590_p9), [#allocation18], 2048  }
  0x55   : > { %7148 = vsyncadd (%p6590_p9), [#allocation18], 4294965248  ;;  %v5155_v0 = vld [vmem:[#allocation2 + $0xa8] sm:$0xf]  ;;  %v6271_v1 = vld [vmem:[#allocation2 + $0xb0] sm:$0xf0] }
  0x56   : > { %v6270_v2 = vld [vmem:[#allocation2 + $0xac] sm:$0xf]  ;;  %v5156_v3 = vor.u32 %v6271_v1, %v5155_v0  ;;  %v5157_v4 = vld [vmem:[#allocation2 + $0xb4] sm:$0xf0]  ;;  %v5143_v5 = vld [vmem:[#allocation2 + $0x90] sm:$0xf] }
  0x57   : > { %v6268_v6 = vld [vmem:[#allocation2 + $0x98] sm:$0xf0]  ;;  %v5160_v7 = vor.u32 %v6270_v2, %v5157_v4  ;;  %v6267_v8 = vld [vmem:[#allocation2 + $0x94] sm:$0xf]  ;;  %v5145_v9 = vld [vmem:[#allocation2 + $0x9c] sm:$0xf0] }
  0x58   : > { %1064 = vmatpush.bf16.msra.mxu0 %v5156_v3  ;;  %v5144_v10 = vor.u32 %v6268_v6, %v5143_v5  ;;  %v5148_v11 = vor.u32 %v6267_v8, %v5145_v9  ;;  %v5131_v12 = vld [vmem:[#allocation2 + $0x78] sm:$0xf]  ;;  %v6265_v13 = vld [vmem:[#allocation2 + $0x80] sm:$0xf0]  ;;  %v6264_v14 = vld [vmem:[#allocation2 + $0x7c] sm:$0xf] }
  0x59   : > { %1077 = vmatpush.bf16.msra.mxu1 %v5160_v7  ;;  %v5133_v15 = vld [vmem:[#allocation2 + $0x84] sm:$0xf0]  ;;  %v5163_v16 = vld [vmem:[#allocation2 + $0xb0] sm:$0xf]  ;;  %v6272_v17 = vld [vmem:[#allocation2 + $0xb8] sm:$0xf0]  ;;  %v5132_v19 = vor.u32 %v6265_v13, %v5131_v12 }
  0x5a   : > { %v5164_v18 = vor.u32 %v6272_v17, %v5163_v16  ;;  %v5151_v20 = vld [vmem:[#allocation2 + $0x98] sm:$0xf]  ;;  %v6269_v21 = vld [vmem:[#allocation2 + $0xa0] sm:$0xf0]  ;;  %v5136_v22 = vor.u32 %v6264_v14, %v5133_v15  ;;  %v5119_v23 = vld [vmem:[#allocation2 + $0x60] sm:$0xf] }
  0x5b   : > { %v6262_v24 = vld [vmem:[#allocation2 + $0x68] sm:$0xf0]  ;;  %v6261_v25 = vld [vmem:[#allocation2 + $0x64] sm:$0xf]  ;;  %v5152_v26 = vor.u32 %v6269_v21, %v5151_v20  ;;  %v5121_v27 = vld [vmem:[#allocation2 + $0x6c] sm:$0xf0] }
  0x5c   : > { %1065 = vmatpush.bf16.msra.mxu0 %v5144_v10  ;;  %1090 = vmatpush.bf16.msra.mxu2 %v5164_v18  ;;  %v5139_v28 = vld [vmem:[#allocation2 + $0x80] sm:$0xf]  ;;  %v6266_v29 = vld [vmem:[#allocation2 + $0x88] sm:$0xf0]  ;;  %p881_p13 = scmp.lt.s32.totalorder %s7326_s5, 1  ;;  %v5120_v30 = vor.u32 %v6262_v24, %v5119_v23  ;;  %v5124_v31 = vor.u32 %v6261_v25, %v5121_v27  ;;  %s8156_s10 = sld [smem:[#allocation35_spill]]  ;;  %v890_v10 = vlaneseq }
  0x5d   : > { %1078 = vmatpush.bf16.msra.mxu1 %v5148_v11  ;;  %v5107_v32 = vld [vmem:[#allocation2 + $0x48] sm:$0xf]  ;;  %v6259_v33 = vld [vmem:[#allocation2 + $0x50] sm:$0xf0]  ;;  %v6258_v34 = vld [vmem:[#allocation2 + $0x4c] sm:$0xf]  ;;  %v5140_v35 = vor.u32 %v6266_v29, %v5139_v28 }
  0x5e   : > { %v5109_v36 = vld [vmem:[#allocation2 + $0x54] sm:$0xf0]  ;;  %v5127_v37 = vld [vmem:[#allocation2 + $0x68] sm:$0xf]  ;;  %v6263_v38 = vld [vmem:[#allocation2 + $0x70] sm:$0xf0]  ;;  %v5108_v39 = vor.u32 %v6259_v33, %v5107_v32 }
  0x5f   : > { %s7465_s24 = scalar_select %p881_p13, %s7326_s5, 1  ;;  %v5095_v40 = vld [vmem:[#allocation2 + $0x30] sm:$0xf]  ;;  %v6256_v41 = vld [vmem:[#allocation2 + $0x38] sm:$0xf0]  ;;  %v5112_v43 = vor.u32 %v6258_v34, %v5109_v36  ;;  %v5128_v45 = vor.u32 %v6263_v38, %v5127_v37  ;;  %v7477_v11 = vand.u32 127, %v890_v10 }
  0x60   : > { %1066 = vmatpush.bf16.msra.mxu0 %v5132_v19  ;;  %1091 = vmatpush.bf16.msra.mxu2 %v5152_v26  ;;  %v6255_v42 = vld [vmem:[#allocation2 + $0x34] sm:$0xf]  ;;  %v5097_v44 = vld [vmem:[#allocation2 + $0x3c] sm:$0xf0]  ;;  %v5115_v46 = vld [vmem:[#allocation2 + $0x50] sm:$0xf]  ;;  %v5096_v48 = vor.u32 %v6256_v41, %v5095_v40 }
  0x61   : > { %1079 = vmatpush.bf16.msra.mxu1 %v5136_v22  ;;  %v6260_v47 = vld [vmem:[#allocation2 + $0x58] sm:$0xf0]  ;;  %s5067_s29 = sshll.u32 %s7465_s24, 3  ;;  %v5100_v49 = vor.u32 %v6255_v42, %v5097_v44  ;;  %v5083_v50 = vld [vmem:[#allocation2 + $0x18] sm:$0xf]  ;;  %s8157_s21 = sld [smem:[#allocation42_spill]] }
  0x62   : > { %v6253_v51 = vld [vmem:[#allocation2 + $0x20] sm:$0xf0]  ;;  %v6252_v52 = vld [vmem:[#allocation2 + $0x1c] sm:$0xf]  ;;  %v5116_v53 = vor.u32 %v6260_v47, %v5115_v46  ;;  %v5085_v54 = vld [vmem:[#allocation2 + $0x24] sm:$0xf0]  ;;  %s884_s26 = scalar_lea.vmem %s8156_s10, %s5067_s29 }
  0x63   : > { %v5103_v55 = vld [vmem:[#allocation2 + $0x38] sm:$0xf]  ;;  %v6257_v56 = vld [vmem:[#allocation2 + $0x40] sm:$0xf0]  ;;  %v5084_v57 = vor.u32 %v6253_v51, %v5083_v50  ;;  %v5088_v58 = vor.u32 %v6252_v52, %v5085_v54  ;;  %v5071_v59 = vld [vmem:[#allocation2] sm:$0xf] }
  0x64   : > { %1067 = vmatpush.bf16.msra.mxu0 %v5120_v30  ;;  %1092 = vmatpush.bf16.msra.mxu2 %v5140_v35  ;;  %v6250_v60 = vld [vmem:[#allocation2 + $0x8] sm:$0xf0]  ;;  %v6249_v61 = vld [vmem:[#allocation2 + $0x4] sm:$0xf]  ;;  %v5104_v62 = vor.u32 %v6257_v56, %v5103_v55  ;;  %v5073_v63 = vld [vmem:[#allocation2 + $0xc] sm:$0xf0] }
  0x65   : > { %1080 = vmatpush.bf16.msra.mxu1 %v5124_v31  ;;  %v5091_v0 = vld [vmem:[#allocation2 + $0x20] sm:$0xf]  ;;  %v6254_v1 = vld [vmem:[#allocation2 + $0x28] sm:$0xf0]  ;;  %v5072_v2 = vor.u32 %v6250_v60, %v5071_v59  ;;  %v5076_v4 = vor.u32 %v6249_v61, %v5073_v63  ;;  %v5079_v6 = vld [vmem:[#allocation2 + $0x8] sm:$0xf] }
  0x66   : > { %v7473_v3 = vld [vmem:[%s884_s26] sm:$0xff]  ;;  %v5092_v5 = vor.u32 %v6254_v1, %v5091_v0  ;;  %v6251_v7 = vld [vmem:[#allocation2 + $0x10] sm:$0xf0]  ;;  %vm1230_vm0 = vcmp.ge.s32.totalorder %v7477_v11, 16  ;;  %vm1231_vm1 = vcmp.lt.s32.totalorder %v7477_v11, 24  ;;  %vm1156_vm2 = vcmp.ge.s32.totalorder %v7477_v11, 8 }
  0x67   : > { %v928_v8 = vpack.c.bf16 %v7473_v3, %v7473_v3  ;;  %v5080_v9 = vor.u32 %v6251_v7, %v5079_v6  ;;  %v927_v12 = vld [vmem:[%s8157_s21] sm:$0x7]  ;;  %vm1157_vm3 = vcmp.lt.s32.totalorder %v7477_v11, 16  ;;  %vm1121_vm4 = vcmp.lt.s32.totalorder %v7477_v11, 8  ;;  %vm7487_vm5 = vmand %vm1230_vm0, %vm1231_vm1  ;;  %s8172_s7 = sld [smem:[#allocation39_spill]]  ;;  %v7969_v18 = vld [vmem:[%s8106_s20 + $0x10] sm:$0xff] }
  0x68   : > { %1068 = vmatpush.bf16.msra.mxu0 %v5108_v39  ;;  %1093 = vmatpush.bf16.msra.mxu2 %v5128_v45  ;;  %v931_v13 = vperm.slane %v927_v12, 1  ;;  %v930_v16 = vperm.slane %v927_v12, 0  ;;  %vm7491_vm6 = vmand %vm1156_vm2, %vm1157_vm3  ;;  %v932_v26 = vperm.slane %v927_v12, 2  ;;  %vm1194_vm10 = vcmask 1043456   ;;  %s8173_s14 = sld [smem:[#allocation36_spill]]  ;;  %s6246_s1 = sshll.u32 %s7326_s5, 3 }
  0x69   : > { %1081 = vmatpush.bf16.msra.mxu1 %v5112_v43  ;;  %vm7498_vm7 = vmpackc.low %vm1121_vm4, %vm1121_vm4  ;;  %vm1285_vm11 = vcmp.ge.s32.totalorder %v7477_v11, 24  ;;  %vm1286_vm12 = vcmp.lt.s32.totalorder %v7477_v11, 32  ;;  %vm1143_vm15 = vcmask 64512   ;;  %s8174_s22 = sld [smem:[#allocation37_spill]]  ;;  %v6088_v20 = vld [vmem:[#allocation13 + $0xe8] sm:$0xf0] }
  0x6a   : > { %vm7505_vm8 = vmpackc.low %vm7487_vm5, %vm7487_vm5  ;;  %v6080_v23 = vld [vmem:[#allocation13 + $0xd8] sm:$0xf0]  ;;  %v3976_v35 = vperm.slane %v7969_v18, 0  ;;  %s8175_s12 = sld [smem:[#allocation46_spill]] }
  0x6b   : > { %vm7512_vm9 = vmpackc.low %vm7491_vm6, %vm7491_vm6  ;;  %s8176_s6 = sld [smem:[#allocation28_spill]] }
  0x6c   : > { %1069 = vmatpush.bf16.msra.mxu0 %v5096_v48  ;;  %1094 = vmatpush.bf16.msra.mxu2 %v5116_v53  ;;  %vm7533_vm13 = vmand %vm1285_vm11, %vm1286_vm12  ;;  %s8179_s28 = sld [smem:[#allocation47_spill]] }
  0x6d   : > { %1082 = vmatpush.bf16.msra.mxu1 %v5100_v49  ;;  %vm7540_vm14 = vmpackc.low %vm7533_vm13, %vm7533_vm13 }
  0x6e   : > { %s888_s25 = scalar_lea.vmem %s8173_s14, %s5067_s29  ;;  %s8177_s29 = sld [smem:[#allocation48_spill]] }
  0x70   : > { %1070 = vmatpush.bf16.msra.mxu0 %v5084_v57  ;;  %1095 = vmatpush.bf16.msra.mxu2 %v5104_v62  ;;  %v6508_v11 = vld [vmem:[%s8175_s12 + $0x18] sm:$0xff] }
  0x71   : > { %1083 = vmatpush.bf16.msra.mxu1 %v5088_v58  ;;  %s878_s30 = sand.u32 1, %s8176_s6  }
  0x72   : > { %s5066_s14 = sshll.u32 %s878_s30, 3  ;;  %s4858_s6 = scalar_lea.sflag [#allocation4], %s878_s30 }
  0x73   : > { %s880_s4 = scalar_lea.vmem [#allocation19], %s5066_s14 }
  0x74   : > { %1071 = vmatpush.bf16.msra.mxu0 %v5072_v2  ;;  %1096 = vmatpush.bf16.msra.mxu2 %v5092_v5  ;;  %s4868_s0 = scalar_lea.hbm %s8177_s29, %s6246_s1  ;;  %s4870_s23 = sshll.u32 %s880_s4, 4  ;;  %s4871_s23 = int_to_ptr.vmem [resolvable:$true] %s4870_s23 }
  0x75   : > { %1084 = vmatpush.bf16.msra.mxu1 %v5076_v4  ;;  %s4872_s27 = sshll.u32 %s4868_s0, 4  ;;  %s7101_s24 = scalar_lea.hbm %s8177_s29, 16  ;;  %s4873_s27 = int_to_ptr.hbm [resolvable:$true] %s4872_s27 }
  0x76   : > { %s7095_s5 = sshra.s32 %s4873_s27, 4  ;;  %s7096_s5 = int_to_ptr.hbm [resolvable:$true] %s7095_s5 }
  0x77   : > { %1072 = vmatmul.bf16.vlgmr.msra.gmra.mxu0 %v928_v8  ;;  %s7097_s2 = scalar_lea.hbm %s7096_s5, 8  ;;  %p7102_p3 = scmp.lt.s32.totalorder %s7096_s5, %s8177_s29 }
  0x78   : > { %1085 = vmatmul.bf16.vlgmr.msra.gmra.mxu1 %v928_v8  ;;  %1097 = vmatpush.bf16.msra.mxu2 %v5080_v9  ;;  %p7098_p0 = scmp.ne.s32.totalorder %s7096_s5, %s7097_s2  ;;  %p7103_p4 = scmp.lt.s32.totalorder %s7101_s24, %s7097_s2 }
  0x7a   : > { %p7099_p1 = pnand %p7098_p0, %p7343_p5  ;;  %p7104_p7 = por %p7103_p4, %p7102_p3 }
  0x7b   : > { %1098 = vmatmul.bf16.vlgmr.msra.gmra.mxu2 %v928_v8 }
  0x7c   : > { %p7100_p2 = pneg %p7099_p1 }
  0x7e   : > { %p7105_p8 = pnand %p7104_p7, %p7100_p2 }
  0xf4   : > { %v1073_v14 = vpop.f32.mrf.mxu0 }
  0xf5   : > { %v1086_v17 = vpop.f32.mrf.mxu1  ;;  %v1074_v24 = vadd.f32 %v1073_v14, %v930_v16 }
  0xf6   : > { %v1087_v19 = vadd.f32 %v1086_v17, %v931_v13 }
  0xf7   : > { %v7522_v27 = vpack.c.bf16 %v1074_v24, %v1074_v24 }
  0xf8   : > { %v5166_v22 = vpack.c.bf16 %v1087_v19, %v1087_v19 }
  0xfa   : > { %5167 = vmatpush.bf16.xpose.msk.msra.mxu3 %vm7498_vm7, %v5166_v22  ;;  %5175 = vmatpush.bf16.xpose.msk.msrb.mxu1 %vm7505_vm8, %v5166_v22 }
  0xfc   : > { %v1075_v25 = vpop.f32.mrf.mxu0 }
  0xfd   : > { %v1088_v28 = vpop.f32.mrf.mxu1 }
  0xfe   : > { %v1099_v29 = vpop.f32.mrf.mxu2 }
  0xff   : > { %v1100_v30 = vadd.f32 %v1099_v29, %v932_v26 }
 0x101   : > { %1137 = vmatmul.bf16.vlgmr.msra.gmra.mxu3 %v7522_v27  ;;  %1247 = vmatmul.bf16.vlgmr.msrb.gmra.mxu1 %v7522_v27  ;;  %v1163_v31 = vsel %vm7491_vm6, %v1100_v30, 0.0  ;;  %v1127_v60 = vsel %vm1121_vm4, %v1100_v30, 0.0  ;;  %v1237_v62 = vsel %vm7487_vm5, %v1100_v30, 0.0  ;;  %v1292_v63 = vsel %vm7533_vm13, %v1100_v30, 0.0 }
 0x102   : > { %5170 = vmatpush.bf16.xpose.msk.msrb.mxu3 %vm7512_vm9, %v5166_v22  ;;  %v1164_v32 = vpack.c.bf16 %v1163_v31, %v1163_v31  ;;  %v1128_v61 = vpack.c.bf16 %v1127_v60, %v1127_v60  ;;  %v1238_v0 = vpack.c.bf16 %v1237_v62, %v1237_v62  ;;  %v1293_v1 = vpack.c.bf16 %v1292_v63, %v1292_v63  ;;  %v7596_v63 = vld [vmem:[%s8095_s9] sm:$0x3f] }
 0x104   : > { %v1196_v33 = vsel %vm1194_vm10, %v1164_v32, 0  ;;  %v1215_v2 = vsel %vm1194_vm10, %v1128_v61, 0  ;;  %v1269_v4 = vsel %vm1194_vm10, %v1238_v0, 0  ;;  %v1324_v5 = vsel %vm1194_vm10, %v1293_v1, 0 }
 0x105   : > { %1224 = vmatpush.bf16.msrb.mxu0 %v1215_v2  ;;  %1278 = vmatpush.bf16.msrb.mxu2 %v1269_v4  ;;  %v1341_v0 = vperm.slane %v7596_v63, 0 }
 0x106   : > { %v1101_v34 = vpop.f32.mrf.mxu2 }
 0x109   : > { %1333 = vmatpush.bf16.msra.mxu0 %v1324_v5 }
 0x10a   : > { %1205 = vmatpush.bf16.msra.mxu3 %v1196_v33 }
 0x111   : > { %1173 = vmatmul.bf16.vlgmr.msrb.gmra.mxu3 %v7522_v27 }
 0x112   : > { %5179 = vmatpush.bf16.xpose.msk.msrb.mxu3 %vm7540_vm14, %v5166_v22 }
 0x17e   : > { %v1248_v37 = vpop.f32.mrf.mxu1 }
 0x17f   : > { %v1252_v42 = vmul.f32 0.35355338, %v1248_v37 }
 0x181   : > { %v1253_v44 = vsel %vm1143_vm15, %v1252_v42, -inf }
 0x184   : > { %v1138_v38 = vpop.f32.mrf.mxu3 }
 0x185   : > { %v1142_v39 = vmul.f32 0.35355338, %v1138_v38 }
 0x186   : > { %v1250_v40 = vpop.f32.mrf.mxu1 }
 0x187   : > { %v1144_v41 = vsel %vm1143_vm15, %v1142_v39, -inf }
 0x188   : > { %1145 = vmax.xlane.f32.xlu1 %v1144_v41 }
 0x18c   : > { %v1140_v43 = vpop.f32.mrf.mxu3 }
 0x18d   : > { %v6280_v43 = vld [vmem:[%s8172_s7 + $0x38] sm:$0xff] }
 0x18e   : > { %1390 = vmatpush.bf16.msra.mxu1 %v6280_v43 }
 0x190   : > { %1254 = vmax.xlane.f32.xlu1 %v1253_v44  ;;  %v6279_v44 = vld [vmem:[%s8172_s7 + $0x30] sm:$0xff] }
 0x192   : > { %1391 = vmatpush.bf16.msra.mxu1 %v6279_v44  ;;  %v1429_v44 = vperm.slane %v7596_v63, 3 }
 0x194   : > { %v1174_v45 = vpop.f32.mrf.mxu3 }
 0x195   : > { %v1178_v46 = vmul.f32 0.35355338, %v1174_v45  ;;  %v6278_v45 = vld [vmem:[%s8172_s7 + $0x28] sm:$0xff] }
 0x196   : > { %1392 = vmatpush.bf16.msra.mxu1 %v6278_v45 }
 0x197   : > { %v1179_v47 = vsel %vm1143_vm15, %v1178_v46, -inf }
 0x198   : > { %1180 = vmax.xlane.f32.xlu0 %v1179_v47  ;;  %v6277_v47 = vld [vmem:[%s8172_s7 + $0x20] sm:$0xff] }
 0x19a   : > { %1393 = vmatpush.bf16.msra.mxu1 %v6277_v47 }
 0x19c   : > { %v1176_v48 = vpop.f32.mrf.mxu3 }
 0x1fb   : > { %v1146_v49 = vpop.xlane.xlu1 %1145 }
 0x1fc   : > { %v1147_v22 = vsub.f32 %v1142_v39, %v1146_v49  ;;  %v6276_v49 = vld [vmem:[%s8172_s7 + $0x18] sm:$0xff] }
 0x1fd   : > { %1394 = vmatpush.bf16.msra.mxu1 %v6276_v49  ;;  %v6289_v49 = vld [vmem:[#allocation7] sm:$0xff] }
 0x1fe   : > { %v1148_v24 = vmul.f32 1.442695, %v1147_v22  ;;  %v6281_v22 = vld [vmem:[#allocation5] sm:$0xff] }
 0x203   : > { %v1255_v50 = vpop.xlane.xlu1 %1254 }
 0x204   : > { %v1256_v53 = vsub.f32 %v1252_v42, %v1255_v50 }
 0x206   : > { %v1257_v55 = vmul.f32 1.442695, %v1256_v53  ;;  %v6274_v53 = vld [vmem:[%s8172_s7 + $0x8] sm:$0xff] }
 0x20b   : > { %v1181_v51 = vpop.xlane.xlu0 %1180 }
 0x20c   : > { %v1182_v52 = vsub.f32 %v1178_v46, %v1181_v51 }
 0x20e   : > { %v1183_v54 = vmul.f32 1.442695, %v1182_v52  ;;  %v6275_v52 = vld [vmem:[%s8172_s7 + $0x10] sm:$0xff] }
 0x20f   : > { %1395 = vmatpush.bf16.msra.mxu1 %v6275_v52 }
 0x210   : > { %6664 = vpow2.f32 %v1183_v54 }
 0x211   : > { %6666 = vpow2.f32 %v1257_v55 }
 0x213   : > { %1396 = vmatpush.bf16.msra.mxu1 %v6274_v53 }
 0x216   : > { %v6665_v56 = vpop.eup %6664 }
 0x217   : > { %v1185_v57 = vsel %vm1143_vm15, %v6665_v56, 0.0  ;;  %v6667_v58 = vpop.eup %6666 }
 0x218   : > { %1186 = vadd.xlane.f32.xlu0 %v1185_v57  ;;  %v1259_v59 = vsel %vm1143_vm15, %v6667_v58, 0.0 }
 0x220   : > { %1260 = vadd.xlane.f32.xlu0 %v1259_v59 }
 0x28b   : > { %v1187_v6 = vpop.xlane.xlu0 %1186 }
 0x28c   : > { %6668 = vrcp.f32 %v1187_v6  ;;  %v6288_v6 = vld [vmem:[#allocation5 + $0x38] sm:$0xff] }
 0x28d   : > { %1516 = vmatpush.bf16.msra.mxu2 %v6288_v6 }
 0x292   : > { %v6669_v7 = vpop.eup %6668 }
 0x293   : > { %v1189_v8 = vmul.f32 %v6669_v7, %v6665_v56  ;;  %v1261_v9 = vpop.xlane.xlu0 %1260  ;;  %v6273_v56 = vld [vmem:[%s8172_s7] sm:$0xff] }
 0x294   : > { %6670 = vrcp.f32 %v1261_v9  ;;  %1397 = vmatpush.bf16.msra.mxu1 %v6273_v56  ;;  %v1531_v56 = vperm.slane %v7596_v63, 1 }
 0x295   : > { %v1190_v10 = vpack.c.bf16 %v1189_v8, %v1189_v8  ;;  %6672 = vpow2.f32 %v1148_v24  ;;  %v6296_v24 = vld [vmem:[#allocation7 + $0x38] sm:$0xff] }
 0x297   : > { %5171 = vmatmul.msk.bf16.vlgmr.msra.gmra.mxu3 %vm1143_vm15, %v1190_v10 }
 0x298   : > { %1580 = vmatpush.bf16.msra.mxu3 %v6296_v24  ;;  %v6317_v24 = vld [vmem:[#allocation2 + $0x160] sm:$0xf0] }
 0x29a   : > { %v6671_v12 = vpop.eup %6670 }
 0x29b   : > { %v1263_v13 = vmul.f32 %v6671_v12, %v6667_v58  ;;  %v6673_v30 = vpop.eup %6672 }
 0x29c   : > { %v1150_v32 = vsel %vm1143_vm15, %v6673_v30, 0.0 }
 0x29d   : > { %v1264_v14 = vpack.c.bf16 %v1263_v13, %v1263_v13  ;;  %v6287_v13 = vld [vmem:[#allocation5 + $0x30] sm:$0xff] }
 0x29e   : > { %1517 = vmatpush.bf16.msra.mxu2 %v6287_v13 }
 0x29f   : > { %5176 = vmatmul.msk.bf16.vlgmr.msrb.gmra.mxu2 %vm1143_vm15, %v1264_v14  ;;  %v6286_v14 = vld [vmem:[#allocation5 + $0x28] sm:$0xff] }
 0x2a2   : > { %1518 = vmatpush.bf16.msra.mxu2 %v6286_v14  ;;  %v5353_v14 = vld [vmem:[#allocation2 + $0x150] sm:$0xf] }
 0x2a7   : > { %1302 = vmatmul.bf16.vlgmr.msrb.gmra.mxu3 %v7522_v27 }
 0x31a   : > { %v1207_v16 = vpop.f32.mrf.mxu3 }
 0x322   : > { %v1209_v17 = vpop.f32.mrf.mxu3  ;;  %v1280_v19 = vpop.f32.mrf.mxu2 }
 0x323   : > { %v6284_v17 = vld [vmem:[#allocation5 + $0x18] sm:$0xff] }
 0x32a   : > { %v1282_v25 = vpop.f32.mrf.mxu2  ;;  %v1303_v26 = vpop.f32.mrf.mxu3 }
 0x32b   : > { %v1307_v28 = vmul.f32 0.35355338, %v1303_v26 }
 0x32d   : > { %v1308_v29 = vsel %vm1143_vm15, %v1307_v28, -inf }
 0x32e   : > { %1309 = vmax.xlane.f32.xlu2 %v1308_v29 }
 0x332   : > { %v1305_v31 = vpop.f32.mrf.mxu3 }
 0x333   : > { %v6293_v31 = vld [vmem:[#allocation7 + $0x20] sm:$0xff] }
 0x336   : > { %1151 = vadd.xlane.f32.xlu2 %v1150_v32 }
 0x3a1   : > { %v1310_v33 = vpop.xlane.xlu2 %1309 }
 0x3a2   : > { %v1311_v34 = vsub.f32 %v1307_v28, %v1310_v33  ;;  %v6295_v28 = vld [vmem:[#allocation7 + $0x30] sm:$0xff] }
 0x3a3   : > { %1581 = vmatpush.bf16.msra.mxu3 %v6295_v28  ;;  %v5341_v28 = vld [vmem:[#allocation2 + $0x138] sm:$0xf] }
 0x3a4   : > { %v1312_v27 = vmul.f32 1.442695, %v1311_v34  ;;  %v6292_v34 = vld [vmem:[#allocation7 + $0x18] sm:$0xff] }
 0x3a6   : > { %6674 = vpow2.f32 %v1312_v27 }
 0x3a9   : > { %v1152_v37 = vpop.xlane.xlu2 %1151 }
 0x3aa   : > { %6676 = vrcp.f32 %v1152_v37 }
 0x3ac   : > { %v6675_v38 = vpop.eup %6674 }
 0x3ad   : > { %v1314_v39 = vsel %vm1143_vm15, %v6675_v38, 0.0 }
 0x3ae   : > { %1315 = vadd.xlane.f32.xlu1 %v1314_v39 }
 0x3b0   : > { %v6677_v40 = vpop.eup %6676 }
 0x3b1   : > { %v1154_v41 = vmul.f32 %v6677_v40, %v6673_v30  ;;  %v6294_v30 = vld [vmem:[#allocation7 + $0x28] sm:$0xff] }
 0x3b2   : > { %1582 = vmatpush.bf16.msra.mxu3 %v6294_v30  ;;  %v6312_v30 = vld [vmem:[#allocation2 + $0x13c] sm:$0xf] }
 0x3b3   : > { %v1155_v42 = vpack.c.bf16 %v1154_v41, %v1154_v41  ;;  %v1427_v41 = vperm.slane %v7596_v63, 2 }
 0x3b5   : > { %5172 = vmatmul.msk.bf16.vlgmr.msrb.gmra.mxu0 %vm1143_vm15, %v1155_v42 }
 0x3b6   : > { %1583 = vmatpush.bf16.msra.mxu3 %v6293_v31 }
 0x3ba   : > { %1584 = vmatpush.bf16.msra.mxu3 %v6292_v34  ;;  %v6314_v34 = vld [vmem:[#allocation2 + $0x148] sm:$0xf0] }
 0x421   : > { %v1316_v46 = vpop.xlane.xlu1 %1315 }
 0x422   : > { %6678 = vrcp.f32 %v1316_v46 }
 0x428   : > { %v6679_v48 = vpop.eup %6678 }
 0x429   : > { %v1318_v50 = vmul.f32 %v6679_v48, %v6675_v38  ;;  %v6291_v38 = vld [vmem:[#allocation7 + $0x10] sm:$0xff]  ;;  %v6290_v48 = vld [vmem:[#allocation7 + $0x8] sm:$0xff] }
 0x42a   : > { %1585 = vmatpush.bf16.msra.mxu3 %v6291_v38  ;;  %v5329_v38 = vld [vmem:[#allocation2 + $0x120] sm:$0xf] }
 0x42b   : > { %v1319_v51 = vpack.c.bf16 %v1318_v50, %v1318_v50  ;;  %v6659_v50 = vld [vmem:[%s8094_s8] ss:$0 sm:$0xff] }
 0x42d   : > { %5180 = vmatmul.msk.bf16.vlgmr.msra.gmra.mxu0 %vm1143_vm15, %v1319_v51 }
 0x42e   : > { %1586 = vmatpush.bf16.msra.mxu3 %v6290_v48  ;;  %v6307_v48 = vld [vmem:[#allocation2 + $0x110] sm:$0xf0] }
 0x432   : > { %v1226_v54 = vpop.f32.mrf.mxu0  ;;  %1587 = vmatpush.bf16.msra.mxu3 %v6289_v49  ;;  %v6306_v49 = vld [vmem:[#allocation2 + $0x10c] sm:$0xf] }
 0x433   : > { %v1227_v57 = vadd.f32 %v1226_v54, %v1207_v16  ;;  %v6285_v16 = vld [vmem:[#allocation5 + $0x20] sm:$0xff] }
 0x434   : > { %1519 = vmatpush.bf16.msra.mxu2 %v6285_v16  ;;  %v6316_v16 = vld [vmem:[#allocation2 + $0x158] sm:$0xf0] }
 0x435   : > { %v1284_v58 = vadd.f32 %v1280_v19, %v1227_v57  ;;  %v6282_v19 = vld [vmem:[#allocation5 + $0x8] sm:$0xff] }
 0x438   : > { %1520 = vmatpush.bf16.msra.mxu2 %v6284_v17  ;;  %v6315_v17 = vld [vmem:[#allocation2 + $0x154] sm:$0xf] }
 0x43a   : > { %v1228_v55 = vpop.f32.mrf.mxu0 }
 0x4aa   : > { %v1335_v59 = vpop.f32.mrf.mxu0 }
 0x4ab   : > { %v1339_v60 = vadd.f32 %v1335_v59, %v1284_v58 }
 0x4ad   : > { %v1340_v61 = vpack.c.bf16 %v1339_v60, %v1339_v60 }
 0x4af   : > { %1398 = vmatmul.bf16.vlgmr.msra.gmra.mxu1 %v1340_v61  ;;  %v5365_v61 = vld [vmem:[#allocation2 + $0x168] sm:$0xf] }
 0x4b2   : > { %v1337_v62 = vpop.f32.mrf.mxu0 }
 0x4b3   : > { %v6319_v62 = vld [vmem:[#allocation2 + $0x170] sm:$0xf0] }
 0x52c   : > { %v1399_v1 = vpop.f32.mrf.mxu1 }
 0x52d   : > { %v1400_v2 = vadd.f32 %v1399_v1, %v1341_v0  ;;  %v6318_v0 = vld [vmem:[#allocation2 + $0x16c] sm:$0xf]  ;;  %v5366_v1 = vor.u32 %v6319_v62, %v5365_v61  ;;  %v5313_v61 = vld [vmem:[#allocation2 + $0xf8] sm:$0xf]  ;;  %v6305_v62 = vld [vmem:[#allocation2 + $0x100] sm:$0xf0] }
 0x52f   : > { %v1403_v4 = vadd.f32 %v1400_v2, %v7473_v3  ;;  %v6283_v3 = vld [vmem:[#allocation5 + $0x10] sm:$0xff]  ;;  %v5367_v2 = vld [vmem:[#allocation2 + $0x174] sm:$0xf0]  ;;  %1792 = vmatpush.bf16.msrb.mxu0 %v5366_v1  ;;  %v5314_v1 = vor.u32 %v6305_v62, %v5313_v61 }
 0x530   : > { %1521 = vmatpush.bf16.msra.mxu2 %v6283_v3  ;;  %v5370_v6 = vor.u32 %v6318_v0, %v5367_v2  ;;  %v5354_v3 = vor.u32 %v6316_v16, %v5353_v14  ;;  %v5293_v2 = vld [vmem:[#allocation2 + $0xd8] sm:$0xf]  ;;  %v5281_v14 = vld [vmem:[#allocation2 + $0xc0] sm:$0xf]  ;;  %v6298_v16 = vld [vmem:[#allocation2 + $0xc8] sm:$0xf0] }
 0x531   : > { %1404 = vadd.xlane.f32.xlu2 %v1403_v4 }
 0x532   : > { %1805 = vmatpush.bf16.msrb.mxu1 %v5370_v6 }
 0x533   : > { %1793 = vmatpush.bf16.msrb.mxu0 %v5354_v3  ;;  %v5282_v3 = vor.u32 %v6298_v16, %v5281_v14 }
 0x534   : > { %v1401_v5 = vpop.f32.mrf.mxu1  ;;  %1522 = vmatpush.bf16.msra.mxu2 %v6282_v19  ;;  %v5355_v19 = vld [vmem:[#allocation2 + $0x15c] sm:$0xf0] }
 0x535   : > { %v6320_v5 = vld [vmem:[#allocation2 + $0x178] sm:$0xf0] }
 0x538   : > { %1523 = vmatpush.bf16.msra.mxu2 %v6281_v22  ;;  %v5361_v22 = vld [vmem:[#allocation2 + $0x158] sm:$0xf] }
 0x5a4   : > { %v1405_v7 = vpop.xlane.xlu2 %1404 }
 0x5a5   : > { %v1406_v8 = vmul.f32 0.03125, %v1405_v7 }
 0x5a7   : > { %v1407_v9 = vsub.f32 %v1403_v4, %v1406_v8  ;;  %v5373_v4 = vld [vmem:[#allocation2 + $0x170] sm:$0xf] }
 0x5a8   : > { %v5374_v7 = vor.u32 %v6320_v5, %v5373_v4  ;;  %v6301_v4 = vld [vmem:[#allocation2 + $0xe0] sm:$0xf0]  ;;  %v6300_v5 = vld [vmem:[#allocation2 + $0xdc] sm:$0xf] }
 0x5a9   : > { %v1410_v10 = vsel %vm1286_vm12, %v1407_v9, 0.0  ;;  %v5294_v6 = vor.u32 %v6301_v4, %v5293_v2 }
 0x5aa   : > { %v1411_v12 = vmul.f32 %v1410_v10, %v1410_v10  ;;  %1818 = vmatpush.bf16.msrb.mxu2 %v5374_v7  ;;  %v5295_v7 = vld [vmem:[#allocation2 + $0xe4] sm:$0xf0] }
 0x5ac   : > { %1412 = vadd.xlane.f32.xlu0 %v1411_v12 }
 0x61f   : > { %v1413_v25 = vpop.xlane.xlu0 %1412 }
 0x620   : > { %v1414_v26 = vmul.f32 0.03125, %v1413_v25  ;;  %v5358_v25 = vor.u32 %v6315_v17, %v5355_v19  ;;  %v6297_v17 = vld [vmem:[#allocation2 + $0xc4] sm:$0xf]  ;;  %v5283_v19 = vld [vmem:[#allocation2 + $0xcc] sm:$0xf0] }
 0x622   : > { %v1415_v29 = vadd.f32 1e-05, %v1414_v26  ;;  %v5362_v26 = vor.u32 %v6317_v24, %v5361_v22  ;;  %1806 = vmatpush.bf16.msrb.mxu1 %v5358_v25  ;;  %v5289_v22 = vld [vmem:[#allocation2 + $0xc8] sm:$0xf]  ;;  %v6299_v24 = vld [vmem:[#allocation2 + $0xd0] sm:$0xf0]  ;;  %v5286_v25 = vor.u32 %v6297_v17, %v5283_v19 }
 0x624   : > { %6680 = vrsqrt.f32 %v1415_v29  ;;  %vm1422_vm1 = vweird.f32 %v1415_v29  ;;  %1819 = vmatpush.bf16.msrb.mxu2 %v5362_v26  ;;  %v5290_v26 = vor.u32 %v6299_v24, %v5289_v22 }
 0x62a   : > { %v6681_v32 = vpop.eup %6680 }
 0x62b   : > { %v1417_v33 = vmul.f32 %v6681_v32, %v1415_v29  ;;  %vm1423_vm0 = vweird.f32 %v6681_v32  ;;  %v6313_v29 = vld [vmem:[#allocation2 + $0x140] sm:$0xf0] }
 0x62c   : > { %vm1424_vm2 = vmor %vm1422_vm1, %vm1423_vm0  ;;  %v5342_v31 = vor.u32 %v6313_v29, %v5341_v28 }
 0x62d   : > { %v1418_v27 = vmul.f32 %v6681_v32, %v1417_v33  ;;  %v5349_v33 = vld [vmem:[#allocation2 + $0x140] sm:$0xf] }
 0x62e   : > { %1794 = vmatpush.bf16.msrb.mxu0 %v5342_v31 }
 0x62f   : > { %v1419_v37 = vmul.f32 0.5, %v1418_v27 }
 0x631   : > { %v1420_v39 = vsub.f32 1.5, %v1419_v37  ;;  %v5350_v37 = vor.u32 %v6314_v34, %v5349_v33 }
 0x633   : > { %v1421_v40 = vmul.f32 %v6681_v32, %v1420_v39  ;;  %1820 = vmatpush.bf16.msrb.mxu2 %v5350_v37  ;;  %v6310_v39 = vld [vmem:[#allocation2 + $0x128] sm:$0xf0] }
 0x635   : > { %v1425_v42 = vsel %vm1424_vm2, %v6681_v32, %v1421_v40  ;;  %v5343_v32 = vld [vmem:[#allocation2 + $0x144] sm:$0xf0]  ;;  %v6309_v40 = vld [vmem:[#allocation2 + $0x124] sm:$0xf] }
 0x636   : > { %v1426_v43 = vmul.f32 %v1425_v42, %v1407_v9  ;;  %v5346_v27 = vor.u32 %v6312_v30, %v5343_v32  ;;  %v5331_v42 = vld [vmem:[#allocation2 + $0x12c] sm:$0xf0] }
 0x638   : > { %v1428_v45 = vmul.f32 %v1427_v41, %v1426_v43  ;;  %1807 = vmatpush.bf16.msrb.mxu1 %v5346_v27  ;;  %v5330_v41 = vor.u32 %v6310_v39, %v5329_v38  ;;  %v5337_v43 = vld [vmem:[#allocation2 + $0x128] sm:$0xf]  ;;  %v1615_v38 = vperm.slane %v7596_v63, 4 }
 0x63a   : > { %v1430_v46 = vadd.f32 %v1429_v44, %v1428_v45  ;;  %v6311_v44 = vld [vmem:[#allocation2 + $0x130] sm:$0xf0]  ;;  %v5334_v45 = vor.u32 %v6309_v40, %v5331_v42  ;;  %1795 = vmatpush.bf16.msrb.mxu0 %v5330_v41  ;;  %v1617_v41 = vperm.slane %v7596_v63, 5 }
 0x63c   : > { %v1464_v47 = vpack.c.bf16 %v1430_v46, %v1430_v46  ;;  %1808 = vmatpush.bf16.msrb.mxu1 %v5334_v45  ;;  %v5278_v45 = vld [vmem:[%s8157_s21 + $0x3] sm:$0x7] }
 0x63d   : > { %v1660_v63 = vperm.slane %v5278_v45, 2 }
 0x63e   : > { %1524 = vmatmul.bf16.vlgmr.msra.gmra.mxu2 %v1464_v47  ;;  %v5317_v47 = vld [vmem:[#allocation2 + $0x108] sm:$0xf] }
 0x6c1   : > { %v1525_v51 = vpop.f32.mrf.mxu2 }
 0x6c2   : > { %v1526_v52 = vadd.f32 %v6659_v50, %v1525_v51  ;;  %v5318_v50 = vor.u32 %v6307_v48, %v5317_v47  ;;  %v5319_v51 = vld [vmem:[#allocation2 + $0x114] sm:$0xf0] }
 0x6c4   : > { %v1529_v53 = vmax.f32 %v1526_v52, 0.0  ;;  %v5325_v52 = vld [vmem:[#allocation2 + $0x110] sm:$0xf]  ;;  %1796 = vmatpush.bf16.msrb.mxu0 %v5318_v50 }
 0x6c6   : > { %v1530_v54 = vpack.c.bf16 %v1529_v53, %v1529_v53  ;;  %v6308_v53 = vld [vmem:[#allocation2 + $0x118] sm:$0xf0] }
 0x6c8   : > { %1588 = vmatmul.bf16.vlgmr.msra.gmra.mxu3 %v1530_v54  ;;  %v5322_v54 = vor.u32 %v6306_v49, %v5319_v51  ;;  %v1658_v49 = vperm.slane %v5278_v45, 0 }
 0x6c9   : > { %v1527_v55 = vpop.f32.mrf.mxu2 }
 0x6ca   : > { %v5326_v55 = vor.u32 %v6308_v53, %v5325_v52  ;;  %1809 = vmatpush.bf16.msrb.mxu1 %v5322_v54 }
 0x74b   : > { %v1589_v57 = vpop.f32.mrf.mxu3 }
 0x74c   : > { %v1590_v58 = vadd.f32 %v1589_v57, %v1531_v56  ;;  %v5305_v56 = vld [vmem:[#allocation2 + $0xf0] sm:$0xf]  ;;  %v6304_v57 = vld [vmem:[#allocation2 + $0xf8] sm:$0xf0] }
 0x74e   : > { %v1593_v59 = vadd.f32 %v1590_v58, %v1430_v46  ;;  %v5338_v46 = vor.u32 %v6311_v44, %v5337_v43  ;;  %v6303_v58 = vld [vmem:[#allocation2 + $0xf4] sm:$0xf] }
 0x750   : > { %1594 = vadd.xlane.f32.xlu1 %v1593_v59  ;;  %1821 = vmatpush.bf16.msrb.mxu2 %v5338_v46  ;;  %v1659_v46 = vperm.slane %v5278_v45, 1 }
 0x753   : > { %v1591_v60 = vpop.f32.mrf.mxu3 }
 0x754   : > { %1822 = vmatpush.bf16.msrb.mxu2 %v5326_v55  ;;  %v5307_v60 = vld [vmem:[#allocation2 + $0xfc] sm:$0xf0] }
 0x755   : > { %v5310_v0 = vor.u32 %v6303_v58, %v5307_v60 }
 0x757   : > { %1810 = vmatpush.bf16.msrb.mxu1 %v5310_v0 }
 0x758   : > { %1823 = vmatpush.bf16.msrb.mxu2 %v5314_v1 }
 0x7c3   : > { %v1595_v8 = vpop.xlane.xlu1 %1594 }
 0x7c4   : > { %v1596_v9 = vmul.f32 0.03125, %v1595_v8  ;;  %v5301_v8 = vld [vmem:[#allocation2 + $0xe0] sm:$0xf] }
 0x7c6   : > { %v7608_v10 = vsub.f32 %v1593_v59, %v1596_v9  ;;  %v5306_v59 = vor.u32 %v6304_v57, %v5305_v56  ;;  %v6302_v9 = vld [vmem:[#allocation2 + $0xe8] sm:$0xf0] }
 0x7c8   : > { %v1598_v12 = vsel %vm1286_vm12, %v7608_v10, 0.0  ;;  %1797 = vmatpush.bf16.msrb.mxu0 %v5306_v59 }
 0x7c9   : > { %v1599_v13 = vmul.f32 %v1598_v12, %v1598_v12  ;;  %v5298_v12 = vor.u32 %v6300_v5, %v5295_v7 }
 0x7cb   : > { %1600 = vadd.xlane.f32.xlu2 %v1599_v13  ;;  %v5302_v13 = vor.u32 %v6302_v9, %v5301_v8  ;;  %1811 = vmatpush.bf16.msrb.mxu1 %v5298_v12 }
 0x7cc   : > { %1798 = vmatpush.bf16.msrb.mxu0 %v5294_v6 }
 0x7cd   : > { %1824 = vmatpush.bf16.msrb.mxu2 %v5302_v13 }
 0x7cf   : > { %1812 = vmatpush.bf16.msrb.mxu1 %v5286_v25 }
 0x7d0   : > { %1799 = vmatpush.bf16.msrb.mxu0 %v5282_v3 }
 0x7d1   : > { %1825 = vmatpush.bf16.msrb.mxu2 %v5290_v26 }
 0x83e   : > { %v1601_v28 = vpop.xlane.xlu2 %1600 }
 0x83f   : > { %v1602_v29 = vmul.f32 0.03125, %v1601_v28 }
 0x841   : > { %v1603_v30 = vadd.f32 1e-05, %v1602_v29 }
 0x843   : > { %6682 = vrsqrt.f32 %v1603_v30  ;;  %vm1610_vm11 = vweird.f32 %v1603_v30 }
 0x849   : > { %v6683_v31 = vpop.eup %6682 }
 0x84a   : > { %v1605_v32 = vmul.f32 %v6683_v31, %v1603_v30  ;;  %vm1611_vm3 = vweird.f32 %v6683_v31 }
 0x84b   : > { %vm1612_vm0 = vmor %vm1610_vm11, %vm1611_vm3 }
 0x84c   : > { %v1606_v33 = vmul.f32 %v6683_v31, %v1605_v32 }
 0x84e   : > { %v1607_v34 = vmul.f32 0.5, %v1606_v33 }
 0x850   : > { %v1608_v27 = vsub.f32 1.5, %v1607_v34 }
 0x852   : > { %v1609_v37 = vmul.f32 %v6683_v31, %v1608_v27 }
 0x854   : > { %v1613_v39 = vsel %vm1612_vm0, %v6683_v31, %v1609_v37 }
 0x855   : > { %v1614_v40 = vmul.f32 %v1613_v39, %v7608_v10 }
 0x857   : > { %v1616_v42 = vmul.f32 %v1615_v38, %v1614_v40 }
 0x859   : > { %v7616_v43 = vadd.f32 %v1617_v41, %v1616_v42 }
 0x85b   : > { %v1656_v44 = vpack.c.bf16 %v7616_v43, %v7616_v43 }
 0x85d   : > { %1800 = vmatmul.bf16.vlgmr.msrb.gmra.mxu0 %v1656_v44  ;;  %1813 = vmatmul.bf16.vlgmr.msrb.gmra.mxu1 %v1656_v44 }
 0x85e   : > { %1826 = vmatmul.bf16.vlgmr.msrb.gmra.mxu2 %v1656_v44 }
 0x8da   : > { %v1801_v47 = vpop.f32.mrf.mxu0  ;;  %v1814_v48 = vpop.f32.mrf.mxu1 }
 0x8db   : > { %v1815_v10 = vadd.f32 %v1814_v48, %v1659_v46  ;;  %v1802_v51 = vadd.f32 %v1801_v47, %v1658_v49 }
 0x8dd   : > { %v5392_v50 = vpack.c.bf16 %v1815_v10, %v1815_v10  ;;  %v7629_v56 = vpack.c.bf16 %v1802_v51, %v1802_v51 }
 0x8df   : > { %5393 = vmatpush.bf16.xpose.msk.msrb.mxu3 %vm7498_vm7, %v5392_v50  ;;  %5396 = vmatpush.bf16.xpose.msk.msra.mxu0 %vm7512_vm9, %v5392_v50 }
 0x8e0   : > { %5401 = vmatpush.bf16.xpose.msk.msra.mxu1 %vm7505_vm8, %v5392_v50 }
 0x8e1   : > { %v1827_v52 = vpop.f32.mrf.mxu2 }
 0x8e2   : > { %v1828_v53 = vadd.f32 %v1827_v52, %v1660_v63  ;;  %v1803_v54 = vpop.f32.mrf.mxu0  ;;  %v1816_v55 = vpop.f32.mrf.mxu1 }
 0x8e4   : > { %v1881_v57 = vsel %vm7491_vm6, %v1828_v53, 0.0  ;;  %v1851_v58 = vsel %vm1121_vm4, %v1828_v53, 0.0  ;;  %v1949_v59 = vsel %vm7487_vm5, %v1828_v53, 0.0  ;;  %v1999_v60 = vsel %vm7533_vm13, %v1828_v53, 0.0 }
 0x8e5   : > { %v1882_v61 = vpack.c.bf16 %v1881_v57, %v1881_v57  ;;  %v1852_v62 = vpack.c.bf16 %v1851_v58, %v1851_v58  ;;  %v1950_v0 = vpack.c.bf16 %v1949_v59, %v1949_v59  ;;  %v2000_v1 = vpack.c.bf16 %v1999_v60, %v1999_v60 }
 0x8e6   : > { %1861 = vmatmul.bf16.vlgmr.msrb.gmra.mxu3 %v7629_v56  ;;  %1891 = vmatmul.bf16.vlgmr.msra.gmra.mxu0 %v7629_v56 }
 0x8e7   : > { %1959 = vmatmul.bf16.vlgmr.msra.gmra.mxu1 %v7629_v56  ;;  %v1913_v2 = vsel %vm1194_vm10, %v1882_v61, 0  ;;  %v1932_v4 = vsel %vm1194_vm10, %v1852_v62, 0  ;;  %v1981_v5 = vsel %vm1194_vm10, %v1950_v0, 0  ;;  %v2031_v6 = vsel %vm1194_vm10, %v2000_v1, 0 }
 0x8e8   : > { %1922 = vmatpush.bf16.msra.mxu3 %v1913_v2  ;;  %1941 = vmatpush.bf16.msrb.mxu0 %v1932_v4 }
 0x8e9   : > { %1990 = vmatpush.bf16.msra.mxu2 %v1981_v5  ;;  %v1829_v7 = vpop.f32.mrf.mxu2 }
 0x8ec   : > { %5405 = vmatpush.bf16.xpose.msk.msrb.mxu3 %vm7540_vm14, %v5392_v50  ;;  %2040 = vmatpush.bf16.msra.mxu0 %v2031_v6 }
 0x963   : > { %v1892_v8 = vpop.f32.mrf.mxu0 }
 0x964   : > { %v1896_v9 = vmul.f32 0.35355338, %v1892_v8  ;;  %v1960_v12 = vpop.f32.mrf.mxu1 }
 0x965   : > { %v1964_v16 = vmul.f32 0.35355338, %v1960_v12  ;;  %v6327_v12 = vld [vmem:[%s8172_s7 + $0x70] sm:$0xff] }
 0x966   : > { %v1897_v13 = vsel %vm1143_vm15, %v1896_v9, -inf }
 0x967   : > { %1898 = vmax.xlane.f32.xlu0 %v1897_v13  ;;  %v1965_v24 = vsel %vm1143_vm15, %v1964_v16, -inf  ;;  %v5590_v13 = vld [vmem:[#allocation8 + $0xa8] sm:$0xf] }
 0x969   : > { %v1862_v14 = vpop.f32.mrf.mxu3 }
 0x96a   : > { %v1866_v17 = vmul.f32 0.35355338, %v1862_v14  ;;  %v6367_v14 = vld [vmem:[#allocation8 + $0xb0] sm:$0xf0] }
 0x96b   : > { %v1894_v3 = vpop.f32.mrf.mxu0 }
 0x96c   : > { %v1962_v19 = vpop.f32.mrf.mxu1  ;;  %v1867_v22 = vsel %vm1143_vm15, %v1866_v17, -inf  ;;  %v6325_v3 = vld [vmem:[%s8172_s7 + $0x60] sm:$0xff] }
 0x96d   : > { %1868 = vmax.xlane.f32.xlu2 %v1867_v22  ;;  %v6324_v19 = vld [vmem:[%s8172_s7 + $0x58] sm:$0xff]  ;;  %v6323_v22 = vld [vmem:[%s8172_s7 + $0x50] sm:$0xff] }
 0x96f   : > { %1966 = vmax.xlane.f32.xlu0 %v1965_v24 }
 0x971   : > { %v1864_v25 = vpop.f32.mrf.mxu3 }
 0x972   : > { %v6322_v25 = vld [vmem:[%s8172_s7 + $0x48] sm:$0xff] }
 0x9da   : > { %v1899_v26 = vpop.xlane.xlu0 %1898 }
 0x9db   : > { %v1900_v28 = vsub.f32 %v1896_v9, %v1899_v26  ;;  %v6328_v9 = vld [vmem:[%s8172_s7 + $0x78] sm:$0xff]  ;;  %v6366_v26 = vld [vmem:[#allocation8 + $0xac] sm:$0xf] }
 0x9dc   : > { %2097 = vmatpush.bf16.msrb.mxu1 %v6328_v9  ;;  %v5518_v9 = vld [vmem:[#allocation8 + $0x18] sm:$0xf] }
 0x9dd   : > { %v1901_v29 = vmul.f32 1.442695, %v1900_v28  ;;  %v5592_v28 = vld [vmem:[#allocation8 + $0xb4] sm:$0xf0] }
 0x9df   : > { %6684 = vpow2.f32 %v1901_v29  ;;  %v6321_v29 = vld [vmem:[%s8172_s7 + $0x40] sm:$0xff] }
 0x9e0   : > { %v1869_v30 = vpop.xlane.xlu2 %1868  ;;  %2098 = vmatpush.bf16.msrb.mxu1 %v6327_v12  ;;  %v6349_v12 = vld [vmem:[#allocation8 + $0x20] sm:$0xf0] }
 0x9e1   : > { %v1870_v31 = vsub.f32 %v1866_v17, %v1869_v30  ;;  %v6326_v17 = vld [vmem:[%s8172_s7 + $0x68] sm:$0xff] }
 0x9e2   : > { %v1967_v32 = vpop.xlane.xlu0 %1966 }
 0x9e3   : > { %v1871_v33 = vmul.f32 1.442695, %v1870_v31  ;;  %v1968_v34 = vsub.f32 %v1964_v16, %v1967_v32  ;;  %v5591_v16 = vor.u32 %v6367_v14, %v5590_v13  ;;  %v5595_v31 = vor.u32 %v6366_v26, %v5592_v28  ;;  %v5506_v14 = vld [vmem:[#allocation8] sm:$0xf]  ;;  %v6344_v28 = vld [vmem:[#allocation7 + $0x78] sm:$0xff] }
 0x9e4   : > { %2099 = vmatpush.bf16.msrb.mxu1 %v6326_v17  ;;  %v5519_v13 = vor.u32 %v6349_v12, %v5518_v9  ;;  %v6330_v9 = vld [vmem:[#allocation5 + $0x48] sm:$0xff]  ;;  %v6329_v12 = vld [vmem:[#allocation5 + $0x40] sm:$0xff] }
 0x9e5   : > { %v6685_v27 = vpop.eup %6684  ;;  %6686 = vpow2.f32 %v1871_v33  ;;  %v1969_v37 = vmul.f32 1.442695, %v1968_v34  ;;  %v6363_v33 = vld [vmem:[#allocation8 + $0x94] sm:$0xf]  ;;  %v5580_v34 = vld [vmem:[#allocation8 + $0x9c] sm:$0xf0] }
 0x9e6   : > { %v1903_v38 = vsel %vm1143_vm15, %v6685_v27, 0.0 }
 0x9e7   : > { %6688 = vpow2.f32 %v1969_v37  ;;  %1904 = vadd.xlane.f32.xlu1 %v1903_v38  ;;  %v5583_v37 = vor.u32 %v6363_v33, %v5580_v34  ;;  %v6360_v38 = vld [vmem:[#allocation8 + $0x7c] sm:$0xf] }
 0x9e8   : > { %2100 = vmatpush.bf16.msrb.mxu1 %v6325_v3  ;;  %v7692_v3 = vld [vmem:[%s888_s25] sm:$0xff] }
 0x9eb   : > { %v6687_v39 = vpop.eup %6686 }
 0x9ec   : > { %v1873_v40 = vsel %vm1143_vm15, %v6687_v39, 0.0  ;;  %2101 = vmatpush.bf16.msrb.mxu1 %v6324_v19  ;;  %v7696_v19 = vpack.c.bf16 %v7692_v3, %v7692_v3 }
 0x9ed   : > { %v6689_v41 = vpop.eup %6688  ;;  %1874 = vadd.xlane.f32.xlu2 %v1873_v40 }
 0x9ee   : > { %v1971_v42 = vsel %vm1143_vm15, %v6689_v41, 0.0 }
 0x9ef   : > { %1972 = vadd.xlane.f32.xlu0 %v1971_v42  ;;  %v6364_v42 = vld [vmem:[#allocation8 + $0x98] sm:$0xf0] }
 0x9f0   : > { %2102 = vmatpush.bf16.msrb.mxu1 %v6323_v22 }
 0x9f4   : > { %2103 = vmatpush.bf16.msrb.mxu1 %v6322_v25 }
 0x9f8   : > { %2104 = vmatpush.bf16.msrb.mxu1 %v6321_v29  ;;  %v6343_v29 = vld [vmem:[#allocation7 + $0x70] sm:$0xff] }
 0x9fc   : > { %2512 = vmatpush.bf16.msra.mxu1 %v5595_v31  ;;  %v7704_v31 = vld [vmem:[%s8095_s9 + $0x8] sm:$0x3f] }
 0x9fd   : > { %v2048_v33 = vperm.slane %v7704_v31, 0 }
 0xa00   : > { %2513 = vmatpush.bf16.msra.mxu1 %v5583_v37 }
 0xa5a   : > { %v1905_v44 = vpop.xlane.xlu1 %1904 }
 0xa5b   : > { %6690 = vrcp.f32 %v1905_v44 }
 0xa60   : > { %v1875_v45 = vpop.xlane.xlu2 %1874 }
 0xa61   : > { %v6691_v46 = vpop.eup %6690  ;;  %6692 = vrcp.f32 %v1875_v45  ;;  %v6357_v45 = vld [vmem:[#allocation8 + $0x64] sm:$0xf] }
 0xa62   : > { %v1907_v47 = vmul.f32 %v6691_v46, %v6685_v27  ;;  %v1973_v48 = vpop.xlane.xlu0 %1972  ;;  %v5556_v46 = vld [vmem:[#allocation8 + $0x6c] sm:$0xf0] }
 0xa63   : > { %6694 = vrcp.f32 %v1973_v48  ;;  %v5566_v48 = vld [vmem:[#allocation8 + $0x78] sm:$0xf] }
 0xa64   : > { %v1908_v49 = vpack.c.bf16 %v1907_v47, %v1907_v47  ;;  %v5559_v47 = vor.u32 %v6357_v45, %v5556_v46  ;;  %v6337_v46 = vld [vmem:[#allocation7 + $0x40] sm:$0xff] }
 0xa66   : > { %5397 = vmatmul.msk.bf16.vlgmr.msra.gmra.mxu3 %vm1143_vm15, %v1908_v49  ;;  %v6361_v49 = vld [vmem:[#allocation8 + $0x80] sm:$0xf0] }
 0xa67   : > { %v6693_v10 = vpop.eup %6692  ;;  %2288 = vmatpush.bf16.msra.mxu3 %v6344_v28  ;;  %v5562_v28 = vld [vmem:[#allocation8 + $0x68] sm:$0xf] }
 0xa68   : > { %v1877_v50 = vmul.f32 %v6693_v10, %v6687_v39  ;;  %v5568_v39 = vld [vmem:[#allocation8 + $0x84] sm:$0xf0]  ;;  %v5567_v10 = vor.u32 %v6361_v49, %v5566_v48 }
 0xa69   : > { %v6695_v63 = vpop.eup %6694  ;;  %v5571_v40 = vor.u32 %v6360_v38, %v5568_v39  ;;  %v6340_v39 = vld [vmem:[#allocation7 + $0x58] sm:$0xff] }
 0xa6a   : > { %v1878_v51 = vpack.c.bf16 %v1877_v50, %v1877_v50  ;;  %v1975_v52 = vmul.f32 %v6695_v63, %v6689_v41  ;;  %v5578_v41 = vld [vmem:[#allocation8 + $0x90] sm:$0xf]  ;;  %v6354_v50 = vld [vmem:[#allocation8 + $0x4c] sm:$0xf]  ;;  %v5544_v63 = vld [vmem:[#allocation8 + $0x54] sm:$0xf0] }
 0xa6b   : > { %2514 = vmatpush.bf16.msra.mxu1 %v5571_v40  ;;  %v5579_v44 = vor.u32 %v6364_v42, %v5578_v41  ;;  %2289 = vmatpush.bf16.msra.mxu3 %v6343_v29  ;;  %v6339_v40 = vld [vmem:[#allocation7 + $0x50] sm:$0xff]  ;;  %v7711_v42 = vld [vmem:[%s8103_s17] sm:$0x7] }
 0xa6c   : > { %v1976_v53 = vpack.c.bf16 %v1975_v52, %v1975_v52  ;;  %5398 = vmatmul.msk.bf16.vlgmr.msrb.gmra.mxu0 %vm1143_vm15, %v1878_v51  ;;  %v5547_v51 = vor.u32 %v6354_v50, %v5544_v63  ;;  %v5554_v52 = vld [vmem:[#allocation8 + $0x60] sm:$0xf]  ;;  %v2366_v45 = vperm.slane %v7711_v42, 1 }
 0xa6d   : > { %2499 = vmatpush.bf16.msrb.mxu0 %v5591_v16  ;;  %v6346_v16 = vld [vmem:[#allocation8 + $0x8] sm:$0xf0] }
 0xa6e   : > { %5402 = vmatmul.msk.bf16.vlgmr.msra.gmra.mxu2 %vm1143_vm15, %v1976_v53  ;;  %v6358_v53 = vld [vmem:[#allocation8 + $0x68] sm:$0xf0]  ;;  %v5507_v17 = vor.u32 %v6346_v16, %v5506_v14  ;;  %v6368_v14 = vld [vmem:[#allocation8 + $0xb8] sm:$0xf0] }
 0xa6f   : > { %2515 = vmatpush.bf16.msra.mxu1 %v5559_v47 }
 0xa71   : > { %2500 = vmatpush.bf16.msrb.mxu0 %v5579_v44  ;;  %v6338_v44 = vld [vmem:[#allocation7 + $0x48] sm:$0xff] }
 0xa73   : > { %2516 = vmatpush.bf16.msra.mxu1 %v5547_v51 }
 0xa75   : > { %2501 = vmatpush.bf16.msrb.mxu0 %v5567_v10 }
 0xa76   : > { %2009 = vmatmul.bf16.vlgmr.msrb.gmra.mxu3 %v7629_v56 }
 0xae9   : > { %v1924_v54 = vpop.f32.mrf.mxu3  ;;  %v1943_v55 = vpop.f32.mrf.mxu0 }
 0xaea   : > { %v1944_v57 = vadd.f32 %v1943_v55, %v1924_v54  ;;  %v6351_v54 = vld [vmem:[#allocation8 + $0x34] sm:$0xf]  ;;  %v5555_v55 = vor.u32 %v6358_v53, %v5554_v52 }
 0xaec   : > { %2502 = vmatpush.bf16.msrb.mxu0 %v5555_v55 }
 0xaf1   : > { %v1926_v58 = vpop.f32.mrf.mxu3  ;;  %v1945_v59 = vpop.f32.mrf.mxu0 }
 0xaf2   : > { %v1992_v60 = vpop.f32.mrf.mxu2  ;;  %v5542_v58 = vld [vmem:[#allocation8 + $0x48] sm:$0xf]  ;;  %v6355_v59 = vld [vmem:[#allocation8 + $0x50] sm:$0xf0] }
 0xaf3   : > { %v7658_v61 = vadd.f32 %v1992_v60, %v1944_v57  ;;  %v5532_v57 = vld [vmem:[#allocation8 + $0x3c] sm:$0xf0] }
 0xaf4   : > { %v5535_v60 = vor.u32 %v6351_v54, %v5532_v57  ;;  %v6336_v57 = vld [vmem:[#allocation5 + $0x78] sm:$0xff] }
 0xaf5   : > { %2224 = vmatpush.bf16.msrb.mxu2 %v6336_v57  ;;  %v2132_v57 = vperm.slane %v7704_v31, 2 }
 0xaf6   : > { %2517 = vmatpush.bf16.msra.mxu1 %v5535_v60  ;;  %v6333_v60 = vld [vmem:[#allocation5 + $0x60] sm:$0xff] }
 0xaf9   : > { %v2010_v62 = vpop.f32.mrf.mxu3 }
 0xafa   : > { %v1994_v0 = vpop.f32.mrf.mxu2  ;;  %v2014_v1 = vmul.f32 0.35355338, %v2010_v62  ;;  %v6348_v62 = vld [vmem:[#allocation8 + $0x1c] sm:$0xf] }
 0xafb   : > { %v5520_v0 = vld [vmem:[#allocation8 + $0x24] sm:$0xf0] }
 0xafc   : > { %v2015_v2 = vsel %vm1143_vm15, %v2014_v1, -inf }
 0xafd   : > { %2016 = vmax.xlane.f32.xlu1 %v2015_v2  ;;  %v5523_v2 = vor.u32 %v6348_v62, %v5520_v0 }
 0xaff   : > { %2518 = vmatpush.bf16.msra.mxu1 %v5523_v2 }
 0xb01   : > { %v2012_v4 = vpop.f32.mrf.mxu3 }
 0xb02   : > { %v5530_v4 = vld [vmem:[#allocation8 + $0x30] sm:$0xf] }
 0xb70   : > { %v2017_v5 = vpop.xlane.xlu1 %2016 }
 0xb71   : > { %v2018_v6 = vsub.f32 %v2014_v1, %v2017_v5  ;;  %v5543_v1 = vor.u32 %v6355_v59, %v5542_v58  ;;  %v6352_v5 = vld [vmem:[#allocation8 + $0x38] sm:$0xf0]  ;;  %v6335_v58 = vld [vmem:[#allocation5 + $0x70] sm:$0xff]  ;;  %v6334_v59 = vld [vmem:[#allocation5 + $0x68] sm:$0xff] }
 0xb72   : > { %2225 = vmatpush.bf16.msrb.mxu2 %v6335_v58 }
 0xb73   : > { %v2019_v7 = vmul.f32 1.442695, %v2018_v6  ;;  %v6345_v6 = vld [vmem:[#allocation8 + $0x4] sm:$0xf]  ;;  %2503 = vmatpush.bf16.msrb.mxu0 %v5543_v1 }
 0xb75   : > { %6696 = vpow2.f32 %v2019_v7  ;;  %v5508_v7 = vld [vmem:[#allocation8 + $0xc] sm:$0xf0] }
 0xb76   : > { %2226 = vmatpush.bf16.msrb.mxu2 %v6334_v59 }
 0xb7a   : > { %2227 = vmatpush.bf16.msrb.mxu2 %v6333_v60  ;;  %v2134_v60 = vperm.slane %v7704_v31, 3 }
 0xb7b   : > { %v6697_v56 = vpop.eup %6696 }
 0xb7c   : > { %v2021_v8 = vsel %vm1143_vm15, %v6697_v56, 0.0 }
 0xb7d   : > { %2022 = vadd.xlane.f32.xlu1 %v2021_v8  ;;  %v5511_v8 = vor.u32 %v6345_v6, %v5508_v7 }
 0xb7f   : > { %2519 = vmatpush.bf16.msra.mxu1 %v5511_v8  ;;  %v6331_v8 = vld [vmem:[#allocation5 + $0x50] sm:$0xff] }
 0xbf0   : > { %v2023_v24 = vpop.xlane.xlu1 %2022 }
 0xbf1   : > { %6698 = vrcp.f32 %v2023_v24 }
 0xbf7   : > { %v6699_v30 = vpop.eup %6698 }
 0xbf8   : > { %v2025_v32 = vmul.f32 %v6699_v30, %v6697_v56  ;;  %v5531_v56 = vor.u32 %v6352_v5, %v5530_v4 }
 0xbfa   : > { %v2026_v27 = vpack.c.bf16 %v2025_v32, %v2025_v32  ;;  %2504 = vmatpush.bf16.msrb.mxu0 %v5531_v56  ;;  %v6342_v32 = vld [vmem:[#allocation7 + $0x68] sm:$0xff]  ;;  %v6332_v56 = vld [vmem:[#allocation5 + $0x58] sm:$0xff] }
 0xbfb   : > { %2290 = vmatpush.bf16.msra.mxu3 %v6342_v32  ;;  %2228 = vmatpush.bf16.msrb.mxu2 %v6332_v56 }
 0xbfc   : > { %5406 = vmatmul.msk.bf16.vlgmr.msra.gmra.mxu0 %vm1143_vm15, %v2026_v27 }
 0xbfe   : > { %2505 = vmatpush.bf16.msrb.mxu0 %v5519_v13  ;;  %v5598_v13 = vld [vmem:[#allocation8 + $0xb0] sm:$0xf] }
 0xbff   : > { %2229 = vmatpush.bf16.msrb.mxu2 %v6331_v8  ;;  %v5599_v16 = vor.u32 %v6368_v14, %v5598_v13 }
 0xc02   : > { %2506 = vmatpush.bf16.msrb.mxu0 %v5507_v17  ;;  %v5586_v17 = vld [vmem:[#allocation8 + $0x98] sm:$0xf] }
 0xc03   : > { %2230 = vmatpush.bf16.msrb.mxu2 %v6330_v9 }
 0xc07   : > { %2231 = vmatpush.bf16.msrb.mxu2 %v6329_v12 }
 0xc0b   : > { %2525 = vmatpush.bf16.msra.mxu2 %v5599_v16 }
 0xc0c   : > { %2507 = vmatmul.bf16.vlgmr.msrb.gmra.mxu0 %v7696_v19 }
 0xc79   : > { %v2042_v22 = vpop.f32.mrf.mxu0 }
 0xc7a   : > { %v2046_v24 = vadd.f32 %v2042_v22, %v7658_v61  ;;  %v6341_v61 = vld [vmem:[#allocation7 + $0x60] sm:$0xff] }
 0xc7b   : > { %2291 = vmatpush.bf16.msra.mxu3 %v6341_v61  ;;  %v6365_v22 = vld [vmem:[#allocation8 + $0xa0] sm:$0xf0]  ;;  %v6356_v61 = vld [vmem:[#allocation8 + $0x58] sm:$0xf0] }
 0xc7c   : > { %v2047_v25 = vpack.c.bf16 %v2046_v24, %v2046_v24  ;;  %v5587_v24 = vor.u32 %v6365_v22, %v5586_v17 }
 0xc7e   : > { %2105 = vmatmul.bf16.vlgmr.msrb.gmra.mxu1 %v2047_v25  ;;  %2526 = vmatpush.bf16.msra.mxu2 %v5587_v24  ;;  %v5574_v25 = vld [vmem:[#allocation8 + $0x80] sm:$0xf] }
 0xc7f   : > { %2292 = vmatpush.bf16.msra.mxu3 %v6340_v39  ;;  %v6353_v39 = vld [vmem:[#allocation8 + $0x40] sm:$0xf0] }
 0xc81   : > { %v2044_v26 = vpop.f32.mrf.mxu0 }
 0xc82   : > { %v6362_v26 = vld [vmem:[#allocation8 + $0x88] sm:$0xf0] }
 0xc83   : > { %2293 = vmatpush.bf16.msra.mxu3 %v6339_v40  ;;  %v5575_v29 = vor.u32 %v6362_v26, %v5574_v25  ;;  %v2367_v26 = vperm.slane %v7711_v42, 2 }
 0xc85   : > { %2527 = vmatpush.bf16.msra.mxu2 %v5575_v29 }
 0xc87   : > { %2294 = vmatpush.bf16.msra.mxu3 %v6338_v44  ;;  %v5526_v44 = vld [vmem:[#allocation8 + $0x20] sm:$0xf] }
 0xc89   : > { %v2508_v30 = vpop.f32.mrf.mxu0 }
 0xc8b   : > { %2295 = vmatpush.bf16.msra.mxu3 %v6337_v46 }
 0xc8e   : > { %2520 = vmatmul.bf16.vlgmr.msra.gmra.mxu1 %v7696_v19 }
 0xc91   : > { %v2510_v37 = vpop.f32.mrf.mxu0 }
 0xcfb   : > { %v2106_v34 = vpop.f32.mrf.mxu1 }
 0xcfc   : > { %v2107_v27 = vadd.f32 %v2106_v34, %v2048_v33  ;;  %v5550_v33 = vld [vmem:[#allocation8 + $0x50] sm:$0xf] }
 0xcfe   : > { %v2110_v38 = vadd.f32 %v2107_v27, %v7616_v43  ;;  %v2365_v43 = vperm.slane %v7711_v42, 0  ;;  %v5551_v27 = vor.u32 %v6356_v61, %v5550_v33 }
 0xd00   : > { %2111 = vadd.xlane.f32.xlu2 %v2110_v38  ;;  %v2509_v10 = vadd.f32 %v2508_v30, %v2365_v43  ;;  %v6359_v30 = vld [vmem:[#allocation8 + $0x70] sm:$0xf0] }
 0xd01   : > { %v5563_v32 = vor.u32 %v6359_v30, %v5562_v28  ;;  %v6347_v43 = vld [vmem:[#allocation8 + $0x10] sm:$0xf0] }
 0xd02   : > { %v7726_v50 = vpack.c.bf16 %v2509_v10, %v2509_v10 }
 0xd03   : > { %v2108_v41 = vpop.f32.mrf.mxu1  ;;  %2528 = vmatpush.bf16.msra.mxu2 %v5563_v32 }
 0xd07   : > { %2529 = vmatpush.bf16.msra.mxu2 %v5551_v27 }
 0xd0b   : > { %v2521_v47 = vpop.f32.mrf.mxu1 }
 0xd0c   : > { %v2522_v48 = vadd.f32 %v2521_v47, %v2366_v45  ;;  %v6350_v45 = vld [vmem:[#allocation8 + $0x28] sm:$0xf0]  ;;  %v5514_v47 = vld [vmem:[#allocation8 + $0x8] sm:$0xf] }
 0xd0d   : > { %v5527_v46 = vor.u32 %v6350_v45, %v5526_v44  ;;  %v5515_v10 = vor.u32 %v6347_v43, %v5514_v47 }
 0xd0e   : > { %v7715_v49 = vpack.c.bf16 %v2522_v48, %v2522_v48 }
 0xd10   : > { %5605 = vmatpush.bf16.xpose.msk.msra.mxu0 %vm7512_vm9, %v7715_v49  ;;  %5610 = vmatpush.bf16.xpose.msk.msrb.mxu1 %vm7505_vm8, %v7715_v49 }
 0xd11   : > { %5602 = vmatpush.bf16.xpose.msk.msrb.mxu3 %vm7498_vm7, %v7715_v49 }
 0xd13   : > { %v2523_v63 = vpop.f32.mrf.mxu1 }
 0xd17   : > { %2597 = vmatmul.bf16.vlgmr.msra.gmra.mxu0 %v7726_v50  ;;  %2665 = vmatmul.bf16.vlgmr.msrb.gmra.mxu1 %v7726_v50 }
 0xd73   : > { %v2112_v51 = vpop.xlane.xlu2 %2111 }
 0xd74   : > { %v2113_v52 = vmul.f32 0.03125, %v2112_v51 }
 0xd76   : > { %v7730_v53 = vsub.f32 %v2110_v38, %v2113_v52  ;;  %v5538_v38 = vld [vmem:[#allocation8 + $0x38] sm:$0xf] }
 0xd77   : > { %v5539_v41 = vor.u32 %v6353_v39, %v5538_v38 }
 0xd78   : > { %v2115_v54 = vsel %vm1286_vm12, %v7730_v53, 0.0 }
 0xd79   : > { %v2116_v55 = vmul.f32 %v2115_v54, %v2115_v54  ;;  %2530 = vmatpush.bf16.msra.mxu2 %v5539_v41 }
 0xd7b   : > { %2117 = vadd.xlane.f32.xlu0 %v2116_v55 }
 0xd7d   : > { %2531 = vmatpush.bf16.msra.mxu2 %v5527_v46 }
 0xd81   : > { %2532 = vmatpush.bf16.msra.mxu2 %v5515_v10 }
 0xd94   : > { %v2598_v62 = vpop.f32.mrf.mxu0  ;;  %v2666_v0 = vpop.f32.mrf.mxu1 }
 0xd95   : > { %v7735_v1 = vmul.f32 0.35355338, %v2598_v62  ;;  %v7739_v4 = vmul.f32 0.35355338, %v2666_v0 }
 0xd97   : > { %v2603_v2 = vsel %vm1143_vm15, %v7735_v1, -inf  ;;  %v2671_v7 = vsel %vm1143_vm15, %v7739_v4, -inf }
 0xd98   : > { %2604 = vmax.xlane.f32.xlu1 %v2603_v2 }
 0xd9c   : > { %v2600_v5 = vpop.f32.mrf.mxu0  ;;  %v2668_v6 = vpop.f32.mrf.mxu1 }
 0xda0   : > { %2672 = vmax.xlane.f32.xlu1 %v2671_v7 }
 0xdee   : > { %v2118_v34 = vpop.xlane.xlu0 %2117 }
 0xdef   : > { %v2119_v37 = vmul.f32 0.03125, %v2118_v34 }
 0xdf1   : > { %v2120_v40 = vadd.f32 1e-05, %v2119_v37 }
 0xdf3   : > { %6700 = vrsqrt.f32 %v2120_v40  ;;  %vm2127_vm2 = vweird.f32 %v2120_v40 }
 0xdf9   : > { %v6701_v48 = vpop.eup %6700 }
 0xdfa   : > { %v2122_v63 = vmul.f32 %v6701_v48, %v2120_v40  ;;  %vm2128_vm1 = vweird.f32 %v6701_v48 }
 0xdfb   : > { %vm2129_vm3 = vmor %vm2127_vm2, %vm2128_vm1 }
 0xdfc   : > { %v2123_v51 = vmul.f32 %v6701_v48, %v2122_v63 }
 0xdfe   : > { %v2124_v52 = vmul.f32 0.5, %v2123_v51 }
 0xe00   : > { %v2125_v54 = vsub.f32 1.5, %v2124_v52 }
 0xe02   : > { %v2126_v55 = vmul.f32 %v6701_v48, %v2125_v54 }
 0xe04   : > { %v2130_v58 = vsel %vm2129_vm3, %v6701_v48, %v2126_v55 }
 0xe05   : > { %v2131_v59 = vmul.f32 %v2130_v58, %v7730_v53 }
 0xe07   : > { %v2133_v62 = vmul.f32 %v2132_v57, %v2131_v59 }
 0xe09   : > { %v7746_v0 = vadd.f32 %v2134_v60, %v2133_v62 }
 0xe0b   : > { %v2605_v2 = vpop.xlane.xlu1 %2604  ;;  %v2172_v5 = vpack.c.bf16 %v7746_v0, %v7746_v0 }
 0xe0c   : > { %v2606_v6 = vsub.f32 %v7735_v1, %v2605_v2  ;;  %v6660_v1 = vld [vmem:[%s8094_s8 + $0x1] ss:$0 sm:$0xff] }
 0xe0d   : > { %2232 = vmatmul.bf16.vlgmr.msrb.gmra.mxu2 %v2172_v5 }
 0xe0e   : > { %v2607_v7 = vmul.f32 1.442695, %v2606_v6 }
 0xe10   : > { %6702 = vpow2.f32 %v2607_v7 }
 0xe13   : > { %v2673_v56 = vpop.xlane.xlu1 %2672 }
 0xe14   : > { %v2674_v8 = vsub.f32 %v7739_v4, %v2673_v56 }
 0xe16   : > { %v6703_v9 = vpop.eup %6702  ;;  %v2675_v12 = vmul.f32 1.442695, %v2674_v8 }
 0xe17   : > { %v2609_v53 = vsel %vm1143_vm15, %v6703_v9, 0.0 }
 0xe18   : > { %6704 = vpow2.f32 %v2675_v12  ;;  %2610 = vadd.xlane.f32.xlu2 %v2609_v53 }
 0xe1d   : > { %2533 = vmatmul.bf16.vlgmr.msra.gmra.mxu2 %v7696_v19 }
 0xe1e   : > { %v6705_v13 = vpop.eup %6704 }
 0xe1f   : > { %v2677_v14 = vsel %vm1143_vm15, %v6705_v13, 0.0 }
 0xe20   : > { %2678 = vadd.xlane.f32.xlu1 %v2677_v14 }
 0xe8b   : > { %v2611_v39 = vpop.xlane.xlu2 %2610 }
 0xe90   : > { %v2233_v16 = vpop.f32.mrf.mxu2 }
 0xe91   : > { %v2234_v17 = vadd.f32 %v6660_v1, %v2233_v16 }
 0xe93   : > { %v2237_v22 = vmax.f32 %v2234_v17, 0.0  ;;  %v2679_v24 = vpop.xlane.xlu1 %2678 }
 0xe94   : > { %6706 = vrcp.f32 %v2679_v24 }
 0xe95   : > { %v2238_v4 = vpack.c.bf16 %v2237_v22, %v2237_v22  ;;  %6708 = vrcp.f32 %v2611_v39 }
 0xe97   : > { %2296 = vmatmul.bf16.vlgmr.msra.gmra.mxu3 %v2238_v4 }
 0xe98   : > { %v2235_v25 = vpop.f32.mrf.mxu2 }
 0xe9a   : > { %v6707_v28 = vpop.eup %6706 }
 0xe9b   : > { %v2681_v30 = vmul.f32 %v6707_v28, %v6705_v13  ;;  %v6709_v43 = vpop.eup %6708 }
 0xe9c   : > { %v2613_v48 = vmul.f32 %v6709_v43, %v6703_v9  ;;  %v2239_v9 = vperm.slane %v7704_v31, 1 }
 0xe9d   : > { %v2682_v46 = vpack.c.bf16 %v2681_v30, %v2681_v30  ;;  %v6400_v30 = vld [vmem:[#allocation13 + $0x74] sm:$0xf0] }
 0xe9e   : > { %v2614_v10 = vpack.c.bf16 %v2613_v48, %v2613_v48  ;;  %v5722_v48 = vld [vmem:[#allocation13 + $0x50] sm:$0xf] }
 0xea0   : > { %v2534_v19 = vpop.f32.mrf.mxu2 }
 0xea1   : > { %v2535_v29 = vadd.f32 %v2534_v19, %v2367_v26 }
 0xea3   : > { %v2587_v32 = vsel %vm7491_vm6, %v2535_v29, 0.0  ;;  %v2655_v33 = vsel %vm7487_vm5, %v2535_v29, 0.0  ;;  %v2557_v61 = vsel %vm1121_vm4, %v2535_v29, 0.0  ;;  %v2705_v34 = vsel %vm7533_vm13, %v2535_v29, 0.0 }
 0xea4   : > { %v2588_v27 = vpack.c.bf16 %v2587_v32, %v2587_v32  ;;  %v2656_v37 = vpack.c.bf16 %v2655_v33, %v2655_v33  ;;  %v2558_v38 = vpack.c.bf16 %v2557_v61, %v2557_v61  ;;  %v2706_v42 = vpack.c.bf16 %v2705_v34, %v2705_v34  ;;  %v6399_v32 = vld [vmem:[#allocation13 + $0x74] sm:$0xf]  ;;  %v5740_v34 = vld [vmem:[#allocation13 + $0x78] sm:$0xf0] }
 0xea6   : > { %v2619_v40 = vsel %vm1194_vm10, %v2588_v27, 0  ;;  %v2687_v41 = vsel %vm1194_vm10, %v2656_v37, 0  ;;  %v2638_v44 = vsel %vm1194_vm10, %v2558_v38, 0  ;;  %v2737_v45 = vsel %vm1194_vm10, %v2706_v42, 0 }
 0xea7   : > { %2567 = vmatmul.bf16.vlgmr.msrb.gmra.mxu3 %v7726_v50  ;;  %2696 = vmatpush.bf16.msrb.mxu2 %v2687_v41  ;;  %v5743_v37 = vor.u32 %v6399_v32, %v5740_v34  ;;  %v5730_v41 = vld [vmem:[#allocation13 + $0x60] sm:$0xf]  ;;  %v6386_v32 = vld [vmem:[#allocation13 + $0x4] sm:$0xf0]  ;;  %v6385_v34 = vld [vmem:[#allocation13 + $0x4] sm:$0xf] }
 0xea8   : > { %2628 = vmatpush.bf16.msra.mxu3 %v2619_v40  ;;  %v2536_v47 = vpop.f32.mrf.mxu2  ;;  %2647 = vmatpush.bf16.msrb.mxu0 %v2638_v44  ;;  %v6398_v44 = vld [vmem:[#allocation13 + $0x64] sm:$0xf0] }
 0xea9   : > { %v5732_v47 = vld [vmem:[#allocation13 + $0x68] sm:$0xf0] }
 0xeaa   : > { %5611 = vmatmul.msk.bf16.vlgmr.msrb.gmra.mxu2 %vm1143_vm15, %v2682_v46  ;;  %v5731_v46 = vor.u32 %v6398_v44, %v5730_v41 }
 0xeac   : > { %5614 = vmatpush.bf16.xpose.msk.msrb.mxu3 %vm7540_vm14, %v7715_v49  ;;  %2746 = vmatpush.bf16.msra.mxu0 %v2737_v45  ;;  %v6397_v45 = vld [vmem:[#allocation13 + $0x64] sm:$0xf] }
 0xead   : > { %v5735_v43 = vor.u32 %v6397_v45, %v5732_v47  ;;  %v6369_v45 = vld [vmem:[#allocation10] sm:$0xff] }
 0xeb7   : > { %5606 = vmatmul.msk.bf16.vlgmr.msra.gmra.mxu3 %vm1143_vm15, %v2614_v10  ;;  %v6396_v10 = vld [vmem:[#allocation13 + $0x54] sm:$0xf0] }
 0xec7   : > { %2715 = vmatmul.bf16.vlgmr.msrb.gmra.mxu3 %v7726_v50 }
 0xf1a   : > { %v2297_v63 = vpop.f32.mrf.mxu3 }
 0xf1b   : > { %v2298_v53 = vadd.f32 %v2297_v63, %v2239_v9  ;;  %v6395_v63 = vld [vmem:[#allocation13 + $0x54] sm:$0xf]  ;;  %v5708_v9 = vld [vmem:[#allocation13 + $0x38] sm:$0xf0] }
 0xf1d   : > { %v2301_v13 = vadd.f32 %v2298_v53, %v7746_v0  ;;  %v5738_v0 = vld [vmem:[#allocation13 + $0x70] sm:$0xf]  ;;  %v5698_v53 = vld [vmem:[#allocation13 + $0x20] sm:$0xf] }
 0xf1e   : > { %v5739_v61 = vor.u32 %v6400_v30, %v5738_v0  ;;  %v5682_v30 = vld [vmem:[#allocation13] sm:$0xf] }
 0xf20   : > { %3024 = vmatpush.bf16.msra.mxu3 %v5739_v61  ;;  %v5683_v61 = vor.u32 %v6386_v32, %v5682_v30 }
 0xf22   : > { %v2299_v51 = vpop.f32.mrf.mxu3 }
 0xf23   : > { %v5723_v51 = vor.u32 %v6396_v10, %v5722_v48  ;;  %v6384_v10 = vld [vmem:[#allocation11 + $0x38] sm:$0xff] }
 0xf24   : > { %3025 = vmatpush.bf16.msra.mxu3 %v5731_v46  ;;  %2908 = vmatpush.bf16.msra.mxu2 %v6384_v10 }
 0xf28   : > { %3026 = vmatpush.bf16.msra.mxu3 %v5723_v51  ;;  %v6383_v51 = vld [vmem:[#allocation11 + $0x30] sm:$0xff] }
 0xf29   : > { %2909 = vmatpush.bf16.msra.mxu2 %v6383_v51 }
 0xf2a   : > { %v2568_v52 = vpop.f32.mrf.mxu3 }
 0xf2b   : > { %v2572_v54 = vmul.f32 0.35355338, %v2568_v52  ;;  %v5724_v52 = vld [vmem:[#allocation13 + $0x58] sm:$0xf0] }
 0xf2d   : > { %v7778_v55 = vpop.f32.mrf.mxu2  ;;  %v2573_v57 = vsel %vm1143_vm15, %v2572_v54, -inf }
 0xf2e   : > { %2574 = vmax.xlane.f32.xlu0 %v2573_v57  ;;  %v5714_v57 = vld [vmem:[#allocation13 + $0x40] sm:$0xf] }
 0xf32   : > { %v2570_v49 = vpop.f32.mrf.mxu3 }
 0xf33   : > { %v6394_v49 = vld [vmem:[#allocation13 + $0x44] sm:$0xf0] }
 0xf35   : > { %v2700_v58 = vpop.f32.mrf.mxu2 }
 0xf36   : > { %v6393_v58 = vld [vmem:[#allocation13 + $0x44] sm:$0xf] }
 0xf3a   : > { %v7781_v59 = vpop.f32.mrf.mxu3 }
 0xf42   : > { %v2632_v60 = vpop.f32.mrf.mxu3 }
 0xf43   : > { %v6376_v60 = vld [vmem:[#allocation10 + $0x38] sm:$0xff] }
 0xf44   : > { %2803 = vmatpush.bf16.msra.mxu1 %v6376_v60 }
 0xf4a   : > { %v2716_v62 = vpop.f32.mrf.mxu3 }
 0xf4b   : > { %v2720_v2 = vmul.f32 0.35355338, %v2716_v62  ;;  %v5715_v62 = vor.u32 %v6394_v49, %v5714_v57  ;;  %v6382_v57 = vld [vmem:[#allocation11 + $0x28] sm:$0xff]  ;;  %v2323_v49 = vperm.slane %v7704_v31, 4 }
 0xf4c   : > { %2910 = vmatpush.bf16.msra.mxu2 %v6382_v57 }
 0xf4d   : > { %v2721_v5 = vsel %vm1143_vm15, %v2720_v2, -inf  ;;  %3027 = vmatpush.bf16.msra.mxu3 %v5715_v62  ;;  %v2325_v62 = vperm.slane %v7704_v31, 5 }
 0xf4e   : > { %2722 = vmax.xlane.f32.xlu2 %v2721_v5 }
 0xf52   : > { %v2718_v50 = vpop.f32.mrf.mxu3 }
 0xf53   : > { %v5706_v50 = vld [vmem:[#allocation13 + $0x30] sm:$0xf] }
 0xfa1   : > { %v2575_v6 = vpop.xlane.xlu0 %2574 }
 0xfa2   : > { %v2576_v7 = vsub.f32 %v2572_v54, %v2575_v6  ;;  %v5727_v54 = vor.u32 %v6395_v63, %v5724_v52  ;;  %v6392_v6 = vld [vmem:[#allocation13 + $0x34] sm:$0xf0] }
 0xfa4   : > { %v2577_v56 = vmul.f32 1.442695, %v2576_v7  ;;  %v6391_v7 = vld [vmem:[#allocation13 + $0x34] sm:$0xf] }
 0xfa6   : > { %6710 = vpow2.f32 %v2577_v56  ;;  %v6375_v56 = vld [vmem:[#allocation10 + $0x30] sm:$0xff] }
 0xfa7   : > { %2804 = vmatpush.bf16.msra.mxu1 %v6375_v56 }
 0xfac   : > { %v6711_v8 = vpop.eup %6710 }
 0xfad   : > { %v2579_v12 = vsel %vm1143_vm15, %v6711_v8, 0.0 }
 0xfae   : > { %2580 = vadd.xlane.f32.xlu0 %v2579_v12  ;;  %v5711_v12 = vor.u32 %v6391_v7, %v5708_v9 }
 0xfb6   : > { %2302 = vadd.xlane.f32.xlu0 %v2301_v13 }
 0xfc1   : > { %v2723_v14 = vpop.xlane.xlu2 %2722 }
 0xfc2   : > { %v2724_v1 = vsub.f32 %v2720_v2, %v2723_v14  ;;  %v5716_v2 = vld [vmem:[#allocation13 + $0x48] sm:$0xf0]  ;;  %v6389_v14 = vld [vmem:[#allocation13 + $0x24] sm:$0xf] }
 0xfc3   : > { %v5719_v5 = vor.u32 %v6393_v58, %v5716_v2  ;;  %v6381_v2 = vld [vmem:[#allocation11 + $0x20] sm:$0xff] }
 0xfc4   : > { %v2725_v16 = vmul.f32 1.442695, %v2724_v1  ;;  %v6374_v1 = vld [vmem:[#allocation10 + $0x28] sm:$0xff]  ;;  %2911 = vmatpush.bf16.msra.mxu2 %v6381_v2 }
 0xfc5   : > { %2805 = vmatpush.bf16.msra.mxu1 %v6374_v1  ;;  %v2938_v1 = vld [vmem:[%s8104_s18] sm:$0x3] }
 0xfc6   : > { %6712 = vpow2.f32 %v2725_v16 }
 0xfcc   : > { %v6713_v17 = vpop.eup %6712 }
 0xfcd   : > { %v2727_v22 = vsel %vm1143_vm15, %v6713_v17, 0.0 }
 0xfce   : > { %2728 = vadd.xlane.f32.xlu2 %v2727_v22 }
0x1021   : > { %v2581_v4 = vpop.xlane.xlu0 %2580 }
0x1022   : > { %6714 = vrcp.f32 %v2581_v4  ;;  %v5690_v4 = vld [vmem:[#allocation13 + $0x10] sm:$0xf] }
0x1028   : > { %v6715_v24 = vpop.eup %6714 }
0x1029   : > { %v2583_v25 = vmul.f32 %v6715_v24, %v6711_v8  ;;  %v2303_v26 = vpop.xlane.xlu0 %2302  ;;  %v5707_v8 = vor.u32 %v6392_v6, %v5706_v50  ;;  %v6388_v24 = vld [vmem:[#allocation13 + $0x14] sm:$0xf0] }
0x102a   : > { %v2304_v28 = vmul.f32 0.03125, %v2303_v26  ;;  %v6373_v26 = vld [vmem:[#allocation10 + $0x20] sm:$0xff]  ;;  %v6380_v6 = vld [vmem:[#allocation11 + $0x18] sm:$0xff] }
0x102b   : > { %v2584_v19 = vpack.c.bf16 %v2583_v25, %v2583_v25  ;;  %3028 = vmatpush.bf16.msra.mxu3 %v5707_v8  ;;  %v6387_v25 = vld [vmem:[#allocation13 + $0x14] sm:$0xf]  ;;  %2806 = vmatpush.bf16.msra.mxu1 %v6373_v26 }
0x102c   : > { %v7788_v29 = vsub.f32 %v2301_v13, %v2304_v28  ;;  %v6390_v13 = vld [vmem:[#allocation13 + $0x24] sm:$0xf0]  ;;  %v5691_v28 = vor.u32 %v6388_v24, %v5690_v4  ;;  %2912 = vmatpush.bf16.msra.mxu2 %v6380_v6 }
0x102d   : > { %5607 = vmatmul.msk.bf16.vlgmr.msrb.gmra.mxu0 %vm1143_vm15, %v2584_v19  ;;  %v5699_v16 = vor.u32 %v6390_v13, %v5698_v53  ;;  %v5692_v19 = vld [vmem:[#allocation13 + $0x18] sm:$0xf0]  ;;  %v6379_v53 = vld [vmem:[#allocation11 + $0x10] sm:$0xff]  ;;  %v6378_v13 = vld [vmem:[#allocation11 + $0x8] sm:$0xff] }
0x102e   : > { %v2306_v33 = vsel %vm1286_vm12, %v7788_v29, 0.0  ;;  %3037 = vmatpush.bf16.msrb.mxu0 %v5743_v37  ;;  %v5695_v0 = vor.u32 %v6387_v25, %v5692_v19 }
0x102f   : > { %v2307_v27 = vmul.f32 %v2306_v33, %v2306_v33  ;;  %3029 = vmatpush.bf16.msra.mxu3 %v5699_v16  ;;  %v6372_v33 = vld [vmem:[#allocation10 + $0x18] sm:$0xff]  ;;  %v2941_v16 = vperm.slane %v2938_v1, 1 }
0x1030   : > { %2807 = vmatpush.bf16.msra.mxu1 %v6372_v33  ;;  %2913 = vmatpush.bf16.msra.mxu2 %v6379_v53  ;;  %v7819_v33 = vld [vmem:[%s8106_s20] sm:$0xff] }
0x1031   : > { %2308 = vadd.xlane.f32.xlu2 %v2307_v27  ;;  %v5684_v27 = vld [vmem:[#allocation13 + $0x8] sm:$0xf0]  ;;  %v2840_v2 = vperm.slane %v7819_v33, 5 }
0x1032   : > { %3038 = vmatpush.bf16.msrb.mxu0 %v5735_v43  ;;  %v5687_v37 = vor.u32 %v6385_v34, %v5684_v27 }
0x1033   : > { %3030 = vmatpush.bf16.msra.mxu3 %v5691_v28 }
0x1034   : > { %2914 = vmatpush.bf16.msra.mxu2 %v6378_v13 }
0x1036   : > { %3039 = vmatpush.bf16.msrb.mxu0 %v5727_v54 }
0x1037   : > { %3031 = vmatpush.bf16.msra.mxu3 %v5683_v61 }
0x103a   : > { %3040 = vmatpush.bf16.msrb.mxu0 %v5719_v5 }
0x103e   : > { %3041 = vmatpush.bf16.msrb.mxu0 %v5711_v12 }
0x1041   : > { %v2729_v38 = vpop.xlane.xlu2 %2728 }
0x1042   : > { %6716 = vrcp.f32 %v2729_v38  ;;  %v6371_v38 = vld [vmem:[#allocation10 + $0x10] sm:$0xff] }
0x1043   : > { %2808 = vmatpush.bf16.msra.mxu1 %v6371_v38 }
0x1048   : > { %v6717_v42 = vpop.eup %6716 }
0x1049   : > { %v2731_v39 = vmul.f32 %v6717_v42, %v6713_v17  ;;  %v5700_v17 = vld [vmem:[#allocation13 + $0x28] sm:$0xf0] }
0x104a   : > { %v5703_v22 = vor.u32 %v6389_v14, %v5700_v17  ;;  %v6377_v14 = vld [vmem:[#allocation11] sm:$0xff] }
0x104b   : > { %v2732_v40 = vpack.c.bf16 %v2731_v39, %v2731_v39  ;;  %2915 = vmatpush.bf16.msra.mxu2 %v6377_v14 }
0x104c   : > { %3042 = vmatpush.bf16.msrb.mxu0 %v5703_v22  ;;  %v2940_v22 = vperm.slane %v2938_v1, 0  ;;  %v7851_v1 = vld [vmem:[%s8174_s22] sm:$0xff] }
0x104d   : > { %5615 = vmatmul.msk.bf16.vlgmr.msra.gmra.mxu0 %vm1143_vm15, %v2732_v40  ;;  %v6370_v40 = vld [vmem:[#allocation10 + $0x8] sm:$0xff] }
0x104e   : > { %2809 = vmatpush.bf16.msra.mxu1 %v6370_v40 }
0x1050   : > { %3043 = vmatpush.bf16.msrb.mxu0 %v5695_v0 }
0x1052   : > { %2810 = vmatpush.bf16.msra.mxu1 %v6369_v45 }
0x1054   : > { %3044 = vmatpush.bf16.msrb.mxu0 %v5687_v37  ;;  %v2754_v37 = vperm.slane %v7819_v33, 0 }
0x10a4   : > { %v2309_v42 = vpop.xlane.xlu2 %2308 }
0x10a5   : > { %v2310_v39 = vmul.f32 0.03125, %v2309_v42 }
0x10a7   : > { %v2311_v41 = vadd.f32 1e-05, %v2310_v39 }
0x10a9   : > { %6718 = vrsqrt.f32 %v2311_v41  ;;  %vm2318_vm0 = vweird.f32 %v2311_v41 }
0x10aa   : > { %v2649_v44 = vpop.f32.mrf.mxu0 }
0x10ab   : > { %v2650_v56 = vadd.f32 %v2649_v44, %v7781_v59 }
0x10ad   : > { %v2702_v8 = vadd.f32 %v7778_v55, %v2650_v56 }
0x10af   : > { %v6719_v46 = vpop.eup %6718 }
0x10b0   : > { %v2313_v47 = vmul.f32 %v6719_v46, %v2311_v41  ;;  %vm2319_vm11 = vweird.f32 %v6719_v46 }
0x10b1   : > { %vm2320_vm1 = vmor %vm2318_vm0, %vm2319_vm11 }
0x10b2   : > { %v2314_v43 = vmul.f32 %v6719_v46, %v2313_v47  ;;  %v2651_v48 = vpop.f32.mrf.mxu0 }
0x10b4   : > { %v2315_v63 = vmul.f32 0.5, %v2314_v43 }
0x10b6   : > { %v2316_v52 = vsub.f32 1.5, %v2315_v63 }
0x10b8   : > { %v2317_v54 = vmul.f32 %v6719_v46, %v2316_v52 }
0x10ba   : > { %v2321_v58 = vsel %vm2320_vm1, %v6719_v46, %v2317_v54 }
0x10bb   : > { %v2322_v60 = vmul.f32 %v2321_v58, %v7788_v29  ;;  %v2838_v58 = vperm.slane %v7819_v33, 4 }
0x10bd   : > { %v2324_v5 = vmul.f32 %v2323_v49, %v2322_v60 }
0x10bf   : > { %v2326_v50 = vadd.f32 %v2325_v62, %v2324_v5 }
0x10c1   : > { %v7798_v7 = vpack.c.bf16 %v2326_v50, %v2326_v50 }
0x10c3   : > { %3032 = vmatmul.bf16.vlgmr.msra.gmra.mxu3 %v7798_v7  ;;  %3045 = vmatmul.bf16.vlgmr.msrb.gmra.mxu0 %v7798_v7 }
0x10ca   : > { %v2748_v29 = vpop.f32.mrf.mxu0 }
0x10cb   : > { %v2752_v9 = vadd.f32 %v2748_v29, %v2702_v8 }
0x10cd   : > { %v2753_v31 = vpack.c.bf16 %v2752_v9, %v2752_v9  ;;  %v2859_v9 = vperm.slane %v7819_v33, 1 }
0x10cf   : > { %2811 = vmatmul.bf16.vlgmr.msra.gmra.mxu1 %v2753_v31 }
0x10d2   : > { %v2750_v12 = vpop.f32.mrf.mxu0 }
0x1140   : > { %v3046_v17 = vpop.f32.mrf.mxu0 }
0x1141   : > { %v3047_v59 = vadd.f32 %v3046_v17, %v2941_v16 }
0x1143   : > { %v3100_v55 = vsel %vm7491_vm6, %v3047_v59, 0.0  ;;  %v3069_v4 = vsel %vm1121_vm4, %v3047_v59, 0.0  ;;  %v3220_v24 = vsel %vm7533_vm13, %v3047_v59, 0.0  ;;  %v3169_v5 = vsel %vm7487_vm5, %v3047_v59, 0.0 }
0x1144   : > { %v3101_v25 = vpack.c.bf16 %v3100_v55, %v3100_v55  ;;  %v3070_v26 = vpack.c.bf16 %v3069_v4, %v3069_v4  ;;  %v3221_v28 = vpack.c.bf16 %v3220_v24, %v3220_v24  ;;  %v3170_v56 = vpack.c.bf16 %v3169_v5, %v3169_v5 }
0x1146   : > { %v3033_v19 = vpop.f32.mrf.mxu3  ;;  %v3133_v0 = vsel %vm1194_vm10, %v3101_v25, 0  ;;  %v3152_v30 = vsel %vm1194_vm10, %v3070_v26, 0  ;;  %v3253_v32 = vsel %vm1194_vm10, %v3221_v28, 0  ;;  %v3202_v29 = vsel %vm1194_vm10, %v3170_v56, 0 }
0x1147   : > { %v3034_v61 = vadd.f32 %v3033_v19, %v2940_v22  ;;  %3142 = vmatpush.bf16.msrb.mxu3 %v3133_v0  ;;  %3161 = vmatpush.bf16.msra.mxu0 %v3152_v30 }
0x1148   : > { %v3048_v34 = vpop.f32.mrf.mxu0 }
0x1149   : > { %v5745_v27 = vpack.c.bf16 %v3034_v61, %v3034_v61 }
0x114b   : > { %3262 = vmatpush.bf16.msrb.mxu0 %v3253_v32  ;;  %5746 = vmatpush.bf16.xpose.msk.msrb.mxu1 %vm7498_vm7, %v5745_v27 }
0x114c   : > { %5749 = vmatpush.bf16.xpose.msk.msrb.mxu2 %vm7512_vm9, %v5745_v27  ;;  %5758 = vmatpush.bf16.xpose.msk.msra.mxu3 %vm7540_vm14, %v5745_v27  ;;  %v2812_v38 = vpop.f32.mrf.mxu1 }
0x114d   : > { %v2813_v42 = vadd.f32 %v2812_v38, %v2754_v37 }
0x114e   : > { %v3035_v39 = vpop.f32.mrf.mxu3 }
0x114f   : > { %v2816_v40 = vadd.f32 %v2813_v42, %v7692_v3 }
0x1151   : > { %2817 = vadd.xlane.f32.xlu1 %v2816_v40 }
0x1153   : > { %5754 = vmatpush.bf16.xpose.msk.msra.mxu1 %vm7505_vm8, %v5745_v27 }
0x1154   : > { %v2814_v41 = vpop.f32.mrf.mxu1 }
0x11c4   : > { %v2818_v44 = vpop.xlane.xlu1 %2817 }
0x11c5   : > { %v2819_v45 = vmul.f32 0.03125, %v2818_v44 }
0x11c7   : > { %v2820_v46 = vsub.f32 %v2816_v40, %v2819_v45 }
0x11c9   : > { %v2821_v47 = vsel %vm1286_vm12, %v2820_v46, 0.0 }
0x11ca   : > { %v2822_v43 = vmul.f32 %v2821_v47, %v2821_v47 }
0x11cc   : > { %2823 = vadd.xlane.f32.xlu0 %v2822_v43 }
0x123f   : > { %v2824_v48 = vpop.xlane.xlu0 %2823 }
0x1240   : > { %v2825_v10 = vmul.f32 0.03125, %v2824_v48 }
0x1242   : > { %v2826_v63 = vadd.f32 1e-05, %v2825_v10 }
0x1244   : > { %6720 = vrsqrt.f32 %v2826_v63  ;;  %vm2833_vm3 = vweird.f32 %v2826_v63 }
0x124a   : > { %v6721_v51 = vpop.eup %6720 }
0x124b   : > { %v2828_v52 = vmul.f32 %v6721_v51, %v2826_v63  ;;  %vm2834_vm2 = vweird.f32 %v6721_v51 }
0x124c   : > { %vm2835_vm11 = vmor %vm2833_vm3, %vm2834_vm2 }
0x124d   : > { %v2829_v54 = vmul.f32 %v6721_v51, %v2828_v52 }
0x124f   : > { %v2830_v57 = vmul.f32 0.5, %v2829_v54 }
0x1251   : > { %v2831_v49 = vsub.f32 1.5, %v2830_v57 }
0x1253   : > { %v2832_v3 = vmul.f32 %v6721_v51, %v2831_v49 }
0x1255   : > { %v2836_v60 = vsel %vm2835_vm11, %v6721_v51, %v2832_v3 }
0x1256   : > { %v2837_v62 = vmul.f32 %v2836_v60, %v2820_v46 }
0x1258   : > { %v2839_v50 = vmul.f32 %v2838_v58, %v2837_v62 }
0x125a   : > { %v7837_v6 = vadd.f32 %v2840_v2, %v2839_v50 }
0x125c   : > { %v2842_v8 = vpack.c.bf16 %v7837_v6, %v7837_v6 }
0x125e   : > { %2916 = vmatmul.bf16.vlgmr.msra.gmra.mxu2 %v2842_v8 }
0x125f   : > { %3211 = vmatpush.bf16.msra.mxu2 %v3202_v29 }
0x12e1   : > { %v2917_v31 = vpop.f32.mrf.mxu2 }
0x12e2   : > { %v2918_v12 = vadd.f32 %v2917_v31, %v2859_v9 }
0x12e4   : > { %v7843_v53 = vpack.c.bf16 %v2918_v12, %v2918_v12 }
0x12e6   : > { %3079 = vmatmul.bf16.vlgmr.msrb.gmra.mxu1 %v7843_v53  ;;  %3110 = vmatmul.bf16.vlgmr.msrb.gmra.mxu2 %v7843_v53 }
0x12e9   : > { %v2919_v13 = vpop.f32.mrf.mxu2 }
0x12f6   : > { %3179 = vmatmul.bf16.vlgmr.msra.gmra.mxu1 %v7843_v53 }
0x1363   : > { %v3080_v14 = vpop.f32.mrf.mxu1 }
0x1364   : > { %v3084_v16 = vmul.f32 0.35355338, %v3080_v14 }
0x1366   : > { %v3085_v17 = vadd.f32 %v3084_v16, %v7851_v1 }
0x1368   : > { %v3086_v59 = vsel %vm1143_vm15, %v3085_v17, -inf }
0x1369   : > { %v3111_v22 = vpop.f32.mrf.mxu2  ;;  %3087 = vmax.xlane.f32.xlu0 %v3086_v59 }
0x136a   : > { %v3115_v55 = vmul.f32 0.35355338, %v3111_v22 }
0x136b   : > { %v3082_v4 = vpop.f32.mrf.mxu1 }
0x136c   : > { %v3116_v24 = vadd.f32 %v3115_v55, %v7851_v1 }
0x136e   : > { %v3117_v25 = vsel %vm1143_vm15, %v3116_v24, -inf }
0x136f   : > { %3118 = vmax.xlane.f32.xlu1 %v3117_v25  ;;  %v6408_v25 = vld [vmem:[#allocation14 + $0x38] sm:$0xff] }
0x1370   : > { %3319 = vmatpush.bf16.msrb.mxu1 %v6408_v25 }
0x1371   : > { %v3113_v26 = vpop.f32.mrf.mxu2 }
0x1372   : > { %v6407_v26 = vld [vmem:[#allocation14 + $0x30] sm:$0xff] }
0x1373   : > { %v3180_v28 = vpop.f32.mrf.mxu1 }
0x1374   : > { %v3184_v19 = vmul.f32 0.35355338, %v3180_v28  ;;  %3320 = vmatpush.bf16.msrb.mxu1 %v6407_v26  ;;  %v6406_v28 = vld [vmem:[#allocation14 + $0x28] sm:$0xff] }
0x1376   : > { %v3185_v0 = vadd.f32 %v3184_v19, %v7851_v1  ;;  %v6405_v19 = vld [vmem:[#allocation14 + $0x20] sm:$0xff] }
0x1378   : > { %v3186_v30 = vsel %vm1143_vm15, %v3185_v0, -inf  ;;  %3321 = vmatpush.bf16.msrb.mxu1 %v6406_v28  ;;  %v6418_v28 = vld [vmem:[#allocation17 + $0x8] sm:$0xff] }
0x1379   : > { %3187 = vmax.xlane.f32.xlu1 %v3186_v30 }
0x137b   : > { %v3182_v32 = vpop.f32.mrf.mxu1 }
0x137c   : > { %3322 = vmatpush.bf16.msrb.mxu1 %v6405_v19  ;;  %v6402_v32 = vld [vmem:[#allocation14 + $0x8] sm:$0xff]  ;;  %v6417_v19 = vld [vmem:[#allocation17] sm:$0xff] }
0x13dc   : > { %v3088_v61 = vpop.xlane.xlu0 %3087 }
0x13dd   : > { %v3089_v34 = vsub.f32 %v3085_v17, %v3088_v61 }
0x13df   : > { %v3090_v27 = vmul.f32 1.442695, %v3089_v34 }
0x13e1   : > { %6722 = vpow2.f32 %v3090_v27 }
0x13e2   : > { %v3119_v37 = vpop.xlane.xlu1 %3118 }
0x13e3   : > { %v3120_v38 = vsub.f32 %v3116_v24, %v3119_v37  ;;  %v6401_v37 = vld [vmem:[#allocation14] sm:$0xff] }
0x13e5   : > { %v3121_v42 = vmul.f32 1.442695, %v3120_v38 }
0x13e7   : > { %v6723_v39 = vpop.eup %6722  ;;  %6724 = vpow2.f32 %v3121_v42 }
0x13e8   : > { %v3092_v40 = vsel %vm1143_vm15, %v6723_v39, 0.0 }
0x13e9   : > { %3093 = vadd.xlane.f32.xlu0 %v3092_v40 }
0x13ec   : > { %v3188_v41 = vpop.xlane.xlu1 %3187 }
0x13ed   : > { %v6725_v44 = vpop.eup %6724  ;;  %v3189_v45 = vsub.f32 %v3185_v0, %v3188_v41  ;;  %v6403_v0 = vld [vmem:[#allocation14 + $0x10] sm:$0xff]  ;;  %v3270_v41 = vperm.slane %v7819_v33, 2 }
0x13ee   : > { %v3123_v46 = vsel %vm1143_vm15, %v6725_v44, 0.0 }
0x13ef   : > { %v3190_v47 = vmul.f32 1.442695, %v3189_v45  ;;  %3124 = vadd.xlane.f32.xlu2 %v3123_v46 }
0x13f1   : > { %6726 = vpow2.f32 %v3190_v47 }
0x13f7   : > { %v6727_v43 = vpop.eup %6726 }
0x13f8   : > { %v3192_v48 = vsel %vm1143_vm15, %v6727_v43, 0.0 }
0x13f9   : > { %3193 = vadd.xlane.f32.xlu1 %v3192_v48 }
0x145c   : > { %v3094_v10 = vpop.xlane.xlu0 %3093 }
0x145d   : > { %6728 = vrcp.f32 %v3094_v10 }
0x1462   : > { %v3125_v63 = vpop.xlane.xlu2 %3124 }
0x1463   : > { %v6729_v51 = vpop.eup %6728  ;;  %6730 = vrcp.f32 %v3125_v63 }
0x1464   : > { %v3096_v52 = vmul.f32 %v6729_v51, %v6723_v39 }
0x1466   : > { %v3097_v54 = vpack.c.bf16 %v3096_v52, %v3096_v52 }
0x1468   : > { %5751 = vmatmul.msk.bf16.vlgmr.msra.gmra.mxu0 %vm1143_vm15, %v3097_v54  ;;  %v6415_v54 = vld [vmem:[#allocation16 + $0x30] sm:$0xff] }
0x1469   : > { %v6731_v57 = vpop.eup %6730 }
0x146a   : > { %v3127_v49 = vmul.f32 %v6731_v57, %v6725_v44  ;;  %v6414_v57 = vld [vmem:[#allocation16 + $0x28] sm:$0xff] }
0x146c   : > { %v3128_v3 = vpack.c.bf16 %v3127_v49, %v3127_v49  ;;  %v3194_v58 = vpop.xlane.xlu1 %3193  ;;  %v6413_v49 = vld [vmem:[#allocation16 + $0x20] sm:$0xff] }
0x146d   : > { %6732 = vrcp.f32 %v3194_v58  ;;  %v6410_v58 = vld [vmem:[#allocation16 + $0x8] sm:$0xff] }
0x146e   : > { %5750 = vmatmul.msk.bf16.vlgmr.msrb.gmra.mxu3 %vm1143_vm15, %v3128_v3  ;;  %v6412_v3 = vld [vmem:[#allocation16 + $0x18] sm:$0xff] }
0x1473   : > { %v6733_v60 = vpop.eup %6732 }
0x1474   : > { %v3196_v62 = vmul.f32 %v6733_v60, %v6727_v43  ;;  %v6416_v43 = vld [vmem:[#allocation16 + $0x38] sm:$0xff]  ;;  %v6409_v60 = vld [vmem:[#allocation16] sm:$0xff] }
0x1475   : > { %3443 = vmatpush.bf16.msrb.mxu2 %v6416_v43  ;;  %v6448_v43 = vld [vmem:[#allocation8 + $0x178] sm:$0xf0] }
0x1476   : > { %v3197_v2 = vpack.c.bf16 %v3196_v62, %v3196_v62  ;;  %v6424_v62 = vld [vmem:[#allocation17 + $0x38] sm:$0xff] }
0x1477   : > { %3507 = vmatpush.bf16.msrb.mxu3 %v6424_v62  ;;  %v6445_v62 = vld [vmem:[#allocation8 + $0x160] sm:$0xf0] }
0x1478   : > { %5755 = vmatmul.msk.bf16.vlgmr.msra.gmra.mxu2 %vm1143_vm15, %v3197_v2 }
0x1479   : > { %3444 = vmatpush.bf16.msrb.mxu2 %v6415_v54 }
0x147d   : > { %3445 = vmatpush.bf16.msrb.mxu2 %v6414_v57  ;;  %v5933_v57 = vld [vmem:[#allocation8 + $0x150] sm:$0xf] }
0x147e   : > { %3230 = vmatmul.bf16.vlgmr.msra.gmra.mxu3 %v7843_v53 }
0x1481   : > { %3446 = vmatpush.bf16.msrb.mxu2 %v6413_v49  ;;  %v6444_v49 = vld [vmem:[#allocation8 + $0x158] sm:$0xf0] }
0x1485   : > { %3447 = vmatpush.bf16.msrb.mxu2 %v6412_v3  ;;  %v6443_v3 = vld [vmem:[#allocation8 + $0x154] sm:$0xf] }
0x14e5   : > { %v3163_v5 = vpop.f32.mrf.mxu0 }
0x14ed   : > { %v3165_v50 = vpop.f32.mrf.mxu0 }
0x14ee   : > { %v6423_v50 = vld [vmem:[#allocation17 + $0x30] sm:$0xff] }
0x14ef   : > { %3508 = vmatpush.bf16.msrb.mxu3 %v6423_v50  ;;  %v5921_v50 = vld [vmem:[#allocation8 + $0x138] sm:$0xf] }
0x14f1   : > { %v3144_v56 = vpop.f32.mrf.mxu3 }
0x14f2   : > { %v3164_v8 = vadd.f32 %v3163_v5, %v3144_v56 }
0x14f9   : > { %v3146_v29 = vpop.f32.mrf.mxu3 }
0x14fa   : > { %v6421_v29 = vld [vmem:[#allocation17 + $0x20] sm:$0xff] }
0x14fb   : > { %v3213_v9 = vpop.f32.mrf.mxu2 }
0x14fc   : > { %v3217_v31 = vadd.f32 %v3213_v9, %v3164_v8  ;;  %v6422_v8 = vld [vmem:[#allocation17 + $0x28] sm:$0xff] }
0x14fd   : > { %3509 = vmatpush.bf16.msrb.mxu3 %v6422_v8  ;;  %v6440_v8 = vld [vmem:[#allocation8 + $0x13c] sm:$0xf] }
0x1501   : > { %v3231_v12 = vpop.f32.mrf.mxu3  ;;  %3510 = vmatpush.bf16.msrb.mxu3 %v6421_v29 }
0x1502   : > { %v3235_v13 = vmul.f32 0.35355338, %v3231_v12  ;;  %v6420_v12 = vld [vmem:[#allocation17 + $0x18] sm:$0xff] }
0x1503   : > { %v3215_v14 = vpop.f32.mrf.mxu2 }
0x1504   : > { %v3236_v16 = vadd.f32 %v3235_v13, %v7851_v1  ;;  %v6404_v1 = vld [vmem:[#allocation14 + $0x18] sm:$0xff] }
0x1505   : > { %3323 = vmatpush.bf16.msrb.mxu1 %v6404_v1  ;;  %3511 = vmatpush.bf16.msrb.mxu3 %v6420_v12  ;;  %v6661_v1 = vld [vmem:[%s8105_s19] ss:$0 sm:$0xff]  ;;  %v6442_v12 = vld [vmem:[#allocation8 + $0x148] sm:$0xf0] }
0x1506   : > { %v3237_v17 = vsel %vm1143_vm15, %v3236_v16, -inf }
0x1507   : > { %3238 = vmax.xlane.f32.xlu2 %v3237_v17 }
0x1509   : > { %v3233_v59 = vpop.f32.mrf.mxu3  ;;  %3324 = vmatpush.bf16.msrb.mxu1 %v6403_v0 }
0x150d   : > { %3325 = vmatpush.bf16.msrb.mxu1 %v6402_v32 }
0x1511   : > { %3326 = vmatpush.bf16.msrb.mxu1 %v6401_v37 }
0x157a   : > { %v3239_v22 = vpop.xlane.xlu2 %3238 }
0x157b   : > { %v3240_v55 = vsub.f32 %v3236_v16, %v3239_v22  ;;  %v6419_v16 = vld [vmem:[#allocation17 + $0x10] sm:$0xff]  ;;  %v3354_v22 = vperm.slane %v7819_v33, 6 }
0x157c   : > { %3512 = vmatpush.bf16.msrb.mxu3 %v6419_v16  ;;  %v5909_v16 = vld [vmem:[#allocation8 + $0x120] sm:$0xf] }
0x157d   : > { %v3241_v4 = vmul.f32 1.442695, %v3240_v55 }
0x157f   : > { %6734 = vpow2.f32 %v3241_v4 }
0x1580   : > { %3513 = vmatpush.bf16.msrb.mxu3 %v6418_v28  ;;  %v6435_v28 = vld [vmem:[#allocation8 + $0x110] sm:$0xf0] }
0x1584   : > { %3514 = vmatpush.bf16.msrb.mxu3 %v6417_v19  ;;  %v6434_v19 = vld [vmem:[#allocation8 + $0x10c] sm:$0xf] }
0x1585   : > { %v6735_v53 = vpop.eup %6734 }
0x1586   : > { %v3243_v24 = vsel %vm1143_vm15, %v6735_v53, 0.0 }
0x1587   : > { %3244 = vadd.xlane.f32.xlu2 %v3243_v24 }
0x15fa   : > { %v3245_v30 = vpop.xlane.xlu2 %3244 }
0x15fb   : > { %6736 = vrcp.f32 %v3245_v30 }
0x1601   : > { %v6737_v61 = vpop.eup %6736 }
0x1602   : > { %v3247_v34 = vmul.f32 %v6737_v61, %v6735_v53  ;;  %v3356_v53 = vperm.slane %v7819_v33, 7 }
0x1604   : > { %v3248_v27 = vpack.c.bf16 %v3247_v34, %v3247_v34 }
0x1606   : > { %5759 = vmatmul.msk.bf16.vlgmr.msrb.gmra.mxu0 %vm1143_vm15, %v3248_v27  ;;  %v3458_v27 = vperm.slane %v7819_v33, 3 }
0x1683   : > { %v3264_v38 = vpop.f32.mrf.mxu0 }
0x1684   : > { %v3268_v42 = vadd.f32 %v3264_v38, %v3217_v31 }
0x1686   : > { %v3269_v39 = vpack.c.bf16 %v3268_v42, %v3268_v42 }
0x1688   : > { %3327 = vmatmul.bf16.vlgmr.msrb.gmra.mxu1 %v3269_v39 }
0x168b   : > { %v3266_v40 = vpop.f32.mrf.mxu0 }
0x168c   : > { %v5945_v40 = vld [vmem:[#allocation8 + $0x168] sm:$0xf] }
0x1705   : > { %v3328_v44 = vpop.f32.mrf.mxu1 }
0x1706   : > { %v3329_v45 = vadd.f32 %v3328_v44, %v3270_v41  ;;  %v6447_v41 = vld [vmem:[#allocation8 + $0x170] sm:$0xf0]  ;;  %v6446_v44 = vld [vmem:[#allocation8 + $0x16c] sm:$0xf] }
0x1708   : > { %v3332_v46 = vadd.f32 %v3329_v45, %v7837_v6  ;;  %v6411_v6 = vld [vmem:[#allocation16 + $0x10] sm:$0xff]  ;;  %v5946_v45 = vor.u32 %v6447_v41, %v5945_v40  ;;  %v5893_v40 = vld [vmem:[#allocation8 + $0xf8] sm:$0xf]  ;;  %v6433_v41 = vld [vmem:[#allocation8 + $0x100] sm:$0xf0] }
0x1709   : > { %3448 = vmatpush.bf16.msrb.mxu2 %v6411_v6  ;;  %v5934_v6 = vor.u32 %v6444_v49, %v5933_v57  ;;  %v5861_v57 = vld [vmem:[#allocation8 + $0xc0] sm:$0xf]  ;;  %v6426_v49 = vld [vmem:[#allocation8 + $0xc8] sm:$0xf0] }
0x170a   : > { %3333 = vadd.xlane.f32.xlu0 %v3332_v46  ;;  %3720 = vmatpush.bf16.msra.mxu0 %v5946_v45  ;;  %v5894_v45 = vor.u32 %v6433_v41, %v5893_v40 }
0x170d   : > { %v3330_v47 = vpop.f32.mrf.mxu1  ;;  %3449 = vmatpush.bf16.msrb.mxu2 %v6410_v58  ;;  %v5935_v58 = vld [vmem:[#allocation8 + $0x15c] sm:$0xf0] }
0x170e   : > { %v5953_v47 = vld [vmem:[#allocation8 + $0x170] sm:$0xf]  ;;  %3721 = vmatpush.bf16.msra.mxu0 %v5934_v6  ;;  %v5862_v6 = vor.u32 %v6426_v49, %v5861_v57 }
0x1711   : > { %3450 = vmatpush.bf16.msrb.mxu2 %v6409_v60  ;;  %v5941_v60 = vld [vmem:[#allocation8 + $0x158] sm:$0xf] }
0x177d   : > { %v3334_v48 = vpop.xlane.xlu0 %3333 }
0x177e   : > { %v3335_v10 = vmul.f32 0.03125, %v3334_v48 }
0x1780   : > { %v3336_v63 = vsub.f32 %v3332_v46, %v3335_v10  ;;  %v5947_v46 = vld [vmem:[#allocation8 + $0x174] sm:$0xf0]  ;;  %v5954_v10 = vor.u32 %v6448_v43, %v5953_v47  ;;  %v6429_v47 = vld [vmem:[#allocation8 + $0xe0] sm:$0xf0]  ;;  %v6428_v43 = vld [vmem:[#allocation8 + $0xdc] sm:$0xf] }
0x1781   : > { %v5950_v48 = vor.u32 %v6446_v44, %v5947_v46  ;;  %v5873_v46 = vld [vmem:[#allocation8 + $0xd8] sm:$0xf] }
0x1782   : > { %v3337_v51 = vsel %vm1286_vm12, %v3336_v63, 0.0  ;;  %3746 = vmatpush.bf16.msra.mxu2 %v5954_v10  ;;  %v5875_v10 = vld [vmem:[#allocation8 + $0xe4] sm:$0xf0] }
0x1783   : > { %v3338_v52 = vmul.f32 %v3337_v51, %v3337_v51  ;;  %3733 = vmatpush.bf16.msra.mxu1 %v5950_v48  ;;  %v5874_v48 = vor.u32 %v6429_v47, %v5873_v46 }
0x1785   : > { %3339 = vadd.xlane.f32.xlu1 %v3338_v52 }
0x17f8   : > { %v3340_v2 = vpop.xlane.xlu1 %3339 }
0x17f9   : > { %v3341_v5 = vmul.f32 0.03125, %v3340_v2  ;;  %v5938_v2 = vor.u32 %v6443_v3, %v5935_v58  ;;  %v6425_v3 = vld [vmem:[#allocation8 + $0xc4] sm:$0xf]  ;;  %v5863_v58 = vld [vmem:[#allocation8 + $0xcc] sm:$0xf0] }
0x17fb   : > { %v3342_v56 = vadd.f32 1e-05, %v3341_v5  ;;  %v5942_v5 = vor.u32 %v6445_v62, %v5941_v60  ;;  %3734 = vmatpush.bf16.msra.mxu1 %v5938_v2  ;;  %v5869_v60 = vld [vmem:[#allocation8 + $0xc8] sm:$0xf]  ;;  %v6427_v62 = vld [vmem:[#allocation8 + $0xd0] sm:$0xf0]  ;;  %v5866_v2 = vor.u32 %v6425_v3, %v5863_v58 }
0x17fd   : > { %6738 = vrsqrt.f32 %v3342_v56  ;;  %vm3349_vm1 = vweird.f32 %v3342_v56  ;;  %3747 = vmatpush.bf16.msra.mxu2 %v5942_v5  ;;  %v5870_v5 = vor.u32 %v6427_v62, %v5869_v60 }
0x1803   : > { %v6739_v9 = vpop.eup %6738 }
0x1804   : > { %v3344_v31 = vmul.f32 %v6739_v9, %v3342_v56  ;;  %vm3350_vm0 = vweird.f32 %v6739_v9  ;;  %v6441_v56 = vld [vmem:[#allocation8 + $0x140] sm:$0xf0] }
0x1805   : > { %vm3351_vm2 = vmor %vm3349_vm1, %vm3350_vm0  ;;  %v5922_v29 = vor.u32 %v6441_v56, %v5921_v50 }
0x1806   : > { %v3345_v13 = vmul.f32 %v6739_v9, %v3344_v31  ;;  %v5929_v31 = vld [vmem:[#allocation8 + $0x140] sm:$0xf] }
0x1807   : > { %3722 = vmatpush.bf16.msra.mxu0 %v5922_v29 }
0x1808   : > { %v3346_v14 = vmul.f32 0.5, %v3345_v13 }
0x180a   : > { %v3347_v17 = vsub.f32 1.5, %v3346_v14  ;;  %v5930_v14 = vor.u32 %v6442_v12, %v5929_v31 }
0x180c   : > { %v3348_v59 = vmul.f32 %v6739_v9, %v3347_v17  ;;  %3748 = vmatpush.bf16.msra.mxu2 %v5930_v14  ;;  %v6438_v17 = vld [vmem:[#allocation8 + $0x128] sm:$0xf0] }
0x180e   : > { %v3352_v55 = vsel %vm3351_vm2, %v6739_v9, %v3348_v59  ;;  %v5923_v9 = vld [vmem:[#allocation8 + $0x144] sm:$0xf0]  ;;  %v6437_v59 = vld [vmem:[#allocation8 + $0x124] sm:$0xf] }
0x180f   : > { %v3353_v4 = vmul.f32 %v3352_v55, %v3336_v63  ;;  %v5926_v13 = vor.u32 %v6440_v8, %v5923_v9  ;;  %v5911_v55 = vld [vmem:[#allocation8 + $0x12c] sm:$0xf0] }
0x1811   : > { %v3355_v24 = vmul.f32 %v3354_v22, %v3353_v4  ;;  %3735 = vmatpush.bf16.msra.mxu1 %v5926_v13  ;;  %v5910_v22 = vor.u32 %v6438_v17, %v5909_v16  ;;  %v5917_v4 = vld [vmem:[#allocation8 + $0x128] sm:$0xf] }
0x1812   : > { %v2329_v13 = vld [vmem:[%s8106_s20 + $0x8] sm:$0x3] }
0x1813   : > { %v3357_v25 = vadd.f32 %v3356_v53, %v3355_v24  ;;  %v6439_v53 = vld [vmem:[#allocation8 + $0x130] sm:$0xf0]  ;;  %v5914_v24 = vor.u32 %v6437_v59, %v5911_v55  ;;  %3723 = vmatpush.bf16.msra.mxu0 %v5910_v22  ;;  %v3542_v17 = vperm.slane %v2329_v13, 0  ;;  %v3544_v22 = vperm.slane %v2329_v13, 1 }
0x1815   : > { %v3391_v26 = vpack.c.bf16 %v3357_v25, %v3357_v25  ;;  %3736 = vmatpush.bf16.msra.mxu1 %v5914_v24 }
0x1817   : > { %3451 = vmatmul.bf16.vlgmr.msrb.gmra.mxu2 %v3391_v26  ;;  %v5897_v26 = vld [vmem:[#allocation8 + $0x108] sm:$0xf] }
0x189a   : > { %v3452_v0 = vpop.f32.mrf.mxu2 }
0x189b   : > { %v3453_v30 = vadd.f32 %v6661_v1, %v3452_v0  ;;  %v5898_v1 = vor.u32 %v6435_v28, %v5897_v26  ;;  %v5899_v0 = vld [vmem:[#allocation8 + $0x114] sm:$0xf0] }
0x189d   : > { %v3456_v32 = vmax.f32 %v3453_v30, 0.0  ;;  %v5905_v30 = vld [vmem:[#allocation8 + $0x110] sm:$0xf]  ;;  %3724 = vmatpush.bf16.msra.mxu0 %v5898_v1 }
0x189f   : > { %v3457_v61 = vpack.c.bf16 %v3456_v32, %v3456_v32  ;;  %v6436_v32 = vld [vmem:[#allocation8 + $0x118] sm:$0xf0] }
0x18a1   : > { %3515 = vmatmul.bf16.vlgmr.msrb.gmra.mxu3 %v3457_v61  ;;  %v5902_v61 = vor.u32 %v6434_v19, %v5899_v0 }
0x18a2   : > { %v3454_v34 = vpop.f32.mrf.mxu2 }
0x18a3   : > { %v5906_v34 = vor.u32 %v6436_v32, %v5905_v30  ;;  %3737 = vmatpush.bf16.msra.mxu1 %v5902_v61 }
0x1924   : > { %v3516_v37 = vpop.f32.mrf.mxu3 }
0x1925   : > { %v3517_v38 = vadd.f32 %v3516_v37, %v3458_v27  ;;  %v5885_v27 = vld [vmem:[#allocation8 + $0xf0] sm:$0xf]  ;;  %v6432_v37 = vld [vmem:[#allocation8 + $0xf8] sm:$0xf0] }
0x1927   : > { %v3520_v42 = vadd.f32 %v3517_v38, %v3357_v25  ;;  %v5918_v25 = vor.u32 %v6439_v53, %v5917_v4  ;;  %v6431_v38 = vld [vmem:[#allocation8 + $0xf4] sm:$0xf] }
0x1929   : > { %3521 = vadd.xlane.f32.xlu2 %v3520_v42  ;;  %3749 = vmatpush.bf16.msra.mxu2 %v5918_v25  ;;  %v5858_v25 = vld [vmem:[%s8103_s17 + $0x3] sm:$0x7] }
0x192a   : > { %v3587_v26 = vperm.slane %v5858_v25, 1  ;;  %v3586_v1 = vperm.slane %v5858_v25, 0 }
0x192c   : > { %v3518_v39 = vpop.f32.mrf.mxu3 }
0x192d   : > { %3750 = vmatpush.bf16.msra.mxu2 %v5906_v34  ;;  %v5887_v39 = vld [vmem:[#allocation8 + $0xfc] sm:$0xf0] }
0x192e   : > { %v5890_v44 = vor.u32 %v6431_v38, %v5887_v39 }
0x1930   : > { %3738 = vmatpush.bf16.msra.mxu1 %v5890_v44 }
0x1931   : > { %3751 = vmatpush.bf16.msra.mxu2 %v5894_v45 }
0x199c   : > { %v3522_v63 = vpop.xlane.xlu2 %3521 }
0x199d   : > { %v3523_v51 = vmul.f32 0.03125, %v3522_v63  ;;  %v5881_v63 = vld [vmem:[#allocation8 + $0xe0] sm:$0xf] }
0x199f   : > { %v7880_v33 = vsub.f32 %v3520_v42, %v3523_v51  ;;  %v5886_v42 = vor.u32 %v6432_v37, %v5885_v27  ;;  %v6430_v51 = vld [vmem:[#allocation8 + $0xe8] sm:$0xf0] }
0x19a1   : > { %v3525_v52 = vsel %vm1286_vm12, %v7880_v33, 0.0  ;;  %3725 = vmatpush.bf16.msra.mxu0 %v5886_v42 }
0x19a2   : > { %v3526_v54 = vmul.f32 %v3525_v52, %v3525_v52  ;;  %v5878_v52 = vor.u32 %v6428_v43, %v5875_v10 }
0x19a4   : > { %3527 = vadd.xlane.f32.xlu0 %v3526_v54  ;;  %v5882_v54 = vor.u32 %v6430_v51, %v5881_v63  ;;  %3739 = vmatpush.bf16.msra.mxu1 %v5878_v52 }
0x19a5   : > { %3726 = vmatpush.bf16.msra.mxu0 %v5874_v48 }
0x19a6   : > { %3752 = vmatpush.bf16.msra.mxu2 %v5882_v54 }
0x19a8   : > { %3740 = vmatpush.bf16.msra.mxu1 %v5866_v2 }
0x19a9   : > { %3727 = vmatpush.bf16.msra.mxu0 %v5862_v6 }
0x19aa   : > { %3753 = vmatpush.bf16.msra.mxu2 %v5870_v5 }
0x1a17   : > { %v3528_v50 = vpop.xlane.xlu0 %3527 }
0x1a18   : > { %v3529_v56 = vmul.f32 0.03125, %v3528_v50 }
0x1a1a   : > { %v3530_v8 = vadd.f32 1e-05, %v3529_v56 }
0x1a1c   : > { %6740 = vrsqrt.f32 %v3530_v8  ;;  %vm3537_vm11 = vweird.f32 %v3530_v8 }
0x1a22   : > { %v6741_v29 = vpop.eup %6740 }
0x1a23   : > { %v3532_v9 = vmul.f32 %v6741_v29, %v3530_v8  ;;  %vm3538_vm3 = vweird.f32 %v6741_v29 }
0x1a24   : > { %vm3539_vm0 = vmor %vm3537_vm11, %vm3538_vm3 }
0x1a25   : > { %v3533_v31 = vmul.f32 %v6741_v29, %v3532_v9 }
0x1a27   : > { %v3534_v12 = vmul.f32 0.5, %v3533_v31 }
0x1a29   : > { %v3535_v14 = vsub.f32 1.5, %v3534_v12 }
0x1a2b   : > { %v3536_v16 = vmul.f32 %v6741_v29, %v3535_v14 }
0x1a2d   : > { %v3540_v59 = vsel %vm3539_vm0, %v6741_v29, %v3536_v16 }
0x1a2e   : > { %v3541_v55 = vmul.f32 %v3540_v59, %v7880_v33  ;;  %v3588_v33 = vperm.slane %v5858_v25, 2 }
0x1a30   : > { %v3543_v4 = vmul.f32 %v3542_v17, %v3541_v55 }
0x1a32   : > { %v7889_v53 = vadd.f32 %v3544_v22, %v3543_v4 }
0x1a34   : > { %v3584_v24 = vpack.c.bf16 %v7889_v53, %v7889_v53 }
0x1a36   : > { %3728 = vmatmul.bf16.vlgmr.msra.gmra.mxu0 %v3584_v24  ;;  %3741 = vmatmul.bf16.vlgmr.msra.gmra.mxu1 %v3584_v24 }
0x1a37   : > { %3754 = vmatmul.bf16.vlgmr.msra.gmra.mxu2 %v3584_v24 }
0x1ab3   : > { %v3729_v28 = vpop.f32.mrf.mxu0  ;;  %v3742_v19 = vpop.f32.mrf.mxu1 }
0x1ab4   : > { %v3743_v0 = vadd.f32 %v3742_v19, %v3587_v26  ;;  %v3730_v32 = vadd.f32 %v3729_v28, %v3586_v1  ;;  %v6094_v28 = vld [vmem:[#allocation13 + $0xf0] sm:$0xf]  ;;  %v6480_v19 = vld [vmem:[#allocation13 + $0xf4] sm:$0xf0] }
0x1ab6   : > { %v5956_v30 = vpack.c.bf16 %v3743_v0, %v3743_v0  ;;  %v7902_v38 = vpack.c.bf16 %v3730_v32, %v3730_v32 }
0x1ab8   : > { %5957 = vmatpush.bf16.xpose.msk.msra.mxu3 %vm7498_vm7, %v5956_v30  ;;  %5960 = vmatpush.bf16.xpose.msk.msrb.mxu0 %vm7512_vm9, %v5956_v30 }
0x1ab9   : > { %5965 = vmatpush.bf16.xpose.msk.msrb.mxu1 %vm7505_vm8, %v5956_v30 }
0x1aba   : > { %v3755_v61 = vpop.f32.mrf.mxu2 }
0x1abb   : > { %v3756_v34 = vadd.f32 %v3755_v61, %v3588_v33  ;;  %v3731_v27 = vpop.f32.mrf.mxu0  ;;  %v3744_v37 = vpop.f32.mrf.mxu1  ;;  %v6095_v33 = vor.u32 %v6480_v19, %v6094_v28  ;;  %v6086_v61 = vld [vmem:[#allocation13 + $0xe0] sm:$0xf] }
0x1abd   : > { %v3809_v42 = vsel %vm7491_vm6, %v3756_v34, 0.0  ;;  %v3779_v39 = vsel %vm1121_vm4, %v3756_v34, 0.0  ;;  %v3877_v40 = vsel %vm7487_vm5, %v3756_v34, 0.0  ;;  %v3927_v41 = vsel %vm7533_vm13, %v3756_v34, 0.0  ;;  %v6478_v34 = vld [vmem:[#allocation13 + $0xe4] sm:$0xf0] }
0x1abe   : > { %v3810_v44 = vpack.c.bf16 %v3809_v42, %v3809_v42  ;;  %v3780_v45 = vpack.c.bf16 %v3779_v39, %v3779_v39  ;;  %v3878_v46 = vpack.c.bf16 %v3877_v40, %v3877_v40  ;;  %v3928_v47 = vpack.c.bf16 %v3927_v41, %v3927_v41  ;;  %v6078_v39 = vld [vmem:[#allocation13 + $0xd0] sm:$0xf]  ;;  %v6476_v40 = vld [vmem:[#allocation13 + $0xd4] sm:$0xf0] }
0x1abf   : > { %3789 = vmatmul.bf16.vlgmr.msra.gmra.mxu3 %v7902_v38  ;;  %3819 = vmatmul.bf16.vlgmr.msrb.gmra.mxu0 %v7902_v38  ;;  %v6087_v37 = vor.u32 %v6478_v34, %v6086_v61  ;;  %v7936_v34 = vld [vmem:[%s8104_s18 + $0x2] sm:$0x3] }
0x1ac0   : > { %3887 = vmatmul.bf16.vlgmr.msrb.gmra.mxu1 %v7902_v38  ;;  %v3841_v43 = vsel %vm1194_vm10, %v3810_v44, 0  ;;  %v3860_v48 = vsel %vm1194_vm10, %v3780_v45, 0  ;;  %v3909_v10 = vsel %vm1194_vm10, %v3878_v46, 0  ;;  %v3959_v63 = vsel %vm1194_vm10, %v3928_v47, 0 }
0x1ac1   : > { %3850 = vmatpush.bf16.msrb.mxu3 %v3841_v43  ;;  %3869 = vmatpush.bf16.msra.mxu0 %v3860_v48  ;;  %v6079_v46 = vor.u32 %v6476_v40, %v6078_v39  ;;  %v6070_v43 = vld [vmem:[#allocation13 + $0xc0] sm:$0xf]  ;;  %v6474_v48 = vld [vmem:[#allocation13 + $0xc4] sm:$0xf0] }
0x1ac2   : > { %3918 = vmatpush.bf16.msrb.mxu2 %v3909_v10  ;;  %v3757_v51 = vpop.f32.mrf.mxu2  ;;  %v6071_v10 = vor.u32 %v6474_v48, %v6070_v43 }
0x1ac3   : > { %v6472_v51 = vld [vmem:[#allocation13 + $0xb4] sm:$0xf0] }
0x1ac5   : > { %5969 = vmatpush.bf16.xpose.msk.msra.mxu3 %vm7540_vm14, %v5956_v30  ;;  %3968 = vmatpush.bf16.msrb.mxu0 %v3959_v63  ;;  %v6062_v63 = vld [vmem:[#allocation13 + $0xb0] sm:$0xf] }
0x1b3c   : > { %v3820_v52 = vpop.f32.mrf.mxu0 }
0x1b3d   : > { %v3824_v54 = vmul.f32 0.35355338, %v3820_v52  ;;  %v3888_v57 = vpop.f32.mrf.mxu1  ;;  %v6063_v52 = vor.u32 %v6472_v51, %v6062_v63  ;;  %v6477_v63 = vld [vmem:[#allocation13 + $0xe4] sm:$0xf] }
0x1b3e   : > { %v3892_v6 = vmul.f32 0.35355338, %v3888_v57  ;;  %v6470_v57 = vld [vmem:[#allocation13 + $0xa4] sm:$0xf0]  ;;  %v6091_v51 = vor.u32 %v6477_v63, %v6088_v20  ;;  %v4060_v63 = vperm.slane %v7969_v18, 4 }
0x1b3f   : > { %v3825_v49 = vsel %vm1143_vm15, %v3824_v54, -inf }
0x1b40   : > { %3826 = vmax.xlane.f32.xlu1 %v3825_v49  ;;  %v3893_v5 = vsel %vm1143_vm15, %v3892_v6, -inf }
0x1b42   : > { %v3790_v3 = vpop.f32.mrf.mxu3 }
0x1b43   : > { %v3794_v58 = vmul.f32 0.35355338, %v3790_v3  ;;  %v6046_v3 = vld [vmem:[#allocation13 + $0x90] sm:$0xf] }
0x1b44   : > { %v3822_v60 = vpop.f32.mrf.mxu0 }
0x1b45   : > { %v3890_v62 = vpop.f32.mrf.mxu1  ;;  %v3795_v2 = vsel %vm1143_vm15, %v3794_v58, -inf  ;;  %v6038_v60 = vld [vmem:[#allocation13 + $0x80] sm:$0xf] }
0x1b46   : > { %3796 = vmax.xlane.f32.xlu0 %v3795_v2  ;;  %v6466_v62 = vld [vmem:[#allocation13 + $0x84] sm:$0xf0] }
0x1b47   : > { %v6039_v2 = vor.u32 %v6466_v62, %v6038_v60  ;;  %v6469_v60 = vld [vmem:[#allocation13 + $0xa4] sm:$0xf] }
0x1b48   : > { %3894 = vmax.xlane.f32.xlu1 %v3893_v5  ;;  %v6456_v5 = vld [vmem:[#allocation10 + $0x78] sm:$0xff] }
0x1b49   : > { %4025 = vmatpush.bf16.msra.mxu1 %v6456_v5 }
0x1b4a   : > { %v3792_v50 = vpop.f32.mrf.mxu3 }
0x1b4b   : > { %v6464_v50 = vld [vmem:[#allocation11 + $0x78] sm:$0xff] }
0x1b4c   : > { %4131 = vmatpush.bf16.msra.mxu2 %v6464_v50  ;;  %v6467_v50 = vld [vmem:[#allocation13 + $0x94] sm:$0xf] }
0x1bb3   : > { %v3827_v56 = vpop.xlane.xlu1 %3826 }
0x1bb4   : > { %v3828_v8 = vsub.f32 %v3824_v54, %v3827_v56  ;;  %v6054_v54 = vld [vmem:[#allocation13 + $0xa0] sm:$0xf]  ;;  %v6455_v56 = vld [vmem:[#allocation10 + $0x70] sm:$0xff] }
0x1bb5   : > { %v6055_v49 = vor.u32 %v6470_v57, %v6054_v54  ;;  %4026 = vmatpush.bf16.msra.mxu1 %v6455_v56  ;;  %v6473_v57 = vld [vmem:[#allocation13 + $0xc4] sm:$0xf]  ;;  %v6048_v56 = vld [vmem:[#allocation13 + $0x98] sm:$0xf0] }
0x1bb6   : > { %v3829_v29 = vmul.f32 1.442695, %v3828_v8  ;;  %v6463_v8 = vld [vmem:[#allocation11 + $0x70] sm:$0xff] }
0x1bb7   : > { %4132 = vmatpush.bf16.msra.mxu2 %v6463_v8  ;;  %v6051_v8 = vor.u32 %v6467_v50, %v6048_v56  ;;  %v7993_v56 = vld [vmem:[%s8174_s22] sm:$0xff] }
0x1bb8   : > { %6742 = vpow2.f32 %v3829_v29  ;;  %v6462_v29 = vld [vmem:[#allocation11 + $0x68] sm:$0xff] }
0x1bb9   : > { %v3797_v9 = vpop.xlane.xlu0 %3796 }
0x1bba   : > { %v3798_v31 = vsub.f32 %v3794_v58, %v3797_v9  ;;  %v6453_v9 = vld [vmem:[#allocation10 + $0x60] sm:$0xff] }
0x1bbb   : > { %v3895_v12 = vpop.xlane.xlu1 %3894  ;;  %4133 = vmatpush.bf16.msra.mxu2 %v6462_v29  ;;  %v6040_v29 = vld [vmem:[#allocation13 + $0x88] sm:$0xf0] }
0x1bbc   : > { %v3799_v13 = vmul.f32 1.442695, %v3798_v31  ;;  %v3896_v14 = vsub.f32 %v3892_v6, %v3895_v12  ;;  %v6468_v6 = vld [vmem:[#allocation13 + $0x94] sm:$0xf0]  ;;  %v6461_v31 = vld [vmem:[#allocation11 + $0x60] sm:$0xff] }
0x1bbd   : > { %v6047_v58 = vor.u32 %v6468_v6, %v6046_v3  ;;  %v6452_v12 = vld [vmem:[#allocation10 + $0x58] sm:$0xff]  ;;  %v6471_v6 = vld [vmem:[#allocation13 + $0xb4] sm:$0xf] }
0x1bbe   : > { %v6743_v16 = vpop.eup %6742  ;;  %6744 = vpow2.f32 %v3799_v13  ;;  %v3897_v17 = vmul.f32 1.442695, %v3896_v14  ;;  %v6460_v13 = vld [vmem:[#allocation11 + $0x58] sm:$0xff]  ;;  %v6451_v14 = vld [vmem:[#allocation10 + $0x50] sm:$0xff] }
0x1bbf   : > { %v3831_v59 = vsel %vm1143_vm15, %v6743_v16, 0.0  ;;  %4134 = vmatpush.bf16.msra.mxu2 %v6461_v31 }
0x1bc0   : > { %6746 = vpow2.f32 %v3897_v17  ;;  %3832 = vadd.xlane.f32.xlu2 %v3831_v59  ;;  %v6450_v17 = vld [vmem:[#allocation10 + $0x48] sm:$0xff] }
0x1bc1   : > { %v6458_v59 = vld [vmem:[#allocation11 + $0x48] sm:$0xff] }
0x1bc3   : > { %4135 = vmatpush.bf16.msra.mxu2 %v6460_v13 }
0x1bc4   : > { %v6745_v22 = vpop.eup %6744 }
0x1bc5   : > { %v3801_v55 = vsel %vm1143_vm15, %v6745_v22, 0.0 }
0x1bc6   : > { %v6747_v4 = vpop.eup %6746  ;;  %3802 = vadd.xlane.f32.xlu0 %v3801_v55 }
0x1bc7   : > { %v3899_v24 = vsel %vm1143_vm15, %v6747_v4, 0.0 }
0x1bc8   : > { %3900 = vadd.xlane.f32.xlu1 %v3899_v24  ;;  %v6449_v24 = vld [vmem:[#allocation10 + $0x40] sm:$0xff] }
0x1c33   : > { %v3833_v25 = vpop.xlane.xlu2 %3832 }
0x1c34   : > { %6748 = vrcp.f32 %v3833_v25  ;;  %v6457_v25 = vld [vmem:[#allocation11 + $0x40] sm:$0xff] }
0x1c39   : > { %v3803_v26 = vpop.xlane.xlu0 %3802 }
0x1c3a   : > { %v6749_v1 = vpop.eup %6748  ;;  %6750 = vrcp.f32 %v3803_v26 }
0x1c3b   : > { %v3835_v0 = vmul.f32 %v6749_v1, %v6743_v16  ;;  %v3901_v30 = vpop.xlane.xlu1 %3900  ;;  %v6459_v16 = vld [vmem:[#allocation11 + $0x50] sm:$0xff] }
0x1c3c   : > { %6752 = vrcp.f32 %v3901_v30  ;;  %4136 = vmatpush.bf16.msra.mxu2 %v6459_v16 }
0x1c3d   : > { %v3836_v32 = vpack.c.bf16 %v3835_v0, %v3835_v0 }
0x1c3f   : > { %5961 = vmatmul.msk.bf16.vlgmr.msrb.gmra.mxu3 %vm1143_vm15, %v3836_v32 }
0x1c40   : > { %v6751_v27 = vpop.eup %6750  ;;  %4248 = vmatpush.bf16.msrb.mxu3 %v6095_v33  ;;  %4137 = vmatpush.bf16.msra.mxu2 %v6458_v59 }
0x1c41   : > { %v3805_v42 = vmul.f32 %v6751_v27, %v6745_v22  ;;  %v4164_v27 = vperm.slane %v7936_v34, 0 }
0x1c42   : > { %v6753_v41 = vpop.eup %6752 }
0x1c43   : > { %v3806_v44 = vpack.c.bf16 %v3805_v42, %v3805_v42  ;;  %v3903_v45 = vmul.f32 %v6753_v41, %v6747_v4  ;;  %v6479_v41 = vld [vmem:[#allocation13 + $0xf4] sm:$0xf] }
0x1c44   : > { %4249 = vmatpush.bf16.msrb.mxu3 %v6087_v37  ;;  %4138 = vmatpush.bf16.msra.mxu2 %v6457_v25 }
0x1c45   : > { %v3904_v47 = vpack.c.bf16 %v3903_v45, %v3903_v45  ;;  %5962 = vmatmul.msk.bf16.vlgmr.msra.gmra.mxu0 %vm1143_vm15, %v3806_v44  ;;  %v6096_v44 = vld [vmem:[#allocation13 + $0xf8] sm:$0xf0] }
0x1c46   : > { %v6099_v45 = vor.u32 %v6479_v41, %v6096_v44 }
0x1c47   : > { %5966 = vmatmul.msk.bf16.vlgmr.msrb.gmra.mxu2 %vm1143_vm15, %v3904_v47 }
0x1c48   : > { %4250 = vmatpush.bf16.msrb.mxu3 %v6079_v46  ;;  %4261 = vmatpush.bf16.msra.mxu0 %v6099_v45 }
0x1c4c   : > { %4251 = vmatpush.bf16.msrb.mxu3 %v6071_v10  ;;  %4262 = vmatpush.bf16.msra.mxu0 %v6091_v51  ;;  %v4062_v51 = vperm.slane %v7969_v18, 5 }
0x1c4f   : > { %3937 = vmatmul.bf16.vlgmr.msra.gmra.mxu3 %v7902_v38  ;;  %v6454_v38 = vld [vmem:[#allocation10 + $0x68] sm:$0xff] }
0x1c50   : > { %4252 = vmatpush.bf16.msrb.mxu3 %v6063_v52  ;;  %4027 = vmatpush.bf16.msra.mxu1 %v6454_v38  ;;  %v6475_v52 = vld [vmem:[#allocation13 + $0xd4] sm:$0xf]  ;;  %v6465_v38 = vld [vmem:[#allocation13 + $0x84] sm:$0xf] }
0x1c51   : > { %v6083_v54 = vor.u32 %v6475_v52, %v6080_v23 }
0x1c53   : > { %4263 = vmatpush.bf16.msra.mxu0 %v6083_v54 }
0x1c54   : > { %4253 = vmatpush.bf16.msrb.mxu3 %v6055_v49  ;;  %4028 = vmatpush.bf16.msra.mxu1 %v6453_v9  ;;  %v6072_v49 = vld [vmem:[#allocation13 + $0xc8] sm:$0xf0]  ;;  %v6043_v9 = vor.u32 %v6465_v38, %v6040_v29 }
0x1c55   : > { %v6075_v3 = vor.u32 %v6473_v57, %v6072_v49 }
0x1c57   : > { %4264 = vmatpush.bf16.msra.mxu0 %v6075_v3 }
0x1c58   : > { %4254 = vmatpush.bf16.msrb.mxu3 %v6047_v58  ;;  %4029 = vmatpush.bf16.msra.mxu1 %v6452_v12  ;;  %v6064_v58 = vld [vmem:[#allocation13 + $0xb8] sm:$0xf0] }
0x1c59   : > { %v6067_v62 = vor.u32 %v6471_v6, %v6064_v58  ;;  %v4082_v58 = vperm.slane %v7969_v18, 1 }
0x1c5b   : > { %4265 = vmatpush.bf16.msra.mxu0 %v6067_v62 }
0x1c5c   : > { %4255 = vmatpush.bf16.msrb.mxu3 %v6039_v2  ;;  %4030 = vmatpush.bf16.msra.mxu1 %v6451_v14  ;;  %v6056_v2 = vld [vmem:[#allocation13 + $0xa8] sm:$0xf0] }
0x1c5d   : > { %v6059_v5 = vor.u32 %v6469_v60, %v6056_v2 }
0x1c5f   : > { %4256 = vmatmul.bf16.vlgmr.msrb.gmra.mxu3 %v7798_v7  ;;  %4266 = vmatpush.bf16.msra.mxu0 %v6059_v5 }
0x1c60   : > { %4031 = vmatpush.bf16.msra.mxu1 %v6450_v17 }
0x1c63   : > { %4267 = vmatpush.bf16.msra.mxu0 %v6051_v8 }
0x1c64   : > { %4032 = vmatpush.bf16.msra.mxu1 %v6449_v24 }
0x1c67   : > { %4268 = vmatpush.bf16.msra.mxu0 %v6043_v9 }
0x1cc2   : > { %v3852_v22 = vpop.f32.mrf.mxu3  ;;  %v3871_v55 = vpop.f32.mrf.mxu0 }
0x1cc3   : > { %v3872_v4 = vadd.f32 %v3871_v55, %v3852_v22  ;;  %v4165_v55 = vperm.slane %v7936_v34, 1 }
0x1cca   : > { %v3854_v26 = vpop.f32.mrf.mxu3  ;;  %v3873_v28 = vpop.f32.mrf.mxu0 }
0x1ccb   : > { %v3920_v19 = vpop.f32.mrf.mxu2 }
0x1ccc   : > { %v3924_v1 = vadd.f32 %v3920_v19, %v3872_v4 }
0x1cd2   : > { %v3938_v0 = vpop.f32.mrf.mxu3 }
0x1cd3   : > { %v3922_v30 = vpop.f32.mrf.mxu2  ;;  %v3942_v33 = vmul.f32 0.35355338, %v3938_v0 }
0x1cd5   : > { %v3943_v32 = vsel %vm1143_vm15, %v3942_v33, -inf }
0x1cd6   : > { %3944 = vmax.xlane.f32.xlu2 %v3943_v32 }
0x1cda   : > { %v3940_v61 = vpop.f32.mrf.mxu3 }
0x1ce2   : > { %v4257_v37 = vpop.f32.mrf.mxu3 }
0x1ce3   : > { %v4258_v42 = vadd.f32 %v4257_v37, %v4164_v27 }
0x1ce5   : > { %v7939_v39 = vpack.c.bf16 %v4258_v42, %v4258_v42 }
0x1ce7   : > { %6102 = vmatpush.bf16.xpose.msk.msrb.mxu1 %vm7498_vm7, %v7939_v39  ;;  %6105 = vmatpush.bf16.xpose.msk.msrb.mxu2 %vm7512_vm9, %v7939_v39 }
0x1cea   : > { %v4259_v40 = vpop.f32.mrf.mxu3 }
0x1d49   : > { %v3945_v46 = vpop.xlane.xlu2 %3944 }
0x1d4a   : > { %v3946_v47 = vsub.f32 %v3942_v33, %v3945_v46 }
0x1d4c   : > { %v3947_v43 = vmul.f32 1.442695, %v3946_v47 }
0x1d4e   : > { %6754 = vpow2.f32 %v3947_v43 }
0x1d54   : > { %v6755_v48 = vpop.eup %6754 }
0x1d55   : > { %v3949_v10 = vsel %vm1143_vm15, %v6755_v48, 0.0 }
0x1d56   : > { %3950 = vadd.xlane.f32.xlu2 %v3949_v10 }
0x1dc9   : > { %v3951_v31 = vpop.xlane.xlu2 %3950 }
0x1dca   : > { %6756 = vrcp.f32 %v3951_v31 }
0x1dd0   : > { %v6757_v12 = vpop.eup %6756 }
0x1dd1   : > { %v3953_v13 = vmul.f32 %v6757_v12, %v6755_v48 }
0x1dd3   : > { %v3954_v14 = vpack.c.bf16 %v3953_v13, %v3953_v13 }
0x1dd5   : > { %5970 = vmatmul.msk.bf16.vlgmr.msrb.gmra.mxu0 %vm1143_vm15, %v3954_v14 }
0x1de5   : > { %4269 = vmatmul.bf16.vlgmr.msra.gmra.mxu0 %v7798_v7 }
0x1e52   : > { %v3970_v16 = vpop.f32.mrf.mxu0 }
0x1e53   : > { %v3974_v17 = vadd.f32 %v3970_v16, %v3924_v1 }
0x1e55   : > { %v3975_v59 = vpack.c.bf16 %v3974_v17, %v3974_v17 }
0x1e57   : > { %4033 = vmatmul.bf16.vlgmr.msra.gmra.mxu1 %v3975_v59 }
0x1e58   : > { %6110 = vmatpush.bf16.xpose.msk.msra.mxu1 %vm7505_vm8, %v7939_v39 }
0x1e5a   : > { %v3972_v22 = vpop.f32.mrf.mxu0 }
0x1e62   : > { %v4270_v4 = vpop.f32.mrf.mxu0 }
0x1e63   : > { %v4271_v24 = vadd.f32 %v4270_v4, %v4165_v55 }
0x1e65   : > { %v4325_v25 = vsel %vm7491_vm6, %v4271_v24, 0.0  ;;  %v4294_v26 = vsel %vm1121_vm4, %v4271_v24, 0.0  ;;  %v4445_v7 = vsel %vm7533_vm13, %v4271_v24, 0.0  ;;  %v4394_v23 = vsel %vm7487_vm5, %v4271_v24, 0.0 }
0x1e66   : > { %v4326_v28 = vpack.c.bf16 %v4325_v25, %v4325_v25  ;;  %v4295_v19 = vpack.c.bf16 %v4294_v26, %v4294_v26  ;;  %v4446_v1 = vpack.c.bf16 %v4445_v7, %v4445_v7  ;;  %v4395_v49 = vpack.c.bf16 %v4394_v23, %v4394_v23 }
0x1e68   : > { %v4358_v21 = vsel %vm1194_vm10, %v4326_v28, 0  ;;  %v4377_v0 = vsel %vm1194_vm10, %v4295_v19, 0  ;;  %v4478_v30 = vsel %vm1194_vm10, %v4446_v1, 0  ;;  %v4427_v6 = vsel %vm1194_vm10, %v4395_v49, 0 }
0x1e69   : > { %4367 = vmatpush.bf16.msra.mxu3 %v4358_v21  ;;  %4386 = vmatpush.bf16.msrb.mxu0 %v4377_v0 }
0x1e6a   : > { %v4272_v33 = vpop.f32.mrf.mxu0 }
0x1e6d   : > { %6114 = vmatpush.bf16.xpose.msk.msrb.mxu3 %vm7540_vm14, %v7939_v39  ;;  %4487 = vmatpush.bf16.msra.mxu0 %v4478_v30 }
0x1ed4   : > { %v4034_v32 = vpop.f32.mrf.mxu1 }
0x1ed5   : > { %v4035_v61 = vadd.f32 %v4034_v32, %v3976_v35 }
0x1ed7   : > { %v4038_v34 = vadd.f32 %v4035_v61, %v7889_v53 }
0x1ed9   : > { %4039 = vadd.xlane.f32.xlu0 %v4038_v34 }
0x1edc   : > { %v4036_v27 = vpop.f32.mrf.mxu1 }
0x1f4c   : > { %v4040_v37 = vpop.xlane.xlu0 %4039 }
0x1f4d   : > { %v4041_v42 = vmul.f32 0.03125, %v4040_v37 }
0x1f4f   : > { %v4042_v40 = vsub.f32 %v4038_v34, %v4041_v42 }
0x1f51   : > { %v4043_v36 = vsel %vm1286_vm12, %v4042_v40, 0.0 }
0x1f52   : > { %v4044_v39 = vmul.f32 %v4043_v36, %v4043_v36 }
0x1f54   : > { %4045 = vadd.xlane.f32.xlu1 %v4044_v39 }
0x1fc7   : > { %v4046_v41 = vpop.xlane.xlu1 %4045 }
0x1fc8   : > { %v4047_v44 = vmul.f32 0.03125, %v4046_v41 }
0x1fca   : > { %v4048_v45 = vadd.f32 1e-05, %v4047_v44 }
0x1fcc   : > { %6758 = vrsqrt.f32 %v4048_v45  ;;  %vm4055_vm6 = vweird.f32 %v4048_v45 }
0x1fd2   : > { %v6759_v46 = vpop.eup %6758 }
0x1fd3   : > { %v4050_v47 = vmul.f32 %v6759_v46, %v4048_v45  ;;  %vm4056_vm4 = vweird.f32 %v6759_v46 }
0x1fd4   : > { %vm4057_vm7 = vmor %vm4055_vm6, %vm4056_vm4 }
0x1fd5   : > { %v4051_v43 = vmul.f32 %v6759_v46, %v4050_v47 }
0x1fd7   : > { %v4052_v48 = vmul.f32 0.5, %v4051_v43 }
0x1fd9   : > { %v4053_v10 = vsub.f32 1.5, %v4052_v48 }
0x1fdb   : > { %v4054_v53 = vmul.f32 %v6759_v46, %v4053_v10 }
0x1fdd   : > { %v4058_v20 = vsel %vm4057_vm7, %v6759_v46, %v4054_v53 }
0x1fde   : > { %v4059_v52 = vmul.f32 %v4058_v20, %v4042_v40 }
0x1fe0   : > { %v4061_v54 = vmul.f32 %v4060_v63, %v4059_v52 }
0x1fe2   : > { %v7979_v57 = vadd.f32 %v4062_v51, %v4061_v54 }
0x1fe4   : > { %v4064_v3 = vpack.c.bf16 %v7979_v57, %v7979_v57 }
0x1fe6   : > { %4139 = vmatmul.bf16.vlgmr.msra.gmra.mxu2 %v4064_v3 }
0x1fe7   : > { %4436 = vmatpush.bf16.msra.mxu2 %v4427_v6 }
0x2069   : > { %v4140_v60 = vpop.f32.mrf.mxu2 }
0x206a   : > { %v4141_v62 = vadd.f32 %v4140_v60, %v4082_v58 }
0x206c   : > { %v7985_v2 = vpack.c.bf16 %v4141_v62, %v4141_v62 }
0x206e   : > { %4304 = vmatmul.bf16.vlgmr.msrb.gmra.mxu1 %v7985_v2  ;;  %4335 = vmatmul.bf16.vlgmr.msrb.gmra.mxu2 %v7985_v2 }
0x2071   : > { %v4142_v15 = vpop.f32.mrf.mxu2 }
0x207e   : > { %4404 = vmatmul.bf16.vlgmr.msra.gmra.mxu1 %v7985_v2 }
0x20eb   : > { %v4305_v5 = vpop.f32.mrf.mxu1 }
0x20ec   : > { %v4309_v50 = vmul.f32 0.35355338, %v4305_v5  ;;  %v6488_v5 = vld [vmem:[#allocation14 + $0x78] sm:$0xff] }
0x20ed   : > { %4544 = vmatpush.bf16.msrb.mxu1 %v6488_v5 }
0x20ee   : > { %v4310_v8 = vadd.f32 %v7993_v56, %v4309_v50  ;;  %v6487_v50 = vld [vmem:[#allocation14 + $0x70] sm:$0xff] }
0x20f0   : > { %v4311_v38 = vsel %vm1143_vm15, %v4310_v8, -inf }
0x20f1   : > { %v4336_v29 = vpop.f32.mrf.mxu2  ;;  %4312 = vmax.xlane.f32.xlu1 %v4311_v38  ;;  %4545 = vmatpush.bf16.msrb.mxu1 %v6487_v50  ;;  %v6485_v38 = vld [vmem:[#allocation14 + $0x60] sm:$0xff] }
0x20f2   : > { %v4340_v9 = vmul.f32 0.35355338, %v4336_v29  ;;  %v6483_v29 = vld [vmem:[#allocation14 + $0x50] sm:$0xff] }
0x20f3   : > { %v4307_v31 = vpop.f32.mrf.mxu1 }
0x20f4   : > { %v4341_v12 = vadd.f32 %v7993_v56, %v4340_v9  ;;  %v6482_v31 = vld [vmem:[#allocation14 + $0x48] sm:$0xff] }
0x20f6   : > { %v4342_v13 = vsel %vm1143_vm15, %v4341_v12, -inf }
0x20f7   : > { %4343 = vmax.xlane.f32.xlu2 %v4342_v13 }
0x20f9   : > { %v4338_v14 = vpop.f32.mrf.mxu2 }
0x20fb   : > { %v4405_v16 = vpop.f32.mrf.mxu1 }
0x20fc   : > { %v4409_v17 = vmul.f32 0.35355338, %v4405_v16  ;;  %v6481_v16 = vld [vmem:[#allocation14 + $0x40] sm:$0xff] }
0x20fe   : > { %v4410_v59 = vadd.f32 %v7993_v56, %v4409_v17 }
0x2100   : > { %v4411_v22 = vsel %vm1143_vm15, %v4410_v59, -inf }
0x2101   : > { %4412 = vmax.xlane.f32.xlu2 %v4411_v22 }
0x2103   : > { %v4407_v55 = vpop.f32.mrf.mxu1 }
0x2164   : > { %v4313_v4 = vpop.xlane.xlu1 %4312 }
0x2165   : > { %v4314_v24 = vsub.f32 %v4310_v8, %v4313_v4  ;;  %v6486_v8 = vld [vmem:[#allocation14 + $0x68] sm:$0xff]  ;;  %v4495_v4 = vperm.slane %v7969_v18, 2 }
0x2166   : > { %4546 = vmatpush.bf16.msrb.mxu1 %v6486_v8  ;;  %v4686_v8 = vperm.slane %v7969_v18, 3 }
0x2167   : > { %v4315_v25 = vmul.f32 1.442695, %v4314_v24 }
0x2169   : > { %6760 = vpow2.f32 %v4315_v25 }
0x216a   : > { %v4344_v26 = vpop.xlane.xlu2 %4343  ;;  %4547 = vmatpush.bf16.msrb.mxu1 %v6485_v38 }
0x216b   : > { %v4345_v7 = vsub.f32 %v4341_v12, %v4344_v26 }
0x216d   : > { %v4346_v28 = vmul.f32 1.442695, %v4345_v7 }
0x216f   : > { %v6761_v19 = vpop.eup %6760  ;;  %6762 = vpow2.f32 %v4346_v28  ;;  %v6496_v28 = vld [vmem:[#allocation16 + $0x78] sm:$0xff] }
0x2170   : > { %v4317_v1 = vsel %vm1143_vm15, %v6761_v19, 0.0  ;;  %4671 = vmatpush.bf16.msrb.mxu2 %v6496_v28 }
0x2171   : > { %4318 = vadd.xlane.f32.xlu1 %v4317_v1 }
0x2174   : > { %v4413_v21 = vpop.xlane.xlu2 %4412 }
0x2175   : > { %v6763_v0 = vpop.eup %6762  ;;  %v4414_v30 = vsub.f32 %v4410_v59, %v4413_v21 }
0x2176   : > { %v4348_v33 = vsel %vm1143_vm15, %v6763_v0, 0.0 }
0x2177   : > { %v4415_v35 = vmul.f32 1.442695, %v4414_v30  ;;  %4349 = vadd.xlane.f32.xlu0 %v4348_v33  ;;  %v6495_v33 = vld [vmem:[#allocation16 + $0x70] sm:$0xff] }
0x2178   : > { %4672 = vmatpush.bf16.msrb.mxu2 %v6495_v33 }
0x2179   : > { %6764 = vpow2.f32 %v4415_v35  ;;  %v6494_v35 = vld [vmem:[#allocation16 + $0x68] sm:$0xff] }
0x217c   : > { %4673 = vmatpush.bf16.msrb.mxu2 %v6494_v35 }
0x217f   : > { %v6765_v32 = vpop.eup %6764 }
0x2180   : > { %v4417_v61 = vsel %vm1143_vm15, %v6765_v32, 0.0 }
0x2181   : > { %4418 = vadd.xlane.f32.xlu2 %v4417_v61  ;;  %v6492_v61 = vld [vmem:[#allocation16 + $0x58] sm:$0xff] }
0x21e4   : > { %v4319_v34 = vpop.xlane.xlu1 %4318 }
0x21e5   : > { %6766 = vrcp.f32 %v4319_v34  ;;  %v6490_v34 = vld [vmem:[#allocation16 + $0x48] sm:$0xff] }
0x21ea   : > { %v4350_v27 = vpop.xlane.xlu0 %4349 }
0x21eb   : > { %v6767_v37 = vpop.eup %6766  ;;  %6768 = vrcp.f32 %v4350_v27  ;;  %v6489_v27 = vld [vmem:[#allocation16 + $0x40] sm:$0xff] }
0x21ec   : > { %v4321_v42 = vmul.f32 %v6767_v37, %v6761_v19  ;;  %v6504_v37 = vld [vmem:[#allocation17 + $0x78] sm:$0xff] }
0x21ee   : > { %v4322_v40 = vpack.c.bf16 %v4321_v42, %v4321_v42 }
0x21f0   : > { %6107 = vmatmul.msk.bf16.vlgmr.msrb.gmra.mxu0 %vm1143_vm15, %v4322_v40 }
0x21f1   : > { %v6769_v36 = vpop.eup %6768 }
0x21f2   : > { %v4352_v39 = vmul.f32 %v6769_v36, %v6763_v0  ;;  %v6503_v36 = vld [vmem:[#allocation17 + $0x70] sm:$0xff] }
0x21f4   : > { %v4353_v41 = vpack.c.bf16 %v4352_v39, %v4352_v39  ;;  %v4419_v44 = vpop.xlane.xlu2 %4418 }
0x21f5   : > { %6770 = vrcp.f32 %v4419_v44  ;;  %v6501_v44 = vld [vmem:[#allocation17 + $0x60] sm:$0xff] }
0x21f6   : > { %6106 = vmatmul.msk.bf16.vlgmr.msra.gmra.mxu3 %vm1143_vm15, %v4353_v41  ;;  %v6502_v41 = vld [vmem:[#allocation17 + $0x68] sm:$0xff] }
0x21f7   : > { %4735 = vmatpush.bf16.msra.mxu3 %v6504_v37 }
0x21fb   : > { %v6771_v45 = vpop.eup %6770  ;;  %4736 = vmatpush.bf16.msra.mxu3 %v6503_v36 }
0x21fc   : > { %v4421_v46 = vmul.f32 %v6771_v45, %v6765_v32  ;;  %v6493_v32 = vld [vmem:[#allocation16 + $0x60] sm:$0xff] }
0x21fd   : > { %4674 = vmatpush.bf16.msrb.mxu2 %v6493_v32 }
0x21fe   : > { %v4422_v47 = vpack.c.bf16 %v4421_v46, %v4421_v46 }
0x21ff   : > { %4737 = vmatpush.bf16.msra.mxu3 %v6502_v41 }
0x2200   : > { %6111 = vmatmul.msk.bf16.vlgmr.msra.gmra.mxu2 %vm1143_vm15, %v4422_v47  ;;  %v6500_v47 = vld [vmem:[#allocation17 + $0x58] sm:$0xff] }
0x2201   : > { %4675 = vmatpush.bf16.msrb.mxu2 %v6492_v61 }
0x2203   : > { %4738 = vmatpush.bf16.msra.mxu3 %v6501_v44 }
0x2206   : > { %4455 = vmatmul.bf16.vlgmr.msrb.gmra.mxu3 %v7985_v2 }
0x2207   : > { %4739 = vmatpush.bf16.msra.mxu3 %v6500_v47 }
0x226d   : > { %v4388_v43 = vpop.f32.mrf.mxu0 }
0x2275   : > { %v4390_v48 = vpop.f32.mrf.mxu0 }
0x2279   : > { %v4369_v10 = vpop.f32.mrf.mxu3 }
0x227a   : > { %v4389_v53 = vadd.f32 %v4388_v43, %v4369_v10  ;;  %v6499_v10 = vld [vmem:[#allocation17 + $0x50] sm:$0xff] }
0x227b   : > { %4740 = vmatpush.bf16.msra.mxu3 %v6499_v10 }
0x2281   : > { %v4371_v63 = vpop.f32.mrf.mxu3 }
0x2283   : > { %v4438_v20 = vpop.f32.mrf.mxu2 }
0x2284   : > { %v4442_v51 = vadd.f32 %v4438_v20, %v4389_v53  ;;  %v4579_v20 = vperm.slane %v7969_v18, 6 }
0x2289   : > { %v4456_v52 = vpop.f32.mrf.mxu3 }
0x228a   : > { %v4460_v23 = vmul.f32 0.35355338, %v4456_v52  ;;  %v4581_v52 = vperm.slane %v7969_v18, 7  ;;  %v6511_v18 = vld [vmem:[%s8175_s12 + $0x30] sm:$0xff] }
0x228b   : > { %v4440_v54 = vpop.f32.mrf.mxu2 }
0x228c   : > { %v4461_v49 = vadd.f32 %v7993_v56, %v4460_v23  ;;  %v6484_v56 = vld [vmem:[#allocation14 + $0x58] sm:$0xff] }
0x228d   : > { %4548 = vmatpush.bf16.msrb.mxu1 %v6484_v56 }
0x228e   : > { %v4462_v3 = vsel %vm1143_vm15, %v4461_v49, -inf }
0x228f   : > { %4463 = vmax.xlane.f32.xlu0 %v4462_v3 }
0x2291   : > { %v4458_v6 = vpop.f32.mrf.mxu3  ;;  %4549 = vmatpush.bf16.msrb.mxu1 %v6483_v29 }
0x2292   : > { %v6498_v6 = vld [vmem:[#allocation17 + $0x48] sm:$0xff] }
0x2293   : > { %4741 = vmatpush.bf16.msra.mxu3 %v6498_v6 }
0x2295   : > { %4550 = vmatpush.bf16.msrb.mxu1 %v6482_v31  ;;  %v6512_v31 = vld [vmem:[%s8175_s12 + $0x38] sm:$0xff] }
0x2296   : > { %4843 = vmatpush.bf16.msrb.mxu0 %v6512_v31 }
0x2299   : > { %4551 = vmatpush.bf16.msrb.mxu1 %v6481_v16 }
0x229a   : > { %4844 = vmatpush.bf16.msrb.mxu0 %v6511_v18 }
0x2302   : > { %v4464_v58 = vpop.xlane.xlu0 %4463 }
0x2303   : > { %v4465_v60 = vsub.f32 %v4461_v49, %v4464_v58  ;;  %v6497_v58 = vld [vmem:[#allocation17 + $0x40] sm:$0xff] }
0x2304   : > { %4742 = vmatpush.bf16.msra.mxu3 %v6497_v58 }
0x2305   : > { %v4466_v62 = vmul.f32 1.442695, %v4465_v60  ;;  %v6662_v60 = vld [vmem:[%s8105_s19 + $0x1] ss:$0 sm:$0xff] }
0x2307   : > { %6772 = vpow2.f32 %v4466_v62 }
0x230d   : > { %v6773_v2 = vpop.eup %6772 }
0x230e   : > { %v4468_v15 = vsel %vm1143_vm15, %v6773_v2, 0.0 }
0x230f   : > { %4469 = vadd.xlane.f32.xlu0 %v4468_v15 }
0x2382   : > { %v4470_v9 = vpop.xlane.xlu0 %4469 }
0x2383   : > { %6774 = vrcp.f32 %v4470_v9 }
0x2389   : > { %v6775_v12 = vpop.eup %6774 }
0x238a   : > { %v4472_v13 = vmul.f32 %v6775_v12, %v6773_v2 }
0x238c   : > { %v4473_v14 = vpack.c.bf16 %v4472_v13, %v4472_v13 }
0x238e   : > { %6115 = vmatmul.msk.bf16.vlgmr.msra.gmra.mxu0 %vm1143_vm15, %v4473_v14 }
0x240b   : > { %v4489_v17 = vpop.f32.mrf.mxu0 }
0x240c   : > { %v4493_v59 = vadd.f32 %v4489_v17, %v4442_v51 }
0x240e   : > { %v4494_v22 = vpack.c.bf16 %v4493_v59, %v4493_v59  ;;  %v6510_v59 = vld [vmem:[%s8175_s12 + $0x28] sm:$0xff] }
0x240f   : > { %4845 = vmatpush.bf16.msrb.mxu0 %v6510_v59 }
0x2410   : > { %4552 = vmatmul.bf16.vlgmr.msrb.gmra.mxu1 %v4494_v22  ;;  %v6509_v22 = vld [vmem:[%s8175_s12 + $0x20] sm:$0xff] }
0x2413   : > { %v4491_v55 = vpop.f32.mrf.mxu0  ;;  %4846 = vmatpush.bf16.msrb.mxu0 %v6509_v22 }
0x2414   : > { %v6507_v55 = vld [vmem:[%s8175_s12 + $0x10] sm:$0xff] }
0x2417   : > { %4847 = vmatpush.bf16.msrb.mxu0 %v6508_v11 }
0x241b   : > { %4848 = vmatpush.bf16.msrb.mxu0 %v6507_v55 }
0x248d   : > { %v4553_v24 = vpop.f32.mrf.mxu1 }
0x248e   : > { %v4554_v25 = vadd.f32 %v4553_v24, %v4495_v4  ;;  %v6506_v4 = vld [vmem:[%s8175_s12 + $0x8] sm:$0xff]  ;;  %v6505_v24 = vld [vmem:[%s8175_s12] sm:$0xff] }
0x248f   : > { %4849 = vmatpush.bf16.msrb.mxu0 %v6506_v4 }
0x2490   : > { %v4557_v26 = vadd.f32 %v4554_v25, %v7979_v57  ;;  %v6491_v57 = vld [vmem:[#allocation16 + $0x50] sm:$0xff] }
0x2491   : > { %4676 = vmatpush.bf16.msrb.mxu2 %v6491_v57 }
0x2492   : > { %4558 = vadd.xlane.f32.xlu1 %v4557_v26 }
0x2493   : > { %4850 = vmatpush.bf16.msrb.mxu0 %v6505_v24 }
0x2495   : > { %v4555_v7 = vpop.f32.mrf.mxu1  ;;  %4677 = vmatpush.bf16.msrb.mxu2 %v6490_v34 }
0x2499   : > { %4678 = vmatpush.bf16.msrb.mxu2 %v6489_v27 }
0x2505   : > { %v4559_v19 = vpop.xlane.xlu1 %4558 }
0x2506   : > { %v4560_v1 = vmul.f32 0.03125, %v4559_v19 }
0x2508   : > { %v4561_v21 = vsub.f32 %v4557_v26, %v4560_v1 }
0x250a   : > { %v4562_v0 = vsel %vm1286_vm12, %v4561_v21, 0.0 }
0x250b   : > { %v4563_v30 = vmul.f32 %v4562_v0, %v4562_v0  ;;  %v5857_v0 = vld [vmem:[%s8106_s20 + $0x18] sm:$0x3] }
0x250c   : > { %v4770_v35 = vperm.slane %v5857_v0, 0  ;;  %v4772_v57 = vperm.slane %v5857_v0, 1 }
0x250d   : > { %4564 = vadd.xlane.f32.xlu2 %v4563_v30 }
0x2580   : > { %v4565_v42 = vpop.xlane.xlu2 %4564 }
0x2581   : > { %v4566_v40 = vmul.f32 0.03125, %v4565_v42  ;;  %v6663_v42 = vld [vmem:[%s8179_s28] ss:$0 sm:$0xff] }
0x2583   : > { %v4567_v39 = vadd.f32 1e-05, %v4566_v40 }
0x2585   : > { %6776 = vrsqrt.f32 %v4567_v39  ;;  %vm4574_vm8 = vweird.f32 %v4567_v39 }
0x258b   : > { %v6777_v45 = vpop.eup %6776 }
0x258c   : > { %v4569_v46 = vmul.f32 %v6777_v45, %v4567_v39  ;;  %vm4575_vm5 = vweird.f32 %v6777_v45 }
0x258d   : > { %vm4576_vm9 = vmor %vm4574_vm8, %vm4575_vm5 }
0x258e   : > { %v4570_v43 = vmul.f32 %v6777_v45, %v4569_v46 }
0x2590   : > { %v4571_v48 = vmul.f32 0.5, %v4570_v43 }
0x2592   : > { %v4572_v53 = vsub.f32 1.5, %v4571_v48 }
0x2594   : > { %v4573_v63 = vmul.f32 %v6777_v45, %v4572_v53 }
0x2596   : > { %v4577_v51 = vsel %vm4576_vm9, %v6777_v45, %v4573_v63 }
0x2597   : > { %v4578_v23 = vmul.f32 %v4577_v51, %v4561_v21 }
0x2599   : > { %v4580_v54 = vmul.f32 %v4579_v20, %v4578_v23 }
0x259b   : > { %v4582_v49 = vadd.f32 %v4581_v52, %v4580_v54 }
0x259d   : > { %v4619_v3 = vpack.c.bf16 %v4582_v49, %v4582_v49 }
0x259f   : > { %4679 = vmatmul.bf16.vlgmr.msrb.gmra.mxu2 %v4619_v3 }
0x2622   : > { %v4680_v62 = vpop.f32.mrf.mxu2 }
0x2623   : > { %v4681_v2 = vadd.f32 %v6662_v60, %v4680_v62 }
0x2625   : > { %v4684_v15 = vmax.f32 %v4681_v2, 0.0 }
0x2627   : > { %v4685_v5 = vpack.c.bf16 %v4684_v15, %v4684_v15 }
0x2629   : > { %4743 = vmatmul.bf16.vlgmr.msra.gmra.mxu3 %v4685_v5 }
0x262a   : > { %v4682_v50 = vpop.f32.mrf.mxu2 }
0x26ac   : > { %v4744_v38 = vpop.f32.mrf.mxu3 }
0x26ad   : > { %v4745_v56 = vadd.f32 %v4744_v38, %v4686_v8 }
0x26af   : > { %v4748_v29 = vadd.f32 %v4745_v56, %v4582_v49 }
0x26b1   : > { %4749 = vadd.xlane.f32.xlu0 %v4748_v29 }
0x26b4   : > { %v4746_v9 = vpop.f32.mrf.mxu3 }
0x2724   : > { %v4750_v12 = vpop.xlane.xlu0 %4749 }
0x2725   : > { %v4751_v13 = vmul.f32 0.03125, %v4750_v12 }
0x2727   : > { %v4752_v14 = vsub.f32 %v4748_v29, %v4751_v13 }
0x2729   : > { %v4753_v16 = vsel %vm1286_vm12, %v4752_v14, 0.0 }
0x272a   : > { %v4754_v17 = vmul.f32 %v4753_v16, %v4753_v16 }
0x272c   : > { %4755 = vadd.xlane.f32.xlu1 %v4754_v17 }
0x279f   : > { %v4756_v25 = vpop.xlane.xlu1 %4755 }
0x27a0   : > { %v4757_v26 = vmul.f32 0.03125, %v4756_v25 }
0x27a2   : > { %v4758_v7 = vadd.f32 1e-05, %v4757_v26 }
0x27a4   : > { %6778 = vrsqrt.f32 %v4758_v7  ;;  %vm4765_vm12 = vweird.f32 %v4758_v7 }
0x27aa   : > { %v6779_v28 = vpop.eup %6778 }
0x27ab   : > { %v4760_v19 = vmul.f32 %v6779_v28, %v4758_v7  ;;  %vm4766_vm10 = vweird.f32 %v6779_v28 }
0x27ac   : > { %vm4767_vm13 = vmor %vm4765_vm12, %vm4766_vm10 }
0x27ad   : > { %v4761_v1 = vmul.f32 %v6779_v28, %v4760_v19 }
0x27af   : > { %v4762_v21 = vmul.f32 0.5, %v4761_v1 }
0x27b1   : > { %v4763_v30 = vsub.f32 1.5, %v4762_v21 }
0x27b3   : > { %v4764_v33 = vmul.f32 %v6779_v28, %v4763_v30 }
0x27b5   : > { %v4768_v32 = vsel %vm4767_vm13, %v6779_v28, %v4764_v33 }
0x27b6   : > { %v4769_v61 = vmul.f32 %v4768_v32, %v4752_v14 }
0x27b8   : > { %v4771_v34 = vmul.f32 %v4770_v35, %v4769_v61 }
0x27ba   : > { %v4773_v27 = vadd.f32 %v4772_v57, %v4771_v34 }
0x27bc   : > { %v4774_v37 = vpack.c.bf16 %v4773_v27, %v4773_v27 }
0x27be   : > { %4851 = vmatmul.bf16.vlgmr.msrb.gmra.mxu0 %v4774_v37 }
0x283b   : > { %v4852_v40 = vpop.f32.mrf.mxu0 }
0x283c   : > { %v4853_v36 = vadd.f32 %v6663_v42, %v4852_v40 }
0x283e   : > { %4856 = vst [vmem:[%s880_s4] sm:$0xff] %v4853_v36 }
0x283f   : > { %7108 = shalt.err (!%p7105_p8)
}
0x2840   : > { %6553 = dma.vmem_to_hbm [thread:$0]  (%p7343_p5), %s4871_s23, 128, %s4873_s27, %s4858_s6  }
0x2843   : > { %v4854_v39 = vpop.f32.mrf.mxu0 }
0x2844 PF: > { %s8180_s30 = sld [smem:[#allocation30_spill]] }
0x2845   : > { %s8181_s0 = sld [smem:[#allocation27_spill]] }
0x284a   : > { %p6610_p9 = scmp.ge.s32.totalorder %s8180_s30, 2 }
0x284b   : > { %s4884_s28 = sand.u32 1, %s8181_s0  }
0x284c   : > { %p6587_p10 = pnand %p6610_p9, %p7347_p6  ;;  %s4885_s4 = scalar_lea.sflag [#allocation4], %s4884_s28 }
0x284e   : > { %p6588_p11 = pneg %p6587_p10 }
0x2850   : > { %7150 = dma.done.wait (%p6588_p11), %s4885_s4, 128  }
0x2851   : > { %7152 = vsyncadd (%p6588_p11), %s4885_s4, 4294967168  ;;  %s8183_s25 = sld [smem:[#allocation31_spill]] }
0x2852   : > { %s8184_s4 = sld [smem:[#allocation28_spill]] }
0x2853   : > { %s8185_s30 = sld [smem:[#allocation29_spill]] }
0x2854   : > { %s8186_s24 = sld [smem:[#allocation32_spill]] }
0x2857   : > { %p39_p12 = scmp.ge.s32.totalorder %s8183_s25, 4  }
0x2859   :  { %41 = sbr.rel (!%p39_p12) target bundleno = 24 (0x18), region = 209 }
0x285e   :  { %4891 = vsyncpa [#allocation3], 1 }
0x285f   :  { %4893 = vsyncpa [#allocation3 + $0x1], 1 }
0x2860   :  { %4894 = vsyncpa [#allocation6], 1 }
0x2861   :  { %4895 = vsyncpa [#allocation9], 1 }
0x2862   :  { %4896 = vsyncpa [#allocation12], 1 }
0x2863   :  { %4897 = vsyncpa [#allocation15], 1 }
0x2864   :  { %4898 = vsyncpa [#allocation18], 1 }
0x2865   :  { %4899 = vsyncpa [#allocation4], 1 }
0x2866   :  { %4901 = vsyncpa [#allocation4 + $0x1], 1 }

</bundles_post_ra>
